<compile_context>
chip_gen: v6e
topology: v6e:2x2x1
jax: 0.10.0
libtpu: 0.0.40
codegen_flags: <defaults>
</compile_context>

<pallas_src>
import jax
import jax.numpy as jnp
from jax.experimental import pallas as pl
from jax.experimental.pallas import tpu as pltpu


D_IN = 784           # 28*28
D_H = 1200
D_OUT = 10
D_IN_PAD = 896       # 7 * 128  (lane-aligned K for fc1)
D_H_PAD = 1280       # 10 * 128 (lane-aligned hidden dim)
D_OUT_PAD = 128      # lane-dense output, sliced back to 10 in the wrapper


def _round_up(x, m):
    return (x + m - 1) // m * m


def _mlp_kernel(x_ref, w1_ref, w2_ref, w3_ref, o_ref):
    # x_ref : [TM, 896]        bf16  (zero-padded features)
    # w1_ref: [896, 1280]      bf16  (fc1.weight.T, zero-padded)
    # w2_ref: [1280, 1280]     bf16  (fc2.weight.T, zero-padded)
    # w3_ref: [1280, 128]      bf16  (fc3.weight.T, zero-padded)
    # o_ref : [TM, 128]        bf16
    x = x_ref[...]
    h1 = jnp.dot(x, w1_ref[...], preferred_element_type=jnp.float32)
    h1 = jnp.maximum(h1, 0.0)                                   # HalfRect1 (f32)
    # dropout1: identity in eval mode
    h2 = jnp.dot(h1.astype(jnp.bfloat16), w2_ref[...],
                 preferred_element_type=jnp.float32)
    h2 = jnp.maximum(h2, 0.0)                                   # HalfRect2 (f32)
    # dropout2: identity in eval mode
    h3 = jnp.dot(h2.astype(jnp.bfloat16), w3_ref[...],
                 preferred_element_type=jnp.float32)
    o_ref[...] = jnp.maximum(h3, 0.0).astype(o_ref.dtype)       # HalfRect3


def prepare_weights(w1, w2, w3):
    """One-time weight prep (do NOT call per forward).
    w1: [1200, 784], w2: [1200, 1200], w3: [10, 1200] (PyTorch nn.Linear layout).
    Returns bf16, transposed-to-[in, out], zero-padded weights."""
    w1t = jnp.pad(jnp.transpose(w1), ((0, D_IN_PAD - D_IN), (0, D_H_PAD - D_H)))
    w2t = jnp.pad(jnp.transpose(w2), ((0, D_H_PAD - D_H), (0, D_H_PAD - D_H)))
    w3t = jnp.pad(jnp.transpose(w3), ((0, D_H_PAD - D_H), (0, D_OUT_PAD - D_OUT)))
    # TODO(synk): optional weight-only quant path (int8 on v5e/v6e, fp8-e4m3 on v7x)
    # would halve the small-batch HBM weight-fetch floor; needs accuracy validation,
    # so the default stays bf16.
    return (w1t.astype(jnp.bfloat16),
            w2t.astype(jnp.bfloat16),
            w3t.astype(jnp.bfloat16))


def _pick_batch_tile(B):
    """Pick TM: multiple of 16 always (bf16 sublane packing); >=128 and >=2 tiles
    when the batch is big enough to split across v7x's two TensorCores."""
    if B >= 2048:
        return 1024                        # many tiles; ~0.35us/step overhead ~5%
    if B >= 512:
        return _round_up(B, 256) // 2      # exactly two tiles, each a multiple of 128
    return max(16, _round_up(B, 16))       # single tile for small batches


def network_ann_forward(x, w1t, w2t, w3t):
    """x: anything reshapable to [-1, 784] (e.g. [B,1,28,28]).
    w1t/w2t/w3t: outputs of prepare_weights (already transposed/padded/bf16)."""
    x2d = x.reshape(-1, D_IN)
    B = x2d.shape[0]

    TM = _pick_batch_tile(B)
    B_pad = _round_up(B, TM)
    num_tiles = B_pad // TM

    x2d = x2d.astype(jnp.bfloat16)
    x2d = jnp.pad(x2d, ((0, B_pad - B), (0, D_IN_PAD - D_IN)))

    # Megacore split only when each TC gets enough rows to amortize its own ~6 MiB
    # weight fetch; small/medium batches are weight-HBM-bound -> keep one core.
    use_parallel = (num_tiles >= 2) and (B_pad >= 1024)

    cost = pl.CostEstimate(
        flops=2 * B_pad * (D_IN_PAD * D_H_PAD + D_H_PAD * D_H_PAD
                           + D_H_PAD * D_OUT_PAD),
        transcendentals=0,
        bytes_accessed=(x2d.size * 2 + w1t.size * 2 + w2t.size * 2 + w3t.size * 2
                        + B_pad * D_OUT_PAD * 2),
    )

    out = pl.pallas_call(
        _mlp_kernel,
        out_shape=jax.ShapeDtypeStruct((B_pad, D_OUT_PAD), jnp.bfloat16),
        grid=(num_tiles,),
        in_specs=[
            pl.BlockSpec((TM, D_IN_PAD), lambda i: (i, 0)),       # streamed x tiles
            pl.BlockSpec((D_IN_PAD, D_H_PAD), lambda i: (0, 0)),  # resident weights
            pl.BlockSpec((D_H_PAD, D_H_PAD), lambda i: (0, 0)),
            pl.BlockSpec((D_H_PAD, D_OUT_PAD), lambda i: (0, 0)),
        ],
        out_specs=pl.BlockSpec((TM, D_OUT_PAD), lambda i: (i, 0)),
        compiler_params=pltpu.CompilerParams(
            dimension_semantics=(("parallel",) if use_parallel else ("arbitrary",)),
            vmem_limit_bytes=48 << 20,     # fits v7x's 64 MiB physical VMEM
        ),
        cost_estimate=cost,
    )(x2d, w1t, w2t, w3t)

    return out[:B, :D_OUT].astype(jnp.float32)


def _reference_forward(x, w1, w2, w3):
    x2d = x.reshape(-1, D_IN).astype(jnp.float32)
    h1 = jnp.maximum(x2d @ w1.T, 0.0)
    h2 = jnp.maximum(h1 @ w2.T, 0.0)
    h3 = jnp.maximum(h2 @ w3.T, 0.0)
    return h3


if __name__ == "__main__":
    key = jax.random.PRNGKey(0)
    k_x, k1, k2, k3 = jax.random.split(key, 4)

    # Small deterministic example: batch of 8 MNIST-shaped images (NCHW).
    batch = 8
    x = jax.random.normal(k_x, (batch, 1, 28, 28), dtype=jnp.float32)

    # Deterministic parameter init (Kaiming-uniform-ish scale, not a checkpoint).
    w1 = jax.random.uniform(k1, (D_H, D_IN), jnp.float32, -1.0, 1.0) * (1.0 / jnp.sqrt(D_IN))
    w2 = jax.random.uniform(k2, (D_H, D_H), jnp.float32, -1.0, 1.0) * (1.0 / jnp.sqrt(D_H))
    w3 = jax.random.uniform(k3, (D_OUT, D_H), jnp.float32, -1.0, 1.0) * (1.0 / jnp.sqrt(D_H))

    # One-time weight preparation (transpose + pad + bf16 cast), outside the fwd path.
    w1t, w2t, w3t = prepare_weights(w1, w2, w3)
    w1t, w2t, w3t = jax.block_until_ready((w1t, w2t, w3t))

    out = network_ann_forward(x, w1t, w2t, w3t)
    out = jax.block_until_ready(out)

    ref = _reference_forward(x, w1, w2, w3)
    assert out.shape == (batch, D_OUT)
    # bf16 matmul inputs / bf16 output with f32 accumulation through two 1200-wide
    # contractions: expect ~1e-2 relative error vs the f32 reference.
    assert jnp.allclose(out, ref, atol=5e-2, rtol=5e-2), "mismatch vs reference"

    print("KERNEL_OK")
</pallas_src>

<mosaic_0001>
module attributes {stable_mosaic.version = 11 : i64} {
  func.func @_mlp_kernel(%arg0: i32, %arg1: memref<16x896xbf16, #tpu.memory_space<vmem>>, %arg2: memref<896x1280xbf16, #tpu.memory_space<vmem>>, %arg3: memref<1280x1280xbf16, #tpu.memory_space<vmem>>, %arg4: memref<1280x128xbf16, #tpu.memory_space<vmem>>, %arg5: memref<16x128xbf16, #tpu.memory_space<vmem>>) attributes {dimension_semantics = [#tpu.dimension_semantics<arbitrary>], iteration_bounds = array<i64: 1>, scalar_prefetch = 0 : i64, scratch_operands = 0 : i64, tpu.core_type = #tpu.core_type<tc>, window_params = [{transform_indices = @transform_0, window_bounds = array<i64: 16, 896>}, {pipeline_mode = #tpu.pipeline_mode<synchronous>, transform_indices = @transform_1, window_bounds = array<i64: 896, 1280>}, {pipeline_mode = #tpu.pipeline_mode<synchronous>, transform_indices = @transform_2, window_bounds = array<i64: 1280, 1280>}, {pipeline_mode = #tpu.pipeline_mode<synchronous>, transform_indices = @transform_3, window_bounds = array<i64: 1280, 128>}, {transform_indices = @transform_4, window_bounds = array<i64: 16, 128>}]} {
    %c0 = arith.constant 0 : index
    %c0_0 = arith.constant 0 : index
    %0 = vector.load %arg1[%c0, %c0_0] : memref<16x896xbf16, #tpu.memory_space<vmem>>, vector<16x896xbf16>
    %c0_1 = arith.constant 0 : index
    %c0_2 = arith.constant 0 : index
    %1 = vector.load %arg2[%c0_1, %c0_2] : memref<896x1280xbf16, #tpu.memory_space<vmem>>, vector<896x1280xbf16>
    %cst = arith.constant dense<0.000000e+00> : vector<16x1280xf32>
    %2 = tpu.matmul %0, %1, %cst {dimension_numbers = #tpu.dot_dimension_numbers<[1], [0], [0], [1], [0, 0, 1, 1], [], []>} : vector<16x896xbf16>, vector<896x1280xbf16>, vector<16x1280xf32> -> vector<16x1280xf32>
    %cst_3 = arith.constant 0.000000e+00 : f32
    %3 = vector.broadcast %cst_3 : f32 to vector<16x1280xf32>
    %4 = arith.maximumf %2, %3 : vector<16x1280xf32>
    %5 = arith.truncf %4 : vector<16x1280xf32> to vector<16x1280xbf16>
    %c0_4 = arith.constant 0 : index
    %c0_5 = arith.constant 0 : index
    %6 = vector.load %arg3[%c0_4, %c0_5] : memref<1280x1280xbf16, #tpu.memory_space<vmem>>, vector<1280x1280xbf16>
    %cst_6 = arith.constant dense<0.000000e+00> : vector<16x1280xf32>
    %7 = tpu.matmul %5, %6, %cst_6 {dimension_numbers = #tpu.dot_dimension_numbers<[1], [0], [0], [1], [0, 0, 1, 1], [], []>} : vector<16x1280xbf16>, vector<1280x1280xbf16>, vector<16x1280xf32> -> vector<16x1280xf32>
    %cst_7 = arith.constant 0.000000e+00 : f32
    %8 = vector.broadcast %cst_7 : f32 to vector<16x1280xf32>
    %9 = arith.maximumf %7, %8 : vector<16x1280xf32>
    %10 = arith.truncf %9 : vector<16x1280xf32> to vector<16x1280xbf16>
    %c0_8 = arith.constant 0 : index
    %c0_9 = arith.constant 0 : index
    %11 = vector.load %arg4[%c0_8, %c0_9] : memref<1280x128xbf16, #tpu.memory_space<vmem>>, vector<1280x128xbf16>
    %cst_10 = arith.constant dense<0.000000e+00> : vector<16x128xf32>
    %12 = tpu.matmul %10, %11, %cst_10 {dimension_numbers = #tpu.dot_dimension_numbers<[1], [0], [0], [1], [0, 0, 1, 1], [], []>} : vector<16x1280xbf16>, vector<1280x128xbf16>, vector<16x128xf32> -> vector<16x128xf32>
    %cst_11 = arith.constant 0.000000e+00 : f32
    %13 = vector.broadcast %cst_11 : f32 to vector<16x128xf32>
    %14 = arith.maximumf %12, %13 : vector<16x128xf32>
    %15 = arith.truncf %14 : vector<16x128xf32> to vector<16x128xbf16>
    %c0_12 = arith.constant 0 : index
    %c0_13 = arith.constant 0 : index
    %16 = vector.load %arg5[%c0_12, %c0_13] : memref<16x128xbf16, #tpu.memory_space<vmem>>, vector<16x128xbf16>
    tpu.vector_store %arg5[%c0_12, %c0_13], %15 {strides = array<i32>} : memref<16x128xbf16, #tpu.memory_space<vmem>>, vector<16x128xbf16>,
    return
  }
  func.func @transform_0(%arg0: i32) -> (i32, i32) {
    %c0_i32 = arith.constant 0 : i32
    %c0_i32_0 = arith.constant 0 : i32
    return %arg0, %c0_i32 : i32, i32
  }
  func.func @transform_1(%arg0: i32) -> (i32, i32) {
    %c0_i32 = arith.constant 0 : i32
    %c0_i32_0 = arith.constant 0 : i32
    %c0_i32_1 = arith.constant 0 : i32
    return %c0_i32, %c0_i32_0 : i32, i32
  }
  func.func @transform_2(%arg0: i32) -> (i32, i32) {
    %c0_i32 = arith.constant 0 : i32
    %c0_i32_0 = arith.constant 0 : i32
    %c0_i32_1 = arith.constant 0 : i32
    return %c0_i32, %c0_i32_0 : i32, i32
  }
  func.func @transform_3(%arg0: i32) -> (i32, i32) {
    %c0_i32 = arith.constant 0 : i32
    %c0_i32_0 = arith.constant 0 : i32
    %c0_i32_1 = arith.constant 0 : i32
    return %c0_i32, %c0_i32_0 : i32, i32
  }
  func.func @transform_4(%arg0: i32) -> (i32, i32) {
    %c0_i32 = arith.constant 0 : i32
    %c0_i32_0 = arith.constant 0 : i32
    return %arg0, %c0_i32 : i32, i32
  }
}

</mosaic_0001>

<bundles_post_ra>
// kernel: tpu_custom_call.1
= control target key start
LH: loop header
LB: loop body
LE: loop exit
PB: predicated region body
PF: predicated region fallthrough
CT: control target
= control target key end

     0   :  { %9 = vsyncpa [#allocation3], 0  ;;  %s15429_s0 = inlined_call_operand.hbm [shape: bf16[16,896], index: 0, kind: input, shape index: {}]   ;;  %s15430_s1 = inlined_call_operand.hbm [shape: bf16[896,1280], index: 1, kind: input, shape index: {}]   ;;  %s15431_s2 = inlined_call_operand.hbm [shape: bf16[1280,1280], index: 2, kind: input, shape index: {}]   ;;  %s15432_s3 = inlined_call_operand.hbm [shape: bf16[1280,128], index: 3, kind: input, shape index: {}]   ;;  %s15433_s4 = inlined_call_operand.hbm [shape: bf16[16,128], index: 4, kind: output, shape index: {}]  }
   0x1   :  { %10 = vsyncpa [#allocation6], 0 }
   0x2   :  { %11 = vsyncpa [#allocation9], 0 }
   0x3   :  { %12 = vsyncpa [#allocation4], 0  ;;  %s14979_s15 = smov [#allocation5]  }
   0x4   :  { %s30_s16 = sshll.u32 %s14979_s15, 4  ;;  %s31_s16 = int_to_ptr.vmem [resolvable:$true] %s30_s16 }
   0x5   :  { %s14879_s17 = scalar_lea.vmem %s31_s16, 71680  ;;  %p14884_p1 = scmp.lt.s32.totalorder %s31_s16, %s31_s16 }
   0x6   :  { %p14880_p0 = scmp.ne.s32.totalorder %s31_s16, %s14879_s17  ;;  %p14885_p2 = scmp.lt.s32.totalorder %s14879_s17, %s14879_s17 }
   0x8   :  { %p14886_p3 = por %p14885_p2, %p14884_p1 }
   0xa   :  { %p14887_p4 = pnand %p14886_p3, %p14880_p0 }
   0xc   :  { %14890 = shalt.err (!%p14887_p4)
}
   0xd   :  { %s14980_s18 = smov 640   ;;  %s14981_s19 = smov 40  }
   0xe   :  { %36 = dma.hbm_to_vmem [thread:$0]  %s15430_s1, 71680, %s31_s16, [#allocation6], %s14980_s18, %s14980_s18, %s14981_s19  }
   0xf   :  { %s14982_s22 = smov [#allocation2]  }
  0x10   :  { %s18_s23 = sshll.u32 %s14982_s22, 4  ;;  %s19_s23 = int_to_ptr.vmem [resolvable:$true] %s18_s23 }
  0x11   :  { %s14899_s24 = scalar_lea.vmem %s19_s23, 896  ;;  %p14904_p6 = scmp.lt.s32.totalorder %s19_s23, %s19_s23 }
  0x12   :  { %p14900_p5 = scmp.ne.s32.totalorder %s19_s23, %s14899_s24  ;;  %p14905_p7 = scmp.lt.s32.totalorder %s14899_s24, %s14899_s24 }
  0x14   :  { %p14906_p8 = por %p14905_p7, %p14904_p6 }
  0x16   :  { %p14907_p9 = pnand %p14906_p8, %p14900_p5 }
  0x18   :  { %14910 = shalt.err (!%p14907_p9)
}
  0x19   :  { %s14983_s25 = smov 448   ;;  %s14984_s26 = smov 28  }
  0x1a   :  { %24 = dma.hbm_to_vmem [thread:$0]  %s15429_s0, 896, %s19_s23, [#allocation3], %s14983_s25, %s14983_s25, %s14984_s26  }
  0x1b   :  { %s14985_s29 = smov [#allocation7]   ;;  %s14986_s5 = smov [#allocation8]  }
  0x1c   :  { %s42_s30 = sshll.u32 %s14985_s29, 4  ;;  %s54_s1 = sshll.u32 %s14986_s5, 4  ;;  %s43_s30 = int_to_ptr.vmem [resolvable:$true] %s42_s30  ;;  %s55_s1 = int_to_ptr.vmem [resolvable:$true] %s54_s1 }
  0x1d   :  { %s14919_s6 = scalar_lea.vmem %s43_s30, 102400  ;;  %p14924_p11 = scmp.lt.s32.totalorder %s43_s30, %s43_s30 }
  0x1e   :  { %p14920_p10 = scmp.ne.s32.totalorder %s43_s30, %s14919_s6  ;;  %p14925_p12 = scmp.lt.s32.totalorder %s14919_s6, %s14919_s6 }
  0x20   :  { %p14926_p13 = por %p14925_p12, %p14924_p11 }
  0x22   :  { %p14927_p0 = pnand %p14926_p13, %p14920_p10 }
  0x24   :  { %14930 = shalt.err (!%p14927_p0)
}
  0x25   :  { %48 = dma.hbm_to_vmem [thread:$0]  %s15431_s2, 102400, %s43_s30, [#allocation6], %s14980_s18, %s14980_s18, %s14981_s19  }
  0x26   :  { %s14939_s0 = scalar_lea.vmem %s55_s1, 10240  ;;  %p14944_p2 = scmp.lt.s32.totalorder %s55_s1, %s55_s1 }
  0x27   :  { %p14940_p1 = scmp.ne.s32.totalorder %s55_s1, %s14939_s0  ;;  %p14945_p3 = scmp.lt.s32.totalorder %s14939_s0, %s14939_s0 }
  0x29   :  { %p14946_p4 = por %p14945_p3, %p14944_p2 }
  0x2b   :  { %p14947_p5 = pnand %p14946_p4, %p14940_p1 }
  0x2d   :  { %14950 = shalt.err (!%p14947_p5)
}
  0x2e   :  { %s14987_s9 = smov 64   ;;  %s14988_s10 = smov 4  }
  0x2f   :  { %60 = dma.hbm_to_vmem [thread:$0]  %s15432_s3, 10240, %s55_s1, [#allocation9], %s14987_s9, %s14987_s9, %s14988_s10  }
  0x30   :  { %14971 = dma.done.wait [#allocation3], 896  }
  0x31   :  { %14972 = vsyncadd [#allocation3], 4294966400 }
  0x32   :  { %14973 = dma.done.wait [#allocation6], 174080  }
  0x33   :  { %14974 = vsyncadd [#allocation6], 4294793216 }
  0x34   :  { %14975 = dma.done.wait [#allocation9], 10240  }
  0x35   :  { %14976 = vsyncadd [#allocation9], 4294957056  ;;  %v12727_v0 = vld [vmem:[#allocation5 + $0x234] ss:$40 sps:$4 sm:$0xff]   ;;  %v12731_v2 = vld [vmem:[#allocation5 + $0x230] ss:$40 sps:$4 sm:$0xff]  }
  0x36   :  { %v12729_v1 = vld [vmem:[#allocation5 + $0x734] ss:$40 sps:$4 sm:$0xff]   ;;  %3478 = vmatprep.subr.bf16.mxu0 %v12727_v0  ;;  %v12732_v3 = vld [vmem:[#allocation5 + $0x730] ss:$40 sps:$4 sm:$0xff]   ;;  %v12733_v4 = vld [vmem:[#allocation5 + $0x1e4] ss:$40 sps:$4 sm:$0xff]  }
  0x37   :  { %3521 = vmatprep.subr.bf16.mxu1 %v12729_v1  ;;  %3479 = vmatpush1.bf16.msra.mxu0 %v12731_v2  ;;  %v12735_v5 = vld [vmem:[#allocation5 + $0x6e4] ss:$40 sps:$4 sm:$0xff]   ;;  %v12737_v6 = vld [vmem:[#allocation5 + $0x1e0] ss:$40 sps:$4 sm:$0xff]   ;;  %v12739_v8 = vld [vmem:[#allocation5 + $0x194] ss:$40 sps:$4 sm:$0xff]  }
  0x38   :  { %3522 = vmatpush1.bf16.msra.mxu1 %v12732_v3  ;;  %3480 = vmatprep.subr.bf16.mxu0 %v12733_v4  ;;  %v12738_v7 = vld [vmem:[#allocation5 + $0x6e0] ss:$40 sps:$4 sm:$0xff]   ;;  %v12741_v9 = vld [vmem:[#allocation5 + $0x694] ss:$40 sps:$4 sm:$0xff]   ;;  %v12743_v10 = vld [vmem:[#allocation5 + $0x190] ss:$40 sps:$4 sm:$0xff]  }
  0x39   :  { %3523 = vmatprep.subr.bf16.mxu1 %v12735_v5  ;;  %v12744_v11 = vld [vmem:[#allocation5 + $0x690] ss:$40 sps:$4 sm:$0xff]   ;;  %v12745_v12 = vld [vmem:[#allocation5 + $0x144] ss:$40 sps:$4 sm:$0xff]   ;;  %v12749_v14 = vld [vmem:[#allocation5 + $0x140] ss:$40 sps:$4 sm:$0xff]  }
  0x3a   :  { %v12747_v13 = vld [vmem:[#allocation5 + $0x644] ss:$40 sps:$4 sm:$0xff]   ;;  %v12750_v15 = vld [vmem:[#allocation5 + $0x640] ss:$40 sps:$4 sm:$0xff]   ;;  %v12751_v16 = vld [vmem:[#allocation5 + $0xf4] ss:$40 sps:$4 sm:$0xff]  }
  0x3b   :  { %3481 = vmatpush1.bf16.msra.mxu0 %v12737_v6  ;;  %v12753_v17 = vld [vmem:[#allocation5 + $0x5f4] ss:$40 sps:$4 sm:$0xff]   ;;  %v12755_v18 = vld [vmem:[#allocation5 + $0xf0] ss:$40 sps:$4 sm:$0xff]   ;;  %v12757_v20 = vld [vmem:[#allocation5 + $0xa4] ss:$40 sps:$4 sm:$0xff]  }
  0x3c   :  { %3524 = vmatpush1.bf16.msra.mxu1 %v12738_v7  ;;  %3482 = vmatprep.subr.bf16.mxu0 %v12739_v8  ;;  %v12756_v19 = vld [vmem:[#allocation5 + $0x5f0] ss:$40 sps:$4 sm:$0xff]   ;;  %v12759_v21 = vld [vmem:[#allocation5 + $0x5a4] ss:$40 sps:$4 sm:$0xff]   ;;  %v12761_v22 = vld [vmem:[#allocation5 + $0xa0] ss:$40 sps:$4 sm:$0xff]  }
  0x3d   :  { %3525 = vmatprep.subr.bf16.mxu1 %v12741_v9  ;;  %v12762_v23 = vld [vmem:[#allocation5 + $0x5a0] ss:$40 sps:$4 sm:$0xff]   ;;  %v12763_v24 = vld [vmem:[#allocation5 + $0x54] ss:$40 sps:$4 sm:$0xff]   ;;  %v12767_v26 = vld [vmem:[#allocation5 + $0x50] ss:$40 sps:$4 sm:$0xff]  }
  0x3e   :  { %v12765_v25 = vld [vmem:[#allocation5 + $0x554] ss:$40 sps:$4 sm:$0xff]   ;;  %v12768_v27 = vld [vmem:[#allocation5 + $0x550] ss:$40 sps:$4 sm:$0xff]   ;;  %v12769_v28 = vld [vmem:[#allocation5 + $0x4] ss:$40 sps:$4 sm:$0xff]  }
  0x3f   :  { %3483 = vmatpush1.bf16.msra.mxu0 %v12743_v10  ;;  %v12771_v29 = vld [vmem:[#allocation5 + $0x504] ss:$40 sps:$4 sm:$0xff]   ;;  %v12773_v30 = vld [vmem:[#allocation5] ss:$40 sps:$4 sm:$0xff]   ;;  %v12775_v32 = vld [vmem:[#allocation5 + $0x4b4] ss:$40 sps:$4 sm:$0xff]  }
  0x40   :  { %3526 = vmatpush1.bf16.msra.mxu1 %v12744_v11  ;;  %3484 = vmatprep.subr.bf16.mxu0 %v12745_v12  ;;  %v12774_v31 = vld [vmem:[#allocation5 + $0x500] ss:$40 sps:$4 sm:$0xff]   ;;  %v12777_v33 = vld [vmem:[#allocation5 + $0x9b4] ss:$40 sps:$4 sm:$0xff]   ;;  %v12779_v34 = vld [vmem:[#allocation5 + $0x4b0] ss:$40 sps:$4 sm:$0xff]  }
  0x41   :  { %3527 = vmatprep.subr.bf16.mxu1 %v12747_v13  ;;  %v12780_v35 = vld [vmem:[#allocation5 + $0x9b0] ss:$40 sps:$4 sm:$0xff]   ;;  %v12781_v36 = vld [vmem:[#allocation5 + $0x464] ss:$40 sps:$4 sm:$0xff]   ;;  %v12785_v38 = vld [vmem:[#allocation5 + $0x460] ss:$40 sps:$4 sm:$0xff]  }
  0x42   :  { %v12783_v37 = vld [vmem:[#allocation5 + $0x964] ss:$40 sps:$4 sm:$0xff]   ;;  %v12786_v39 = vld [vmem:[#allocation5 + $0x960] ss:$40 sps:$4 sm:$0xff]   ;;  %v12787_v40 = vld [vmem:[#allocation5 + $0x414] ss:$40 sps:$4 sm:$0xff]  }
  0x43   :  { %3485 = vmatpush1.bf16.msra.mxu0 %v12749_v14  ;;  %v12789_v41 = vld [vmem:[#allocation5 + $0x914] ss:$40 sps:$4 sm:$0xff]   ;;  %v12791_v42 = vld [vmem:[#allocation5 + $0x410] ss:$40 sps:$4 sm:$0xff]   ;;  %v12793_v44 = vld [vmem:[#allocation5 + $0x3c4] ss:$40 sps:$4 sm:$0xff]  }
  0x44   :  { %3528 = vmatpush1.bf16.msra.mxu1 %v12750_v15  ;;  %3486 = vmatprep.subr.bf16.mxu0 %v12751_v16  ;;  %v12792_v43 = vld [vmem:[#allocation5 + $0x910] ss:$40 sps:$4 sm:$0xff]   ;;  %v12795_v45 = vld [vmem:[#allocation5 + $0x8c4] ss:$40 sps:$4 sm:$0xff]   ;;  %v12797_v46 = vld [vmem:[#allocation5 + $0x3c0] ss:$40 sps:$4 sm:$0xff]  }
  0x45   :  { %3529 = vmatprep.subr.bf16.mxu1 %v12753_v17  ;;  %v12798_v47 = vld [vmem:[#allocation5 + $0x8c0] ss:$40 sps:$4 sm:$0xff]   ;;  %v12799_v49 = vld [vmem:[#allocation5 + $0x374] ss:$40 sps:$4 sm:$0xff]   ;;  %v12803_v52 = vld [vmem:[#allocation5 + $0x370] ss:$40 sps:$4 sm:$0xff]  }
  0x46   :  { %v15037_v48 = vld [vmem:[#allocation2 + $0x4] ss:$28 sps:$4 sm:$0xff]   ;;  %v15039_v50 = vld [vmem:[#allocation2 + $0xc] ss:$28 sps:$4 sm:$0xff]   ;;  %v14989_v14 = vmov 0   ;;  %s14990_s2 = smov [#allocation10]  }
  0x47   :  { %3487 = vmatpush1.bf16.msra.mxu0 %v12755_v18  ;;  %v12801_v51 = vld [vmem:[#allocation5 + $0x874] ss:$40 sps:$4 sm:$0xff]   ;;  %3510 = vmatprep.mubr.bf16.mxu0 %v15037_v48  ;;  %v12804_v53 = vld [vmem:[#allocation5 + $0x870] ss:$40 sps:$4 sm:$0xff]   ;;  %v12805_v54 = vld [vmem:[#allocation5 + $0x324] ss:$40 sps:$4 sm:$0xff]  }
  0x48   :  { %3530 = vmatpush1.bf16.msra.mxu1 %v12756_v19  ;;  %3488 = vmatprep.subr.bf16.mxu0 %v12757_v20  ;;  %v12807_v55 = vld [vmem:[#allocation5 + $0x824] ss:$40 sps:$4 sm:$0xff]   ;;  %v12809_v56 = vld [vmem:[#allocation5 + $0x320] ss:$40 sps:$4 sm:$0xff]   ;;  %v12811_v58 = vld [vmem:[#allocation5 + $0x2d4] ss:$40 sps:$4 sm:$0xff]  }
  0x49   :  { %3531 = vmatprep.subr.bf16.mxu1 %v12759_v21  ;;  %3553 = vmatprep.mubr.bf16.mxu1 %v15039_v50  ;;  %v12810_v57 = vld [vmem:[#allocation5 + $0x820] ss:$40 sps:$4 sm:$0xff]   ;;  %v12813_v59 = vld [vmem:[#allocation5 + $0x7d4] ss:$40 sps:$4 sm:$0xff]   ;;  %v12815_v60 = vld [vmem:[#allocation5 + $0x2d0] ss:$40 sps:$4 sm:$0xff]  }
  0x4a   :  { %v12816_v61 = vld [vmem:[#allocation5 + $0x7d0] ss:$40 sps:$4 sm:$0xff]   ;;  %v12817_v62 = vld [vmem:[#allocation5 + $0x284] ss:$40 sps:$4 sm:$0xff]   ;;  %v12821_v0 = vld [vmem:[#allocation5 + $0x280] ss:$40 sps:$4 sm:$0xff]  }
  0x4b   :  { %3489 = vmatpush1.bf16.msra.mxu0 %v12761_v22  ;;  %v12819_v63 = vld [vmem:[#allocation5 + $0x784] ss:$40 sps:$4 sm:$0xff]   ;;  %v12822_v1 = vld [vmem:[#allocation5 + $0x780] ss:$40 sps:$4 sm:$0xff]   ;;  %v12831_v2 = vld [vmem:[#allocation5 + $0xc34] ss:$40 sps:$4 sm:$0xff]  }
  0x4c   :  { %3532 = vmatpush1.bf16.msra.mxu1 %v12762_v23  ;;  %3490 = vmatprep.subr.bf16.mxu0 %v12763_v24  ;;  %v12834_v3 = vld [vmem:[#allocation5 + $0x1134] ss:$40 sps:$4 sm:$0xff]   ;;  %v15043_v4 = vld [vmem:[#allocation2] ss:$28 sps:$4 sm:$0xff]   ;;  %v15045_v5 = vld [vmem:[#allocation2 + $0x8] ss:$28 sps:$4 sm:$0xff]  }
  0x4d   :  { %3533 = vmatprep.subr.bf16.mxu1 %v12765_v25  ;;  %v12829_v6 = vld [vmem:[#allocation5 + $0xc30] ss:$40 sps:$4 sm:$0xff]   ;;  %v12837_v8 = vld [vmem:[#allocation5 + $0xbe4] ss:$40 sps:$4 sm:$0xff]   ;;  %v12835_v10 = vld [vmem:[#allocation5 + $0xbe0] ss:$40 sps:$4 sm:$0xff]  }
  0x4e   :  { %v12832_v7 = vld [vmem:[#allocation5 + $0x1130] ss:$40 sps:$4 sm:$0xff]   ;;  %v12840_v9 = vld [vmem:[#allocation5 + $0x10e4] ss:$40 sps:$4 sm:$0xff]   ;;  %v12838_v11 = vld [vmem:[#allocation5 + $0x10e0] ss:$40 sps:$4 sm:$0xff]  }
  0x4f   :  { %3491 = vmatpush1.bf16.msra.mxu0 %v12767_v26  ;;  %v12843_v12 = vld [vmem:[#allocation5 + $0xb94] ss:$40 sps:$4 sm:$0xff]   ;;  %v12841_v15 = vld [vmem:[#allocation5 + $0xb90] ss:$40 sps:$4 sm:$0xff]   ;;  %v12849_v17 = vld [vmem:[#allocation5 + $0xb44] ss:$40 sps:$4 sm:$0xff]  }
  0x50   :  { %3534 = vmatpush1.bf16.msra.mxu1 %v12768_v27  ;;  %3492 = vmatprep.subr.bf16.mxu0 %v12769_v28  ;;  %v12846_v13 = vld [vmem:[#allocation5 + $0x1094] ss:$40 sps:$4 sm:$0xff]   ;;  %v12844_v16 = vld [vmem:[#allocation5 + $0x1090] ss:$40 sps:$4 sm:$0xff]   ;;  %v12852_v18 = vld [vmem:[#allocation5 + $0x1044] ss:$40 sps:$4 sm:$0xff]  }
  0x51   :  { %3535 = vmatprep.subr.bf16.mxu1 %v12771_v29  ;;  %v12847_v19 = vld [vmem:[#allocation5 + $0xb40] ss:$40 sps:$4 sm:$0xff]   ;;  %v12855_v21 = vld [vmem:[#allocation5 + $0xaf4] ss:$40 sps:$4 sm:$0xff]   ;;  %v12853_v23 = vld [vmem:[#allocation5 + $0xaf0] ss:$40 sps:$4 sm:$0xff]  }
  0x52   :  { %v12850_v20 = vld [vmem:[#allocation5 + $0x1040] ss:$40 sps:$4 sm:$0xff]   ;;  %v12858_v22 = vld [vmem:[#allocation5 + $0xff4] ss:$40 sps:$4 sm:$0xff]   ;;  %v12856_v24 = vld [vmem:[#allocation5 + $0xff0] ss:$40 sps:$4 sm:$0xff]  }
  0x53   :  { %3493 = vmatpush1.bf16.msra.mxu0 %v12773_v30  ;;  %v12861_v25 = vld [vmem:[#allocation5 + $0xaa4] ss:$40 sps:$4 sm:$0xff]   ;;  %v12859_v27 = vld [vmem:[#allocation5 + $0xaa0] ss:$40 sps:$4 sm:$0xff]   ;;  %v12867_v29 = vld [vmem:[#allocation5 + $0xa54] ss:$40 sps:$4 sm:$0xff]  }
  0x54   :  { %3536 = vmatpush1.bf16.msra.mxu1 %v12774_v31  ;;  %3494 = vmatprep.subr.bf16.mxu0 %v12775_v32  ;;  %v12864_v26 = vld [vmem:[#allocation5 + $0xfa4] ss:$40 sps:$4 sm:$0xff]   ;;  %v12862_v28 = vld [vmem:[#allocation5 + $0xfa0] ss:$40 sps:$4 sm:$0xff]   ;;  %v12870_v30 = vld [vmem:[#allocation5 + $0xf54] ss:$40 sps:$4 sm:$0xff]  }
  0x55   :  { %3537 = vmatprep.subr.bf16.mxu1 %v12777_v33  ;;  %v12865_v31 = vld [vmem:[#allocation5 + $0xa50] ss:$40 sps:$4 sm:$0xff]   ;;  %v12873_v33 = vld [vmem:[#allocation5 + $0xa04] ss:$40 sps:$4 sm:$0xff]   ;;  %s11135_s3 = sshll.u32 %s14990_s2, 4  ;;  %s11136_s3 = int_to_ptr.vmem [resolvable:$true] %s11135_s3 }
  0x56   :  { %v12868_v32 = vld [vmem:[#allocation5 + $0xf50] ss:$40 sps:$4 sm:$0xff]   ;;  %s14951_s13 = scalar_lea.vmem %s11136_s3, 128  ;;  %p14956_p7 = scmp.lt.s32.totalorder %s11136_s3, %s11136_s3 }
  0x57   :  { %3495 = vmatpush2.bf16.msra.mxu0 %v12779_v34  ;;  %v12876_v34 = vld [vmem:[#allocation5 + $0xf04] ss:$40 sps:$4 sm:$0xff]   ;;  %p14952_p6 = scmp.ne.s32.totalorder %s11136_s3, %s14951_s13  ;;  %p14957_p8 = scmp.lt.s32.totalorder %s14951_s13, %s14951_s13 }
  0x58   :  { %3538 = vmatpush2.bf16.msra.mxu1 %v12780_v35  ;;  %3496 = vmatprep.subr.bf16.mxu0 %v12781_v36  ;;  %v15050_v35 = vld [vmem:[#allocation2 + $0x14] ss:$28 sps:$4 sm:$0xff]   ;;  %v12871_v36 = vld [vmem:[#allocation5 + $0xa00] ss:$40 sps:$4 sm:$0xff]  }
  0x59   :  { %3539 = vmatprep.subr.bf16.mxu1 %v12783_v37  ;;  %v12874_v37 = vld [vmem:[#allocation5 + $0xf00] ss:$40 sps:$4 sm:$0xff]   ;;  %p14958_p9 = por %p14957_p8, %p14956_p7 }
  0x5b   :  { %3497 = vmatpush2.bf16.msra.mxu0 %v12785_v38  ;;  %v12879_v38 = vld [vmem:[#allocation5 + $0xeb4] ss:$40 sps:$4 sm:$0xff]   ;;  %p14959_p10 = pnand %p14958_p9, %p14952_p6 }
  0x5c   :  { %3540 = vmatpush2.bf16.msra.mxu1 %v12786_v39  ;;  %3498 = vmatprep.subr.bf16.mxu0 %v12787_v40  ;;  %v12882_v39 = vld [vmem:[#allocation5 + $0x23c] ss:$40 sps:$4 sm:$0xff]   ;;  %v12877_v40 = vld [vmem:[#allocation5 + $0xeb0] ss:$40 sps:$4 sm:$0xff]  }
  0x5d   :  { %3541 = vmatprep.subr.bf16.mxu1 %v12789_v41  ;;  %v15053_v41 = vld [vmem:[#allocation2 + $0x18] ss:$28 sps:$4 sm:$0xff]  }
  0x5f   :  { %3499 = vmatpush2.bf16.msra.mxu0 %v12791_v42  ;;  %v12880_v42 = vld [vmem:[#allocation5 + $0x238] ss:$40 sps:$4 sm:$0xff]  }
  0x60   :  { %3542 = vmatpush2.bf16.msra.mxu1 %v12792_v43  ;;  %3500 = vmatprep.subr.bf16.mxu0 %v12793_v44  ;;  %v12886_v43 = vld [vmem:[#allocation5 + $0xe64] ss:$40 sps:$4 sm:$0xff]  }
  0x61   :  { %3543 = vmatprep.subr.bf16.mxu1 %v12795_v45  ;;  %v12889_v44 = vld [vmem:[#allocation5 + $0x1ec] ss:$40 sps:$4 sm:$0xff]   ;;  %v12884_v45 = vld [vmem:[#allocation5 + $0xe60] ss:$40 sps:$4 sm:$0xff]  }
  0x63   :  { %3501 = vmatpush2.bf16.msra.mxu0 %v12797_v46  ;;  %v12887_v46 = vld [vmem:[#allocation5 + $0x1e8] ss:$40 sps:$4 sm:$0xff]  }
  0x64   :  { %3544 = vmatpush2.bf16.msra.mxu1 %v12798_v47  ;;  %3502 = vmatprep.subr.bf16.mxu0 %v12799_v49  ;;  %v12892_v47 = vld [vmem:[#allocation5 + $0xe14] ss:$40 sps:$4 sm:$0xff]  }
  0x65   :  { %3545 = vmatprep.subr.bf16.mxu1 %v12801_v51  ;;  %v12895_v49 = vld [vmem:[#allocation5 + $0x19c] ss:$40 sps:$4 sm:$0xff]   ;;  %v12890_v51 = vld [vmem:[#allocation5 + $0xe10] ss:$40 sps:$4 sm:$0xff]  }
  0x67   :  { %3503 = vmatpush2.bf16.msra.mxu0 %v12803_v52  ;;  %v12893_v52 = vld [vmem:[#allocation5 + $0x198] ss:$40 sps:$4 sm:$0xff]  }
  0x68   :  { %3546 = vmatpush2.bf16.msra.mxu1 %v12804_v53  ;;  %3504 = vmatprep.subr.bf16.mxu0 %v12805_v54  ;;  %v12898_v53 = vld [vmem:[#allocation5 + $0xdc4] ss:$40 sps:$4 sm:$0xff]  }
  0x69   :  { %3547 = vmatprep.subr.bf16.mxu1 %v12807_v55  ;;  %v12901_v54 = vld [vmem:[#allocation5 + $0x14c] ss:$40 sps:$4 sm:$0xff]   ;;  %v12896_v55 = vld [vmem:[#allocation5 + $0xdc0] ss:$40 sps:$4 sm:$0xff]  }
  0x6b   :  { %3505 = vmatpush2.bf16.msra.mxu0 %v12809_v56  ;;  %v12899_v56 = vld [vmem:[#allocation5 + $0x148] ss:$40 sps:$4 sm:$0xff]  }
  0x6c   :  { %3548 = vmatpush2.bf16.msra.mxu1 %v12810_v57  ;;  %3506 = vmatprep.subr.bf16.mxu0 %v12811_v58  ;;  %v12904_v57 = vld [vmem:[#allocation5 + $0xd74] ss:$40 sps:$4 sm:$0xff]  }
  0x6d   :  { %3549 = vmatprep.subr.bf16.mxu1 %v12813_v59  ;;  %v12907_v58 = vld [vmem:[#allocation5 + $0xfc] ss:$40 sps:$4 sm:$0xff]   ;;  %v12902_v59 = vld [vmem:[#allocation5 + $0xd70] ss:$40 sps:$4 sm:$0xff]  }
  0x6f   :  { %3507 = vmatpush2.bf16.msra.mxu0 %v12815_v60  ;;  %v12910_v60 = vld [vmem:[#allocation5 + $0xd24] ss:$40 sps:$4 sm:$0xff]  }
  0x70   :  { %3550 = vmatpush2.bf16.msra.mxu1 %v12816_v61  ;;  %3508 = vmatprep.subr.bf16.mxu0 %v12817_v62  ;;  %v12913_v61 = vld [vmem:[#allocation5 + $0xac] ss:$40 sps:$4 sm:$0xff]   ;;  %v12908_v62 = vld [vmem:[#allocation5 + $0xd20] ss:$40 sps:$4 sm:$0xff]  }
  0x71   :  { %3551 = vmatprep.subr.bf16.mxu1 %v12819_v63  ;;  %v12911_v63 = vld [vmem:[#allocation5 + $0xa8] ss:$40 sps:$4 sm:$0xff]  }
  0x73   :  { %3509 = vmatpush2.bf16.msra.mxu0 %v12821_v0  ;;  %v12916_v0 = vld [vmem:[#allocation5 + $0xcd4] ss:$40 sps:$4 sm:$0xff]  }
  0x74   :  { %3552 = vmatpush2.bf16.msra.mxu1 %v12822_v1  ;;  %3564 = vmatprep.subr.bf16.mxu0 %v12831_v2  ;;  %v12919_v1 = vld [vmem:[#allocation5 + $0x5c] ss:$40 sps:$4 sm:$0xff]   ;;  %v12914_v2 = vld [vmem:[#allocation5 + $0xcd0] ss:$40 sps:$4 sm:$0xff]  }
  0x75   :  { %3607 = vmatprep.subr.bf16.mxu1 %v12834_v3  ;;  %v12917_v3 = vld [vmem:[#allocation5 + $0x58] ss:$40 sps:$4 sm:$0xff]  }
  0x76   :  { %3511 = vmatmul.mubr.bf16.vlgmr.msra.gmra.mxu0 %v15043_v4 }
  0x77   :  { %3554 = vmatmul.mubr.bf16.vlgmr.msra.gmra.mxu1 %v15045_v5  ;;  %3565 = vmatpush1.bf16.msra.mxu0 %v12829_v6  ;;  %v12922_v6 = vld [vmem:[#allocation5 + $0xc84] ss:$40 sps:$4 sm:$0xff]  }
  0x78   :  { %3608 = vmatpush1.bf16.msra.mxu1 %v12832_v7  ;;  %3566 = vmatprep.subr.bf16.mxu0 %v12837_v8  ;;  %v12925_v7 = vld [vmem:[#allocation5 + $0xc] ss:$40 sps:$4 sm:$0xff]   ;;  %v12920_v8 = vld [vmem:[#allocation5 + $0xc80] ss:$40 sps:$4 sm:$0xff]  }
  0x79   :  { %3609 = vmatprep.subr.bf16.mxu1 %v12840_v9  ;;  %3639 = vmatprep.mubr.bf16.mxu1 %v14989_v14  ;;  %v12923_v9 = vld [vmem:[#allocation5 + $0x8] ss:$40 sps:$4 sm:$0xff]  }
  0x7a   :  { %3596 = vmatprep.mubr.bf16.mxu0 %v15050_v35 }
  0x7b   :  { %3567 = vmatpush1.bf16.msra.mxu0 %v12835_v10  ;;  %v12931_v10 = vld [vmem:[#allocation5 + $0x4bc] ss:$40 sps:$4 sm:$0xff]  }
  0x7c   :  { %3610 = vmatpush1.bf16.msra.mxu1 %v12838_v11  ;;  %3568 = vmatprep.subr.bf16.mxu0 %v12843_v12  ;;  %v12934_v11 = vld [vmem:[#allocation5 + $0x73c] ss:$40 sps:$4 sm:$0xff]   ;;  %v15057_v12 = vld [vmem:[#allocation2 + $0x10] ss:$28 sps:$4 sm:$0xff]  }
  0x7d   :  { %3611 = vmatprep.subr.bf16.mxu1 %v12846_v13  ;;  %v12929_v13 = vld [vmem:[#allocation5 + $0x4b8] ss:$40 sps:$4 sm:$0xff]  }
  0x7f   :  { %3569 = vmatpush1.bf16.msra.mxu0 %v12841_v15  ;;  %v12932_v15 = vld [vmem:[#allocation5 + $0x738] ss:$40 sps:$4 sm:$0xff]  }
  0x80   :  { %3612 = vmatpush1.bf16.msra.mxu1 %v12844_v16  ;;  %3570 = vmatprep.subr.bf16.mxu0 %v12849_v17  ;;  %v12937_v16 = vld [vmem:[#allocation5 + $0x46c] ss:$40 sps:$4 sm:$0xff]  }
  0x81   :  { %3613 = vmatprep.subr.bf16.mxu1 %v12852_v18  ;;  %v12940_v17 = vld [vmem:[#allocation5 + $0x6ec] ss:$40 sps:$4 sm:$0xff]   ;;  %v12935_v18 = vld [vmem:[#allocation5 + $0x468] ss:$40 sps:$4 sm:$0xff]  }
  0x83   :  { %3571 = vmatpush1.bf16.msra.mxu0 %v12847_v19  ;;  %v12938_v19 = vld [vmem:[#allocation5 + $0x6e8] ss:$40 sps:$4 sm:$0xff]  }
  0x84   :  { %3614 = vmatpush1.bf16.msra.mxu1 %v12850_v20  ;;  %3572 = vmatprep.subr.bf16.mxu0 %v12855_v21  ;;  %v12943_v20 = vld [vmem:[#allocation5 + $0x41c] ss:$40 sps:$4 sm:$0xff]  }
  0x85   :  { %3615 = vmatprep.subr.bf16.mxu1 %v12858_v22  ;;  %v12946_v21 = vld [vmem:[#allocation5 + $0x69c] ss:$40 sps:$4 sm:$0xff]   ;;  %v12941_v22 = vld [vmem:[#allocation5 + $0x418] ss:$40 sps:$4 sm:$0xff]  }
  0x87   :  { %3573 = vmatpush1.bf16.msra.mxu0 %v12853_v23  ;;  %v12944_v23 = vld [vmem:[#allocation5 + $0x698] ss:$40 sps:$4 sm:$0xff]  }
  0x88   :  { %3616 = vmatpush1.bf16.msra.mxu1 %v12856_v24  ;;  %3574 = vmatprep.subr.bf16.mxu0 %v12861_v25  ;;  %v12949_v24 = vld [vmem:[#allocation5 + $0x3cc] ss:$40 sps:$4 sm:$0xff]  }
  0x89   :  { %3617 = vmatprep.subr.bf16.mxu1 %v12864_v26  ;;  %v12952_v25 = vld [vmem:[#allocation5 + $0x64c] ss:$40 sps:$4 sm:$0xff]   ;;  %v12947_v26 = vld [vmem:[#allocation5 + $0x3c8] ss:$40 sps:$4 sm:$0xff]  }
  0x8b   :  { %3575 = vmatpush1.bf16.msra.mxu0 %v12859_v27  ;;  %v12950_v27 = vld [vmem:[#allocation5 + $0x648] ss:$40 sps:$4 sm:$0xff]  }
  0x8c   :  { %3618 = vmatpush1.bf16.msra.mxu1 %v12862_v28  ;;  %3576 = vmatprep.subr.bf16.mxu0 %v12867_v29  ;;  %v12955_v28 = vld [vmem:[#allocation5 + $0x37c] ss:$40 sps:$4 sm:$0xff]  }
  0x8d   :  { %3619 = vmatprep.subr.bf16.mxu1 %v12870_v30  ;;  %v12958_v29 = vld [vmem:[#allocation5 + $0x5fc] ss:$40 sps:$4 sm:$0xff]   ;;  %v12953_v30 = vld [vmem:[#allocation5 + $0x378] ss:$40 sps:$4 sm:$0xff]  }
  0x8f   :  { %3577 = vmatpush1.bf16.msra.mxu0 %v12865_v31  ;;  %v12961_v31 = vld [vmem:[#allocation5 + $0x32c] ss:$40 sps:$4 sm:$0xff]  }
  0x90   :  { %3620 = vmatpush1.bf16.msra.mxu1 %v12868_v32  ;;  %3578 = vmatprep.subr.bf16.mxu0 %v12873_v33  ;;  %v12964_v32 = vld [vmem:[#allocation5 + $0x5ac] ss:$40 sps:$4 sm:$0xff]   ;;  %v12959_v33 = vld [vmem:[#allocation5 + $0x328] ss:$40 sps:$4 sm:$0xff]  }
  0x91   :  { %3621 = vmatprep.subr.bf16.mxu1 %v12876_v34  ;;  %v12962_v34 = vld [vmem:[#allocation5 + $0x5a8] ss:$40 sps:$4 sm:$0xff]  }
  0x93   :  { %3579 = vmatpush1.bf16.msra.mxu0 %v12871_v36  ;;  %v12967_v36 = vld [vmem:[#allocation5 + $0x2dc] ss:$40 sps:$4 sm:$0xff]  }
  0x94   :  { %3622 = vmatpush1.bf16.msra.mxu1 %v12874_v37  ;;  %3580 = vmatprep.subr.bf16.mxu0 %v12879_v38  ;;  %v12970_v37 = vld [vmem:[#allocation5 + $0x55c] ss:$40 sps:$4 sm:$0xff]   ;;  %v12965_v38 = vld [vmem:[#allocation5 + $0x2d8] ss:$40 sps:$4 sm:$0xff]  }
  0x95   :  { %3650 = vmatprep.subr.bf16.mxu1 %v12882_v39  ;;  %v12968_v39 = vld [vmem:[#allocation5 + $0x558] ss:$40 sps:$4 sm:$0xff]  }
  0x97   :  { %3640 = vmatmul.mubr.bf16.vlgmr.msra.gmra.mxu1 %v15053_v41  ;;  %3581 = vmatpush2.bf16.msra.mxu0 %v12877_v40  ;;  %v12973_v40 = vld [vmem:[#allocation5 + $0x28c] ss:$40 sps:$4 sm:$0xff]  }
  0x98   :  { %3651 = vmatpush1.bf16.msra.mxu1 %v12880_v42  ;;  %3582 = vmatprep.subr.bf16.mxu0 %v12886_v43  ;;  %v12976_v42 = vld [vmem:[#allocation5 + $0x50c] ss:$40 sps:$4 sm:$0xff]   ;;  %v12971_v43 = vld [vmem:[#allocation5 + $0x288] ss:$40 sps:$4 sm:$0xff]  }
  0x99   :  { %3652 = vmatprep.subr.bf16.mxu1 %v12889_v44  ;;  %3682 = vmatprep.mubr.bf16.mxu1 %v15037_v48  ;;  %v12905_v48 = vld [vmem:[#allocation5 + $0xf8] ss:$40 sps:$4 sm:$0xff]   ;;  %v12974_v44 = vld [vmem:[#allocation5 + $0x508] ss:$40 sps:$4 sm:$0xff]  }
  0x9b   :  { %3583 = vmatpush2.bf16.msra.mxu0 %v12884_v45  ;;  %v12979_v45 = vld [vmem:[#allocation5 + $0x9bc] ss:$40 sps:$4 sm:$0xff]  }
  0x9c   :  { %3653 = vmatpush1.bf16.msra.mxu1 %v12887_v46  ;;  %3584 = vmatprep.subr.bf16.mxu0 %v12892_v47  ;;  %v12982_v46 = vld [vmem:[#allocation5 + $0xc3c] ss:$40 sps:$4 sm:$0xff]   ;;  %v12977_v47 = vld [vmem:[#allocation5 + $0x9b8] ss:$40 sps:$4 sm:$0xff]  }
  0x9d   :  { %3654 = vmatprep.subr.bf16.mxu1 %v12895_v49  ;;  %v12980_v49 = vld [vmem:[#allocation5 + $0xc38] ss:$40 sps:$4 sm:$0xff]  }
  0x9f   :  { %3585 = vmatpush2.bf16.msra.mxu0 %v12890_v51  ;;  %v12985_v51 = vld [vmem:[#allocation5 + $0x96c] ss:$40 sps:$4 sm:$0xff]  }
  0xa0   :  { %3655 = vmatpush1.bf16.msra.mxu1 %v12893_v52  ;;  %3586 = vmatprep.subr.bf16.mxu0 %v12898_v53  ;;  %v12988_v52 = vld [vmem:[#allocation5 + $0xbec] ss:$40 sps:$4 sm:$0xff]   ;;  %v12983_v53 = vld [vmem:[#allocation5 + $0x968] ss:$40 sps:$4 sm:$0xff]  }
  0xa1   :  { %3656 = vmatprep.subr.bf16.mxu1 %v12901_v54  ;;  %v12986_v54 = vld [vmem:[#allocation5 + $0xbe8] ss:$40 sps:$4 sm:$0xff]  }
  0xa3   :  { %3587 = vmatpush2.bf16.msra.mxu0 %v12896_v55  ;;  %v12991_v55 = vld [vmem:[#allocation5 + $0x91c] ss:$40 sps:$4 sm:$0xff]  }
  0xa4   :  { %3657 = vmatpush1.bf16.msra.mxu1 %v12899_v56  ;;  %3588 = vmatprep.subr.bf16.mxu0 %v12904_v57  ;;  %v12994_v56 = vld [vmem:[#allocation5 + $0xb9c] ss:$40 sps:$4 sm:$0xff]   ;;  %v12989_v57 = vld [vmem:[#allocation5 + $0x918] ss:$40 sps:$4 sm:$0xff]  }
  0xa5   :  { %3658 = vmatprep.subr.bf16.mxu1 %v12907_v58  ;;  %v12992_v58 = vld [vmem:[#allocation5 + $0xb98] ss:$40 sps:$4 sm:$0xff]  }
  0xa7   :  { %3589 = vmatpush2.bf16.msra.mxu0 %v12902_v59  ;;  %v12997_v59 = vld [vmem:[#allocation5 + $0x8cc] ss:$40 sps:$4 sm:$0xff]  }
  0xa8   :  { %3659 = vmatpush1.bf16.msra.mxu1 %v12905_v48  ;;  %3590 = vmatprep.subr.bf16.mxu0 %v12910_v60  ;;  %v13000_v48 = vld [vmem:[#allocation5 + $0xb4c] ss:$40 sps:$4 sm:$0xff]   ;;  %v12995_v60 = vld [vmem:[#allocation5 + $0x8c8] ss:$40 sps:$4 sm:$0xff]  }
  0xa9   :  { %3660 = vmatprep.subr.bf16.mxu1 %v12913_v61  ;;  %v13003_v61 = vld [vmem:[#allocation5 + $0x87c] ss:$40 sps:$4 sm:$0xff]  }
  0xab   :  { %3591 = vmatpush2.bf16.msra.mxu0 %v12908_v62  ;;  %v13006_v62 = vld [vmem:[#allocation5 + $0xafc] ss:$40 sps:$4 sm:$0xff]  }
  0xac   :  { %3661 = vmatpush1.bf16.msra.mxu1 %v12911_v63  ;;  %3592 = vmatprep.subr.bf16.mxu0 %v12916_v0  ;;  %v13001_v63 = vld [vmem:[#allocation5 + $0x878] ss:$40 sps:$4 sm:$0xff]   ;;  %v13009_v0 = vld [vmem:[#allocation5 + $0x82c] ss:$40 sps:$4 sm:$0xff]  }
  0xad   :  { %3662 = vmatprep.subr.bf16.mxu1 %v12919_v1  ;;  %v13012_v1 = vld [vmem:[#allocation5 + $0xaac] ss:$40 sps:$4 sm:$0xff]  }
  0xaf   :  { %3593 = vmatpush2.bf16.msra.mxu0 %v12914_v2  ;;  %v13007_v2 = vld [vmem:[#allocation5 + $0x828] ss:$40 sps:$4 sm:$0xff]  }
  0xb0   :  { %3663 = vmatpush1.bf16.msra.mxu1 %v12917_v3  ;;  %3594 = vmatprep.subr.bf16.mxu0 %v12922_v6  ;;  %v13010_v3 = vld [vmem:[#allocation5 + $0xaa8] ss:$40 sps:$4 sm:$0xff]   ;;  %v13015_v6 = vld [vmem:[#allocation5 + $0x7dc] ss:$40 sps:$4 sm:$0xff]  }
  0xb1   :  { %3664 = vmatprep.subr.bf16.mxu1 %v12925_v7  ;;  %v13018_v7 = vld [vmem:[#allocation5 + $0xa5c] ss:$40 sps:$4 sm:$0xff]  }
  0xb3   :  { %3595 = vmatpush2.bf16.msra.mxu0 %v12920_v8  ;;  %v13013_v8 = vld [vmem:[#allocation5 + $0x7d8] ss:$40 sps:$4 sm:$0xff]  }
  0xb4   :  { %3665 = vmatpush1.bf16.msra.mxu1 %v12923_v9  ;;  %3693 = vmatprep.subr.bf16.mxu0 %v12934_v11  ;;  %v13016_v9 = vld [vmem:[#allocation5 + $0xa58] ss:$40 sps:$4 sm:$0xff]   ;;  %v13024_v11 = vld [vmem:[#allocation5 + $0xa0c] ss:$40 sps:$4 sm:$0xff]  }
  0xb5   :  { %3666 = vmatprep.subr.bf16.mxu1 %v12931_v10  ;;  %v13021_v10 = vld [vmem:[#allocation5 + $0x78c] ss:$40 sps:$4 sm:$0xff]  }
  0xb6   :  { %3597 = vmatmul.mubr.bf16.vlgmr.msra.gmra.mxu0 %v15057_v12 }
  0xb7   :  { %3694 = vmatpush1.bf16.msra.mxu0 %v12932_v15  ;;  %3725 = vmatprep.mubr.bf16.mxu0 %v15039_v50  ;;  %v12956_v50 = vld [vmem:[#allocation5 + $0x5f8] ss:$40 sps:$4 sm:$0xff]   ;;  %v13022_v15 = vld [vmem:[#allocation5 + $0xa08] ss:$40 sps:$4 sm:$0xff]  }
  0xb8   :  { %3667 = vmatpush2.bf16.msra.mxu1 %v12929_v13  ;;  %3695 = vmatprep.subr.bf16.mxu0 %v12940_v17  ;;  %v13019_v13 = vld [vmem:[#allocation5 + $0x788] ss:$40 sps:$4 sm:$0xff]   ;;  %v13030_v17 = vld [vmem:[#allocation5 + $0x113c] ss:$40 sps:$4 sm:$0xff]  }
  0xb9   :  { %3668 = vmatprep.subr.bf16.mxu1 %v12937_v16  ;;  %v13027_v16 = vld [vmem:[#allocation5 + $0xebc] ss:$40 sps:$4 sm:$0xff]  }
  0xbb   :  { %3696 = vmatpush1.bf16.msra.mxu0 %v12938_v19  ;;  %v13028_v19 = vld [vmem:[#allocation5 + $0x1138] ss:$40 sps:$4 sm:$0xff]  }
  0xbc   :  { %3669 = vmatpush2.bf16.msra.mxu1 %v12935_v18  ;;  %3697 = vmatprep.subr.bf16.mxu0 %v12946_v21  ;;  %v13025_v18 = vld [vmem:[#allocation5 + $0xeb8] ss:$40 sps:$4 sm:$0xff]   ;;  %v13036_v21 = vld [vmem:[#allocation5 + $0x10ec] ss:$40 sps:$4 sm:$0xff]  }
  0xbd   :  { %3670 = vmatprep.subr.bf16.mxu1 %v12943_v20  ;;  %v13033_v20 = vld [vmem:[#allocation5 + $0xe6c] ss:$40 sps:$4 sm:$0xff]  }
  0xbf   :  { %3698 = vmatpush1.bf16.msra.mxu0 %v12944_v23  ;;  %v13034_v23 = vld [vmem:[#allocation5 + $0x10e8] ss:$40 sps:$4 sm:$0xff]  }
  0xc0   :  { %3671 = vmatpush2.bf16.msra.mxu1 %v12941_v22  ;;  %3699 = vmatprep.subr.bf16.mxu0 %v12952_v25  ;;  %v13031_v22 = vld [vmem:[#allocation5 + $0xe68] ss:$40 sps:$4 sm:$0xff]   ;;  %v13042_v25 = vld [vmem:[#allocation5 + $0x109c] ss:$40 sps:$4 sm:$0xff]  }
  0xc1   :  { %3672 = vmatprep.subr.bf16.mxu1 %v12949_v24  ;;  %v13039_v24 = vld [vmem:[#allocation5 + $0xe1c] ss:$40 sps:$4 sm:$0xff]  }
  0xc3   :  { %3700 = vmatpush1.bf16.msra.mxu0 %v12950_v27  ;;  %v13040_v27 = vld [vmem:[#allocation5 + $0x1098] ss:$40 sps:$4 sm:$0xff]  }
  0xc4   :  { %3673 = vmatpush2.bf16.msra.mxu1 %v12947_v26  ;;  %3701 = vmatprep.subr.bf16.mxu0 %v12958_v29  ;;  %v13037_v26 = vld [vmem:[#allocation5 + $0xe18] ss:$40 sps:$4 sm:$0xff]   ;;  %v13048_v29 = vld [vmem:[#allocation5 + $0x104c] ss:$40 sps:$4 sm:$0xff]  }
  0xc5   :  { %3674 = vmatprep.subr.bf16.mxu1 %v12955_v28  ;;  %v13045_v28 = vld [vmem:[#allocation5 + $0xdcc] ss:$40 sps:$4 sm:$0xff]  }
  0xc7   :  { %3702 = vmatpush1.bf16.msra.mxu0 %v12956_v50  ;;  %v13051_v50 = vld [vmem:[#allocation5 + $0xd7c] ss:$40 sps:$4 sm:$0xff]  }
  0xc8   :  { %3675 = vmatpush2.bf16.msra.mxu1 %v12953_v30  ;;  %3703 = vmatprep.subr.bf16.mxu0 %v12964_v32  ;;  %v13043_v30 = vld [vmem:[#allocation5 + $0xdc8] ss:$40 sps:$4 sm:$0xff]   ;;  %v13049_v32 = vld [vmem:[#allocation5 + $0xd78] ss:$40 sps:$4 sm:$0xff]  }
  0xc9   :  { %3676 = vmatprep.subr.bf16.mxu1 %v12961_v31  ;;  %v13054_v31 = vld [vmem:[#allocation5 + $0xffc] ss:$40 sps:$4 sm:$0xff]  }
  0xcb   :  { %3704 = vmatpush1.bf16.msra.mxu0 %v12962_v34  ;;  %v13057_v34 = vld [vmem:[#allocation5 + $0xd2c] ss:$40 sps:$4 sm:$0xff]  }
  0xcc   :  { %3677 = vmatpush2.bf16.msra.mxu1 %v12959_v33  ;;  %3705 = vmatprep.subr.bf16.mxu0 %v12970_v37  ;;  %v13052_v33 = vld [vmem:[#allocation5 + $0xff8] ss:$40 sps:$4 sm:$0xff]   ;;  %v13055_v37 = vld [vmem:[#allocation5 + $0xd28] ss:$40 sps:$4 sm:$0xff]  }
  0xcd   :  { %3678 = vmatprep.subr.bf16.mxu1 %v12967_v36  ;;  %v13060_v36 = vld [vmem:[#allocation5 + $0xfac] ss:$40 sps:$4 sm:$0xff]  }
  0xcf   :  { %3706 = vmatpush1.bf16.msra.mxu0 %v12968_v39  ;;  %v13063_v39 = vld [vmem:[#allocation5 + $0xcdc] ss:$40 sps:$4 sm:$0xff]  }
  0xd0   :  { %3679 = vmatpush2.bf16.msra.mxu1 %v12965_v38  ;;  %3707 = vmatprep.subr.bf16.mxu0 %v12976_v42  ;;  %v13058_v38 = vld [vmem:[#allocation5 + $0xfa8] ss:$40 sps:$4 sm:$0xff]   ;;  %v13061_v42 = vld [vmem:[#allocation5 + $0xcd8] ss:$40 sps:$4 sm:$0xff]  }
  0xd1   :  { %3680 = vmatprep.subr.bf16.mxu1 %v12973_v40  ;;  %v13066_v40 = vld [vmem:[#allocation5 + $0xf5c] ss:$40 sps:$4 sm:$0xff]  }
  0xd3   :  { %3708 = vmatpush1.bf16.msra.mxu0 %v12974_v44  ;;  %v13069_v44 = vld [vmem:[#allocation5 + $0xc8c] ss:$40 sps:$4 sm:$0xff]  }
  0xd4   :  { %3681 = vmatpush2.bf16.msra.mxu1 %v12971_v43  ;;  %3709 = vmatprep.subr.bf16.mxu0 %v12979_v45  ;;  %v13064_v43 = vld [vmem:[#allocation5 + $0xf58] ss:$40 sps:$4 sm:$0xff]   ;;  %v13072_v45 = vld [vmem:[#allocation5 + $0xf0c] ss:$40 sps:$4 sm:$0xff]  }
  0xd5   :  { %3736 = vmatprep.subr.bf16.mxu1 %v12982_v46  ;;  %v13067_v46 = vld [vmem:[#allocation5 + $0xc88] ss:$40 sps:$4 sm:$0xff]  }
  0xd7   :  { %3683 = vmatmul.mubr.bf16.vlgmr.msra.gmra.mxu1 %v15043_v4  ;;  %3710 = vmatpush2.bf16.msra.mxu0 %v12977_v47  ;;  %v12998_v4 = vld [vmem:[#allocation5 + $0xb48] ss:$40 sps:$4 sm:$0xff]  }
  0xd8   :  { %3737 = vmatpush1.bf16.msra.mxu1 %v12980_v49  ;;  %3711 = vmatprep.subr.bf16.mxu0 %v12985_v51  ;;  %v13070_v47 = vld [vmem:[#allocation5 + $0xf08] ss:$40 sps:$4 sm:$0xff]   ;;  %v13075_v49 = vld [vmem:[#allocation5 + $0x244] ss:$40 sps:$4 sm:$0xff]  }
  0xd9   :  { %3738 = vmatprep.subr.bf16.mxu1 %v12988_v52  ;;  %3768 = vmatprep.mubr.bf16.mxu1 %v15050_v35  ;;  %v13004_v35 = vld [vmem:[#allocation5 + $0xaf8] ss:$40 sps:$4 sm:$0xff]   ;;  %v13078_v51 = vld [vmem:[#allocation5 + $0x744] ss:$40 sps:$4 sm:$0xff]  }
  0xda   :  { %v13073_v52 = vld [vmem:[#allocation5 + $0x240] ss:$40 sps:$4 sm:$0xff]  }
  0xdb   :  { %3712 = vmatpush2.bf16.msra.mxu0 %v12983_v53  ;;  %v13076_v53 = vld [vmem:[#allocation5 + $0x740] ss:$40 sps:$4 sm:$0xff]  }
  0xdc   :  { %3739 = vmatpush1.bf16.msra.mxu1 %v12986_v54  ;;  %3713 = vmatprep.subr.bf16.mxu0 %v12991_v55  ;;  %v13081_v54 = vld [vmem:[#allocation5 + $0x1f4] ss:$40 sps:$4 sm:$0xff]  }
  0xdd   :  { %3740 = vmatprep.subr.bf16.mxu1 %v12994_v56  ;;  %v13084_v55 = vld [vmem:[#allocation5 + $0x6f4] ss:$40 sps:$4 sm:$0xff]   ;;  %v13079_v56 = vld [vmem:[#allocation5 + $0x1f0] ss:$40 sps:$4 sm:$0xff]  }
  0xdf   :  { %3714 = vmatpush2.bf16.msra.mxu0 %v12989_v57  ;;  %v13082_v57 = vld [vmem:[#allocation5 + $0x6f0] ss:$40 sps:$4 sm:$0xff]  }
  0xe0   :  { %3741 = vmatpush1.bf16.msra.mxu1 %v12992_v58  ;;  %3715 = vmatprep.subr.bf16.mxu0 %v12997_v59  ;;  %v13087_v58 = vld [vmem:[#allocation5 + $0x1a4] ss:$40 sps:$4 sm:$0xff]  }
  0xe1   :  { %3742 = vmatprep.subr.bf16.mxu1 %v13000_v48  ;;  %v13090_v59 = vld [vmem:[#allocation5 + $0x6a4] ss:$40 sps:$4 sm:$0xff]  }
  0xe2   :  { %v15067_v48 = vld [vmem:[#allocation2 + $0x4] ss:$28 sps:$4 sm:$0xff]  }
  0xe3   :  { %3716 = vmatpush2.bf16.msra.mxu0 %v12995_v60  ;;  %v14858_v60 = vld [vmem:[#allocation2 + $0xc] ss:$28 sps:$4 sm:$0xff]  }
  0xe4   :  { %3743 = vmatpush1.bf16.msra.mxu1 %v12998_v4  ;;  %3717 = vmatprep.subr.bf16.mxu0 %v13003_v61  ;;  %v13085_v4 = vld [vmem:[#allocation5 + $0x1a0] ss:$40 sps:$4 sm:$0xff]   ;;  %v13093_v61 = vld [vmem:[#allocation5 + $0x154] ss:$40 sps:$4 sm:$0xff]  }
  0xe5   :  { %3744 = vmatprep.subr.bf16.mxu1 %v13006_v62  ;;  %v13091_v62 = vld [vmem:[#allocation5 + $0x150] ss:$40 sps:$4 sm:$0xff]  }
  0xe7   :  { %3718 = vmatpush2.bf16.msra.mxu0 %v13001_v63  ;;  %v13094_v63 = vld [vmem:[#allocation5 + $0x650] ss:$40 sps:$4 sm:$0xff]  }
  0xe8   :  { %3745 = vmatpush1.bf16.msra.mxu1 %v13004_v35  ;;  %3719 = vmatprep.subr.bf16.mxu0 %v13009_v0  ;;  %v13099_v35 = vld [vmem:[#allocation5 + $0x104] ss:$40 sps:$4 sm:$0xff]  }
  0xe9   :  { %3746 = vmatprep.subr.bf16.mxu1 %v13012_v1  ;;  %v13102_v0 = vld [vmem:[#allocation5 + $0x604] ss:$40 sps:$4 sm:$0xff]   ;;  %v13097_v1 = vld [vmem:[#allocation5 + $0x100] ss:$40 sps:$4 sm:$0xff]  }
  0xeb   :  { %3720 = vmatpush2.bf16.msra.mxu0 %v13007_v2  ;;  %v13100_v2 = vld [vmem:[#allocation5 + $0x600] ss:$40 sps:$4 sm:$0xff]  }
  0xec   :  { %3747 = vmatpush1.bf16.msra.mxu1 %v13010_v3  ;;  %3721 = vmatprep.subr.bf16.mxu0 %v13015_v6  ;;  %v13105_v3 = vld [vmem:[#allocation5 + $0xb4] ss:$40 sps:$4 sm:$0xff]  }
  0xed   :  { %3748 = vmatprep.subr.bf16.mxu1 %v13018_v7  ;;  %v13108_v6 = vld [vmem:[#allocation5 + $0x5b4] ss:$40 sps:$4 sm:$0xff]   ;;  %v13103_v7 = vld [vmem:[#allocation5 + $0xb0] ss:$40 sps:$4 sm:$0xff]  }
  0xef   :  { %3722 = vmatpush2.bf16.msra.mxu0 %v13013_v8  ;;  %v13106_v8 = vld [vmem:[#allocation5 + $0x5b0] ss:$40 sps:$4 sm:$0xff]  }
  0xf0   :  { %3749 = vmatpush1.bf16.msra.mxu1 %v13016_v9  ;;  %3723 = vmatprep.subr.bf16.mxu0 %v13021_v10  ;;  %v13111_v9 = vld [vmem:[#allocation5 + $0x64] ss:$40 sps:$4 sm:$0xff]  }
  0xf1   :  { %3750 = vmatprep.subr.bf16.mxu1 %v13024_v11  ;;  %v13114_v10 = vld [vmem:[#allocation5 + $0x564] ss:$40 sps:$4 sm:$0xff]   ;;  %v13109_v11 = vld [vmem:[#allocation5 + $0x60] ss:$40 sps:$4 sm:$0xff]  }
  0xf3   :  { %3724 = vmatpush2.bf16.msra.mxu0 %v13019_v13  ;;  %v13112_v13 = vld [vmem:[#allocation5 + $0x560] ss:$40 sps:$4 sm:$0xff]  }
  0xf4   :  { %3751 = vmatpush1.bf16.msra.mxu1 %v13022_v15  ;;  %3779 = vmatprep.subr.bf16.mxu0 %v13030_v17  ;;  %v13117_v15 = vld [vmem:[#allocation5 + $0x14] ss:$40 sps:$4 sm:$0xff]   ;;  %v13115_v17 = vld [vmem:[#allocation5 + $0x10] ss:$40 sps:$4 sm:$0xff]  }
  0xf5   :  { %3752 = vmatprep.subr.bf16.mxu1 %v13027_v16  ;;  %v13120_v16 = vld [vmem:[#allocation5 + $0x514] ss:$40 sps:$4 sm:$0xff]  }
  0xf6   :  { %3726 = vmatmul.mubr.bf16.vlgmr.msra.gmra.mxu0 %v15045_v5  ;;  %v13046_v5 = vld [vmem:[#allocation5 + $0x1048] ss:$40 sps:$4 sm:$0xff]  }
  0xf7   :  { %3780 = vmatpush1.bf16.msra.mxu0 %v13028_v19  ;;  %3811 = vmatprep.mubr.bf16.mxu0 %v14989_v14  ;;  %v13123_v19 = vld [vmem:[#allocation5 + $0x4c4] ss:$40 sps:$4 sm:$0xff]  }
  0xf8   :  { %3753 = vmatpush2.bf16.msra.mxu1 %v13025_v18  ;;  %3781 = vmatprep.subr.bf16.mxu0 %v13036_v21  ;;  %v13118_v18 = vld [vmem:[#allocation5 + $0x510] ss:$40 sps:$4 sm:$0xff]   ;;  %v13121_v21 = vld [vmem:[#allocation5 + $0x4c0] ss:$40 sps:$4 sm:$0xff]  }
  0xf9   :  { %3754 = vmatprep.subr.bf16.mxu1 %v13033_v20  ;;  %v13126_v20 = vld [vmem:[#allocation5 + $0x9c4] ss:$40 sps:$4 sm:$0xff]  }
  0xfb   :  { %3782 = vmatpush1.bf16.msra.mxu0 %v13034_v23  ;;  %v13129_v23 = vld [vmem:[#allocation5 + $0x474] ss:$40 sps:$4 sm:$0xff]  }
  0xfc   :  { %3755 = vmatpush2.bf16.msra.mxu1 %v13031_v22  ;;  %3783 = vmatprep.subr.bf16.mxu0 %v13042_v25  ;;  %v13124_v22 = vld [vmem:[#allocation5 + $0x9c0] ss:$40 sps:$4 sm:$0xff]  }
  0xfd   :  { %3756 = vmatprep.subr.bf16.mxu1 %v13039_v24  ;;  %v13132_v24 = vld [vmem:[#allocation5 + $0x974] ss:$40 sps:$4 sm:$0xff]  }
  0xff   :  { %3784 = vmatpush1.bf16.msra.mxu0 %v13040_v27  ;;  %v13127_v27 = vld [vmem:[#allocation5 + $0x470] ss:$40 sps:$4 sm:$0xff]  }
 0x100   :  { %3757 = vmatpush2.bf16.msra.mxu1 %v13037_v26  ;;  %3785 = vmatprep.subr.bf16.mxu0 %v13048_v29  ;;  %v13130_v29 = vld [vmem:[#allocation5 + $0x970] ss:$40 sps:$4 sm:$0xff]  }
 0x101   :  { %3758 = vmatprep.subr.bf16.mxu1 %v13045_v28 }
 0x103   :  { %3786 = vmatpush1.bf16.msra.mxu0 %v13046_v5 }
 0x104   :  { %3759 = vmatpush2.bf16.msra.mxu1 %v13043_v30  ;;  %3787 = vmatprep.subr.bf16.mxu0 %v13054_v31  ;;  %v13135_v30 = vld [vmem:[#allocation5 + $0x424] ss:$40 sps:$4 sm:$0xff]  }
 0x105   :  { %3760 = vmatprep.subr.bf16.mxu1 %v13051_v50  ;;  %v13138_v31 = vld [vmem:[#allocation5 + $0x924] ss:$40 sps:$4 sm:$0xff]  }
 0x107   :  { %3788 = vmatpush1.bf16.msra.mxu0 %v13052_v33 }
 0x108   :  { %3761 = vmatpush2.bf16.msra.mxu1 %v13049_v32  ;;  %3789 = vmatprep.subr.bf16.mxu0 %v13060_v36 }
 0x109   :  { %3762 = vmatprep.subr.bf16.mxu1 %v13057_v34  ;;  %v13133_v34 = vld [vmem:[#allocation5 + $0x420] ss:$40 sps:$4 sm:$0xff]  }
 0x10b   :  { %3790 = vmatpush1.bf16.msra.mxu0 %v13058_v38  ;;  %v13141_v38 = vld [vmem:[#allocation5 + $0x3d4] ss:$40 sps:$4 sm:$0xff]  }
 0x10c   :  { %3763 = vmatpush2.bf16.msra.mxu1 %v13055_v37  ;;  %3791 = vmatprep.subr.bf16.mxu0 %v13066_v40  ;;  %v13136_v37 = vld [vmem:[#allocation5 + $0x920] ss:$40 sps:$4 sm:$0xff]   ;;  %v13139_v40 = vld [vmem:[#allocation5 + $0x3d0] ss:$40 sps:$4 sm:$0xff]  }
 0x10d   :  { %3764 = vmatprep.subr.bf16.mxu1 %v13063_v39  ;;  %v13144_v39 = vld [vmem:[#allocation5 + $0x8d4] ss:$40 sps:$4 sm:$0xff]  }
 0x10f   :  { %3792 = vmatpush1.bf16.msra.mxu0 %v13064_v43  ;;  %v13147_v43 = vld [vmem:[#allocation5 + $0x384] ss:$40 sps:$4 sm:$0xff]  }
 0x110   :  { %3765 = vmatpush2.bf16.msra.mxu1 %v13061_v42  ;;  %3793 = vmatprep.subr.bf16.mxu0 %v13072_v45  ;;  %v13142_v42 = vld [vmem:[#allocation5 + $0x8d0] ss:$40 sps:$4 sm:$0xff]   ;;  %v13145_v45 = vld [vmem:[#allocation5 + $0x380] ss:$40 sps:$4 sm:$0xff]  }
 0x111   :  { %3766 = vmatprep.subr.bf16.mxu1 %v13069_v44  ;;  %v13150_v44 = vld [vmem:[#allocation5 + $0x884] ss:$40 sps:$4 sm:$0xff]  }
 0x113   :  { %3794 = vmatpush1.bf16.msra.mxu0 %v13070_v47  ;;  %v13153_v47 = vld [vmem:[#allocation5 + $0x334] ss:$40 sps:$4 sm:$0xff]  }
 0x114   :  { %3767 = vmatpush2.bf16.msra.mxu1 %v13067_v46  ;;  %3822 = vmatprep.subr.bf16.mxu0 %v13075_v49  ;;  %v13148_v46 = vld [vmem:[#allocation5 + $0x880] ss:$40 sps:$4 sm:$0xff]   ;;  %v13156_v49 = vld [vmem:[#allocation5 + $0x834] ss:$40 sps:$4 sm:$0xff]  }
 0x115   :  { %3865 = vmatprep.subr.bf16.mxu1 %v13078_v51  ;;  %v13151_v51 = vld [vmem:[#allocation5 + $0x330] ss:$40 sps:$4 sm:$0xff]  }
 0x116   :  { %3812 = vmatmul.mubr.bf16.vlgmr.msra.gmra.mxu0 %v15053_v41  ;;  %v13096_v41 = vld [vmem:[#allocation5 + $0x654] ss:$40 sps:$4 sm:$0xff]  }
 0x117   :  { %3769 = vmatmul.mubr.bf16.vlgmr.msra.gmra.mxu1 %v15057_v12  ;;  %3823 = vmatpush1.bf16.msra.mxu0 %v13073_v52  ;;  %v13088_v12 = vld [vmem:[#allocation5 + $0x6a0] ss:$40 sps:$4 sm:$0xff]   ;;  %v13154_v52 = vld [vmem:[#allocation5 + $0x830] ss:$40 sps:$4 sm:$0xff]  }
 0x118   :  { %3866 = vmatpush1.bf16.msra.mxu1 %v13076_v53  ;;  %3824 = vmatprep.subr.bf16.mxu0 %v13081_v54  ;;  %v13159_v53 = vld [vmem:[#allocation5 + $0x2e4] ss:$40 sps:$4 sm:$0xff]  }
 0x119   :  { %3867 = vmatprep.subr.bf16.mxu1 %v13084_v55  ;;  %3854 = vmatprep.mubr.bf16.mxu0 %v15067_v48  ;;  %v13162_v54 = vld [vmem:[#allocation5 + $0x7e4] ss:$40 sps:$4 sm:$0xff]   ;;  %v13157_v55 = vld [vmem:[#allocation5 + $0x2e0] ss:$40 sps:$4 sm:$0xff]  }
 0x11a   :  { %3897 = vmatprep.mubr.bf16.mxu1 %v14858_v60  ;;  %v13166_v60 = vld [vmem:[#allocation5 + $0x790] ss:$40 sps:$4 sm:$0xff]  }
 0x11b   :  { %3825 = vmatpush1.bf16.msra.mxu0 %v13079_v56  ;;  %v13160_v56 = vld [vmem:[#allocation5 + $0x7e0] ss:$40 sps:$4 sm:$0xff]  }
 0x11c   :  { %3868 = vmatpush1.bf16.msra.mxu1 %v13082_v57  ;;  %3826 = vmatprep.subr.bf16.mxu0 %v13087_v58  ;;  %v13165_v57 = vld [vmem:[#allocation5 + $0x294] ss:$40 sps:$4 sm:$0xff]  }
 0x11d   :  { %3869 = vmatprep.subr.bf16.mxu1 %v13090_v59  ;;  %v13168_v58 = vld [vmem:[#allocation5 + $0x794] ss:$40 sps:$4 sm:$0xff]   ;;  %v13163_v59 = vld [vmem:[#allocation5 + $0x290] ss:$40 sps:$4 sm:$0xff]  }
 0x11f   :  { %3827 = vmatpush1.bf16.msra.mxu0 %v13085_v4  ;;  %v13171_v4 = vld [vmem:[#allocation5 + $0xc44] ss:$40 sps:$4 sm:$0xff]  }
 0x120   :  { %3870 = vmatpush1.bf16.msra.mxu1 %v13088_v12  ;;  %3828 = vmatprep.subr.bf16.mxu0 %v13093_v61  ;;  %v13174_v12 = vld [vmem:[#allocation5 + $0x1144] ss:$40 sps:$4 sm:$0xff]   ;;  %v13169_v61 = vld [vmem:[#allocation5 + $0xc40] ss:$40 sps:$4 sm:$0xff]  }
 0x121   :  { %3871 = vmatprep.subr.bf16.mxu1 %v13096_v41  ;;  %v13172_v41 = vld [vmem:[#allocation5 + $0x1140] ss:$40 sps:$4 sm:$0xff]  }
 0x123   :  { %3829 = vmatpush1.bf16.msra.mxu0 %v13091_v62  ;;  %v13177_v62 = vld [vmem:[#allocation5 + $0xbf4] ss:$40 sps:$4 sm:$0xff]  }
 0x124   :  { %3872 = vmatpush1.bf16.msra.mxu1 %v13094_v63  ;;  %3830 = vmatprep.subr.bf16.mxu0 %v13099_v35  ;;  %v13180_v63 = vld [vmem:[#allocation5 + $0x10f4] ss:$40 sps:$4 sm:$0xff]   ;;  %v13175_v35 = vld [vmem:[#allocation5 + $0xbf0] ss:$40 sps:$4 sm:$0xff]  }
 0x125   :  { %3873 = vmatprep.subr.bf16.mxu1 %v13102_v0  ;;  %v13178_v0 = vld [vmem:[#allocation5 + $0x10f0] ss:$40 sps:$4 sm:$0xff]  }
 0x127   :  { %3831 = vmatpush1.bf16.msra.mxu0 %v13097_v1  ;;  %v15078_v1 = vld [vmem:[#allocation2] ss:$28 sps:$4 sm:$0xff]  }
 0x128   :  { %3874 = vmatpush1.bf16.msra.mxu1 %v13100_v2  ;;  %3832 = vmatprep.subr.bf16.mxu0 %v13105_v3  ;;  %v14860_v2 = vld [vmem:[#allocation2 + $0x8] ss:$28 sps:$4 sm:$0xff]  }
 0x129   :  { %3875 = vmatprep.subr.bf16.mxu1 %v13108_v6  ;;  %v13183_v3 = vld [vmem:[#allocation5 + $0xba4] ss:$40 sps:$4 sm:$0xff]  }
 0x12a   :  { %v13186_v6 = vld [vmem:[#allocation5 + $0x10a4] ss:$40 sps:$4 sm:$0xff]  }
 0x12b   :  { %3833 = vmatpush1.bf16.msra.mxu0 %v13103_v7  ;;  %v13181_v7 = vld [vmem:[#allocation5 + $0xba0] ss:$40 sps:$4 sm:$0xff]  }
 0x12c   :  { %3876 = vmatpush1.bf16.msra.mxu1 %v13106_v8  ;;  %3834 = vmatprep.subr.bf16.mxu0 %v13111_v9  ;;  %v13184_v8 = vld [vmem:[#allocation5 + $0x10a0] ss:$40 sps:$4 sm:$0xff]   ;;  %v15082_v9 = vld [vmem:[#allocation2 + $0x14] ss:$28 sps:$4 sm:$0xff]  }
 0x12d   :  { %3877 = vmatprep.subr.bf16.mxu1 %v13114_v10  ;;  %v13189_v10 = vld [vmem:[#allocation5 + $0xb54] ss:$40 sps:$4 sm:$0xff]  }
 0x12f   :  { %3835 = vmatpush1.bf16.msra.mxu0 %v13109_v11  ;;  %v13192_v11 = vld [vmem:[#allocation5 + $0x1054] ss:$40 sps:$4 sm:$0xff]  }
 0x130   :  { %3878 = vmatpush1.bf16.msra.mxu1 %v13112_v13  ;;  %3836 = vmatprep.subr.bf16.mxu0 %v13117_v15  ;;  %v13187_v13 = vld [vmem:[#allocation5 + $0xb50] ss:$40 sps:$4 sm:$0xff]  }
 0x131   :  { %3879 = vmatprep.subr.bf16.mxu1 %v13120_v16  ;;  %v13190_v15 = vld [vmem:[#allocation5 + $0x1050] ss:$40 sps:$4 sm:$0xff]   ;;  %v13195_v16 = vld [vmem:[#allocation5 + $0xb04] ss:$40 sps:$4 sm:$0xff]  }
 0x133   :  { %3837 = vmatpush1.bf16.msra.mxu0 %v13115_v17  ;;  %v13198_v17 = vld [vmem:[#allocation5 + $0x1004] ss:$40 sps:$4 sm:$0xff]  }
 0x134   :  { %3880 = vmatpush1.bf16.msra.mxu1 %v13118_v18  ;;  %3838 = vmatprep.subr.bf16.mxu0 %v13123_v19  ;;  %v13193_v18 = vld [vmem:[#allocation5 + $0xb00] ss:$40 sps:$4 sm:$0xff]  }
 0x135   :  { %3881 = vmatprep.subr.bf16.mxu1 %v13126_v20  ;;  %v13196_v19 = vld [vmem:[#allocation5 + $0x1000] ss:$40 sps:$4 sm:$0xff]   ;;  %v13201_v20 = vld [vmem:[#allocation5 + $0xab4] ss:$40 sps:$4 sm:$0xff]  }
 0x136   :  { %v3512_v25 = vpop.f32.mrf.mxu0 }
 0x137   :  { %v3555_v26 = vpop.f32.mrf.mxu1  ;;  %3839 = vmatpush2.bf16.msra.mxu0 %v13121_v21  ;;  %v13204_v21 = vld [vmem:[#allocation5 + $0xfb4] ss:$40 sps:$4 sm:$0xff]  }
 0x138   :  { %v15070_v28 = vadd.f32 %v3555_v26, %v3512_v25  ;;  %3882 = vmatpush2.bf16.msra.mxu1 %v13124_v22  ;;  %v15072_v5 = vpop.f32.mrf.mxu0  ;;  %3840 = vmatprep.subr.bf16.mxu0 %v13129_v23  ;;  %v13199_v22 = vld [vmem:[#allocation5 + $0xab0] ss:$40 sps:$4 sm:$0xff]   ;;  %v13210_v25 = vld [vmem:[#allocation5 + $0xf64] ss:$40 sps:$4 sm:$0xff]   ;;  %v13205_v26 = vld [vmem:[#allocation5 + $0xa60] ss:$40 sps:$4 sm:$0xff]  }
 0x139   :  { %v15074_v50 = vpop.f32.mrf.mxu1  ;;  %3883 = vmatprep.subr.bf16.mxu1 %v13132_v24  ;;  %v13202_v23 = vld [vmem:[#allocation5 + $0xfb0] ss:$40 sps:$4 sm:$0xff]   ;;  %v13207_v24 = vld [vmem:[#allocation5 + $0xa64] ss:$40 sps:$4 sm:$0xff]  }
 0x13a   :  { %v3516_v32 = vpop.f32.mrf.mxu0 }
 0x13b   :  { %v3559_v33 = vpop.f32.mrf.mxu1  ;;  %3841 = vmatpush2.bf16.msra.mxu0 %v13127_v27  ;;  %v13208_v27 = vld [vmem:[#allocation5 + $0xf60] ss:$40 sps:$4 sm:$0xff]  }
 0x13c   :  { %v15076_v36 = vadd.f32 %v3559_v33, %v3516_v32  ;;  %3884 = vmatpush2.bf16.msra.mxu1 %v13130_v29  ;;  %3842 = vmatprep.subr.bf16.mxu0 %v13135_v30  ;;  %v13213_v29 = vld [vmem:[#allocation5 + $0xa14] ss:$40 sps:$4 sm:$0xff]   ;;  %v13214_v32 = vld [vmem:[#allocation5 + $0xf10] ss:$40 sps:$4 sm:$0xff]   ;;  %v13219_v33 = vld [vmem:[#allocation5 + $0xec4] ss:$40 sps:$4 sm:$0xff]  }
 0x13d   :  { %3885 = vmatprep.subr.bf16.mxu1 %v13138_v31  ;;  %v13216_v30 = vld [vmem:[#allocation5 + $0xf14] ss:$40 sps:$4 sm:$0xff]   ;;  %v13211_v31 = vld [vmem:[#allocation5 + $0xa10] ss:$40 sps:$4 sm:$0xff]  }
 0x13f   :  { %3843 = vmatpush2.bf16.msra.mxu0 %v13133_v34  ;;  %v13222_v34 = vld [vmem:[#allocation5 + $0x24c] ss:$40 sps:$4 sm:$0xff]  }
 0x140   :  { %3886 = vmatpush2.bf16.msra.mxu1 %v13136_v37  ;;  %3844 = vmatprep.subr.bf16.mxu0 %v13141_v38  ;;  %v13217_v37 = vld [vmem:[#allocation5 + $0xec0] ss:$40 sps:$4 sm:$0xff]  }
 0x141   :  { %3887 = vmatprep.subr.bf16.mxu1 %v13144_v39  ;;  %v13220_v38 = vld [vmem:[#allocation5 + $0x248] ss:$40 sps:$4 sm:$0xff]   ;;  %v15085_v39 = vpop.f32.mrf.mxu1 }
 0x143   :  { %3845 = vmatpush2.bf16.msra.mxu0 %v13139_v40  ;;  %v15087_v40 = vpop.f32.mrf.mxu0 }
 0x144   :  { %3888 = vmatpush2.bf16.msra.mxu1 %v13142_v42  ;;  %3846 = vmatprep.subr.bf16.mxu0 %v13147_v43  ;;  %v13225_v43 = vld [vmem:[#allocation5 + $0xe74] ss:$40 sps:$4 sm:$0xff]  }
 0x145   :  { %3889 = vmatprep.subr.bf16.mxu1 %v13150_v44  ;;  %v13228_v44 = vld [vmem:[#allocation5 + $0x1fc] ss:$40 sps:$4 sm:$0xff]  }
 0x147   :  { %3847 = vmatpush2.bf16.msra.mxu0 %v13145_v45 }
 0x148   :  { %3890 = vmatpush2.bf16.msra.mxu1 %v13148_v46  ;;  %3848 = vmatprep.subr.bf16.mxu0 %v13153_v47  ;;  %v14862_v46 = vld [vmem:[#allocation2 + $0x18] ss:$28 sps:$4 sm:$0xff]  }
 0x149   :  { %3891 = vmatprep.subr.bf16.mxu1 %v13156_v49  ;;  %v13223_v49 = vld [vmem:[#allocation5 + $0xe70] ss:$40 sps:$4 sm:$0xff]  }
 0x14b   :  { %3849 = vmatpush2.bf16.msra.mxu0 %v13151_v51  ;;  %v13226_v51 = vld [vmem:[#allocation5 + $0x1f8] ss:$40 sps:$4 sm:$0xff]  }
 0x14c   :  { %3892 = vmatpush2.bf16.msra.mxu1 %v13154_v52  ;;  %3850 = vmatprep.subr.bf16.mxu0 %v13159_v53 }
 0x14d   :  { %3893 = vmatprep.subr.bf16.mxu1 %v13162_v54  ;;  %v13231_v54 = vld [vmem:[#allocation5 + $0xe24] ss:$40 sps:$4 sm:$0xff]  }
 0x14f   :  { %3851 = vmatpush2.bf16.msra.mxu0 %v13157_v55  ;;  %v13234_v55 = vld [vmem:[#allocation5 + $0x1ac] ss:$40 sps:$4 sm:$0xff]  }
 0x150   :  { %3894 = vmatpush2.bf16.msra.mxu1 %v13160_v56  ;;  %3852 = vmatprep.subr.bf16.mxu0 %v13165_v57 }
 0x151   :  { %3895 = vmatprep.subr.bf16.mxu1 %v13168_v58 }
 0x153   :  { %3853 = vmatpush2.bf16.msra.mxu0 %v13163_v59  ;;  %v13232_v59 = vld [vmem:[#allocation5 + $0x1a8] ss:$40 sps:$4 sm:$0xff]  }
 0x154   :  { %3896 = vmatpush2.bf16.msra.mxu1 %v13166_v60  ;;  %3908 = vmatprep.subr.bf16.mxu0 %v13171_v4  ;;  %v13237_v4 = vld [vmem:[#allocation5 + $0xdd4] ss:$40 sps:$4 sm:$0xff]  }
 0x155   :  { %3951 = vmatprep.subr.bf16.mxu1 %v13174_v12  ;;  %v13240_v12 = vld [vmem:[#allocation5 + $0x15c] ss:$40 sps:$4 sm:$0xff]  }
 0x156   :  { %3855 = vmatmul.mubr.bf16.vlgmr.msra.gmra.mxu0 %v15078_v1 }
 0x157   :  { %3898 = vmatmul.mubr.bf16.vlgmr.msra.gmra.mxu1 %v14860_v2  ;;  %3909 = vmatpush1.bf16.msra.mxu0 %v13169_v61  ;;  %v3641_v42 = vpop.f32.mrf.mxu1  ;;  %v13241_v2 = vld [vmem:[#allocation5 + $0xd80] ss:$40 sps:$4 sm:$0xff]  }
 0x158   :  { %3952 = vmatpush1.bf16.msra.mxu1 %v13172_v41  ;;  %3910 = vmatprep.subr.bf16.mxu0 %v13177_v62  ;;  %v13235_v41 = vld [vmem:[#allocation5 + $0xdd0] ss:$40 sps:$4 sm:$0xff]  }
 0x159   :  { %3953 = vmatprep.subr.bf16.mxu1 %v13180_v63  ;;  %3983 = vmatprep.mubr.bf16.mxu1 %v14989_v14  ;;  %v15090_v52 = vpop.f32.mrf.mxu1 }
 0x15a   :  { %3940 = vmatprep.mubr.bf16.mxu0 %v15082_v9 }
 0x15b   :  { %3911 = vmatpush1.bf16.msra.mxu0 %v13175_v35  ;;  %v3645_v60 = vpop.f32.mrf.mxu1  ;;  %v13238_v35 = vld [vmem:[#allocation5 + $0x158] ss:$40 sps:$4 sm:$0xff]  }
 0x15c   :  { %3954 = vmatpush1.bf16.msra.mxu1 %v13178_v0  ;;  %3912 = vmatprep.subr.bf16.mxu0 %v13183_v3  ;;  %v13244_v3 = vld [vmem:[#allocation5 + $0x108] ss:$40 sps:$4 sm:$0xff]  }
 0x15d   :  { %3955 = vmatprep.subr.bf16.mxu1 %v13186_v6  ;;  %v13249_v6 = vld [vmem:[#allocation5 + $0xd34] ss:$40 sps:$4 sm:$0xff]  }
 0x15f   :  { %3913 = vmatpush1.bf16.msra.mxu0 %v13181_v7  ;;  %v13252_v7 = vld [vmem:[#allocation5 + $0xbc] ss:$40 sps:$4 sm:$0xff]  }
 0x160   :  { %3956 = vmatpush1.bf16.msra.mxu1 %v13184_v8  ;;  %3914 = vmatprep.subr.bf16.mxu0 %v13189_v10  ;;  %v13247_v8 = vld [vmem:[#allocation5 + $0xd30] ss:$40 sps:$4 sm:$0xff]  }
 0x161   :  { %3957 = vmatprep.subr.bf16.mxu1 %v13192_v11  ;;  %v13250_v10 = vld [vmem:[#allocation5 + $0xb8] ss:$40 sps:$4 sm:$0xff]   ;;  %v13255_v11 = vld [vmem:[#allocation5 + $0xce4] ss:$40 sps:$4 sm:$0xff]  }
 0x163   :  { %3915 = vmatpush1.bf16.msra.mxu0 %v13187_v13  ;;  %v13258_v13 = vld [vmem:[#allocation5 + $0x6c] ss:$40 sps:$4 sm:$0xff]  }
 0x164   :  { %3958 = vmatpush1.bf16.msra.mxu1 %v13190_v15  ;;  %3916 = vmatprep.subr.bf16.mxu0 %v13195_v16  ;;  %v13253_v15 = vld [vmem:[#allocation5 + $0xce0] ss:$40 sps:$4 sm:$0xff]  }
 0x165   :  { %3959 = vmatprep.subr.bf16.mxu1 %v13198_v17  ;;  %v13256_v16 = vld [vmem:[#allocation5 + $0x68] ss:$40 sps:$4 sm:$0xff]   ;;  %v13261_v17 = vld [vmem:[#allocation5 + $0xc94] ss:$40 sps:$4 sm:$0xff]  }
 0x167   :  { %3917 = vmatpush1.bf16.msra.mxu0 %v13193_v18  ;;  %v13264_v18 = vld [vmem:[#allocation5 + $0x1c] ss:$40 sps:$4 sm:$0xff]  }
 0x168   :  { %3960 = vmatpush1.bf16.msra.mxu1 %v13196_v19  ;;  %3918 = vmatprep.subr.bf16.mxu0 %v13201_v20  ;;  %v13259_v19 = vld [vmem:[#allocation5 + $0xc90] ss:$40 sps:$4 sm:$0xff]  }
 0x169   :  { %3961 = vmatprep.subr.bf16.mxu1 %v13204_v21  ;;  %v13262_v20 = vld [vmem:[#allocation5 + $0x18] ss:$40 sps:$4 sm:$0xff]   ;;  %v13267_v21 = vld [vmem:[#allocation5 + $0x4cc] ss:$40 sps:$4 sm:$0xff]  }
 0x16b   :  { %3919 = vmatpush1.bf16.msra.mxu0 %v13199_v22  ;;  %v13270_v22 = vld [vmem:[#allocation5 + $0x74c] ss:$40 sps:$4 sm:$0xff]  }
 0x16c   :  { %3962 = vmatpush1.bf16.msra.mxu1 %v13202_v23  ;;  %3920 = vmatprep.subr.bf16.mxu0 %v13207_v24  ;;  %v13265_v23 = vld [vmem:[#allocation5 + $0x4c8] ss:$40 sps:$4 sm:$0xff]  }
 0x16d   :  { %3963 = vmatprep.subr.bf16.mxu1 %v13210_v25  ;;  %v13268_v24 = vld [vmem:[#allocation5 + $0x748] ss:$40 sps:$4 sm:$0xff]   ;;  %v13273_v25 = vld [vmem:[#allocation5 + $0x47c] ss:$40 sps:$4 sm:$0xff]  }
 0x16f   :  { %3921 = vmatpush1.bf16.msra.mxu0 %v13205_v26  ;;  %v13276_v26 = vld [vmem:[#allocation5 + $0x6fc] ss:$40 sps:$4 sm:$0xff]  }
 0x170   :  { %3964 = vmatpush1.bf16.msra.mxu1 %v13208_v27  ;;  %3922 = vmatprep.subr.bf16.mxu0 %v13213_v29  ;;  %v13271_v27 = vld [vmem:[#allocation5 + $0x478] ss:$40 sps:$4 sm:$0xff]  }
 0x171   :  { %3965 = vmatprep.subr.bf16.mxu1 %v13216_v30  ;;  %v13274_v29 = vld [vmem:[#allocation5 + $0x6f8] ss:$40 sps:$4 sm:$0xff]  }
 0x172   :  { %v15098_v30 = vld [vmem:[#allocation2 + $0x10] ss:$28 sps:$4 sm:$0xff]  }
 0x173   :  { %3923 = vmatpush1.bf16.msra.mxu0 %v13211_v31  ;;  %v13279_v31 = vld [vmem:[#allocation5 + $0x42c] ss:$40 sps:$4 sm:$0xff]  }
 0x174   :  { %3966 = vmatpush1.bf16.msra.mxu1 %v13214_v32  ;;  %3924 = vmatprep.subr.bf16.mxu0 %v13219_v33  ;;  %v13282_v32 = vld [vmem:[#allocation5 + $0x6ac] ss:$40 sps:$4 sm:$0xff]   ;;  %v13277_v33 = vld [vmem:[#allocation5 + $0x428] ss:$40 sps:$4 sm:$0xff]  }
 0x175   :  { %3994 = vmatprep.subr.bf16.mxu1 %v13222_v34  ;;  %v13280_v34 = vld [vmem:[#allocation5 + $0x6a8] ss:$40 sps:$4 sm:$0xff]  }
 0x176   :  { %v3598_v45 = vpop.f32.mrf.mxu0 }
 0x177   :  { %3984 = vmatmul.mubr.bf16.vlgmr.msra.gmra.mxu1 %v14862_v46  ;;  %v3599_v47 = vadd.f32 %v3598_v45, %v15070_v28  ;;  %3925 = vmatpush2.bf16.msra.mxu0 %v13217_v37  ;;  %v13229_v28 = vld [vmem:[#allocation5 + $0xe20] ss:$40 sps:$4 sm:$0xff]   ;;  %v15101_v37 = vld [vmem:[#allocation2 + $0xc] ss:$28 sps:$4 sm:$0xff]  }
 0x178   :  { %3995 = vmatpush1.bf16.msra.mxu1 %v13220_v38  ;;  %v15092_v53 = vpop.f32.mrf.mxu0  ;;  %3926 = vmatprep.subr.bf16.mxu0 %v13225_v43  ;;  %v13285_v38 = vld [vmem:[#allocation5 + $0x3dc] ss:$40 sps:$4 sm:$0xff]   ;;  %v13283_v43 = vld [vmem:[#allocation5 + $0x3d8] ss:$40 sps:$4 sm:$0xff]   ;;  %v13291_v45 = vld [vmem:[#allocation5 + $0x38c] ss:$40 sps:$4 sm:$0xff]  }
 0x179   :  { %3996 = vmatprep.subr.bf16.mxu1 %v13228_v44  ;;  %v3642_v56 = vadd.f32 %v3641_v42, %v3599_v47  ;;  %4026 = vmatprep.mubr.bf16.mxu1 %v15067_v48  ;;  %v13243_v48 = vld [vmem:[#allocation5 + $0xd84] ss:$40 sps:$4 sm:$0xff]   ;;  %v13286_v44 = vld [vmem:[#allocation5 + $0x658] ss:$40 sps:$4 sm:$0xff]   ;;  %v13289_v47 = vld [vmem:[#allocation5 + $0x388] ss:$40 sps:$4 sm:$0xff]  }
 0x17a   :  { %v3602_v57 = vpop.f32.mrf.mxu0  ;;  %v13288_v42 = vld [vmem:[#allocation5 + $0x65c] ss:$40 sps:$4 sm:$0xff]   ;;  %v13294_v46 = vld [vmem:[#allocation5 + $0x60c] ss:$40 sps:$4 sm:$0xff]  }
 0x17b   :  { %v3603_v58 = vadd.f32 %v3602_v57, %v15076_v36  ;;  %3927 = vmatpush2.bf16.msra.mxu0 %v13223_v49  ;;  %v4338_v62 = vmax.f32 %v3642_v56, 0.0  ;;  %v13246_v36 = vld [vmem:[#allocation5 + $0x10c] ss:$40 sps:$4 sm:$0xff]   ;;  %v13292_v49 = vld [vmem:[#allocation5 + $0x608] ss:$40 sps:$4 sm:$0xff]  }
 0x17c   :  { %3997 = vmatpush1.bf16.msra.mxu1 %v13226_v51  ;;  %3928 = vmatprep.subr.bf16.mxu0 %v13231_v54  ;;  %v13297_v51 = vld [vmem:[#allocation5 + $0x33c] ss:$40 sps:$4 sm:$0xff]   ;;  %v13298_v56 = vld [vmem:[#allocation5 + $0x5b8] ss:$40 sps:$4 sm:$0xff]   ;;  %v13303_v57 = vld [vmem:[#allocation5 + $0x2ec] ss:$40 sps:$4 sm:$0xff]  }
 0x17d   :  { %3998 = vmatprep.subr.bf16.mxu1 %v13234_v55  ;;  %v3646_v61 = vadd.f32 %v3645_v60, %v3603_v58  ;;  %v13300_v54 = vld [vmem:[#allocation5 + $0x5bc] ss:$40 sps:$4 sm:$0xff]   ;;  %v13295_v55 = vld [vmem:[#allocation5 + $0x338] ss:$40 sps:$4 sm:$0xff]   ;;  %v13306_v58 = vld [vmem:[#allocation5 + $0x56c] ss:$40 sps:$4 sm:$0xff]  }
 0x17e   :  { %v13309_v60 = vld [vmem:[#allocation5 + $0x29c] ss:$40 sps:$4 sm:$0xff]  }
 0x17f   :  { %v4348_v63 = vmax.f32 %v3646_v61, 0.0  ;;  %3929 = vmatpush2.bf16.msra.mxu0 %v13229_v28  ;;  %v13301_v28 = vld [vmem:[#allocation5 + $0x2e8] ss:$40 sps:$4 sm:$0xff]   ;;  %v13310_v61 = vld [vmem:[#allocation5 + $0x518] ss:$40 sps:$4 sm:$0xff]  }
 0x180   :  { %3999 = vmatpush1.bf16.msra.mxu1 %v13232_v59  ;;  %3930 = vmatprep.subr.bf16.mxu0 %v13237_v4  ;;  %v13304_v59 = vld [vmem:[#allocation5 + $0x568] ss:$40 sps:$4 sm:$0xff]   ;;  %v13312_v4 = vld [vmem:[#allocation5 + $0x51c] ss:$40 sps:$4 sm:$0xff]  }
 0x181   :  { %4000 = vmatprep.subr.bf16.mxu1 %v13240_v12  ;;  %v15096_v0 = vpack.c.bf16 %v4348_v63, %v4338_v62  ;;  %v13307_v12 = vld [vmem:[#allocation5 + $0x298] ss:$40 sps:$4 sm:$0xff]   ;;  %v13315_v62 = vld [vmem:[#allocation5 + $0x9cc] ss:$40 sps:$4 sm:$0xff]  }
 0x182   :  { %v13318_v63 = vld [vmem:[#allocation5 + $0xc4c] ss:$40 sps:$4 sm:$0xff]  }
 0x183   :  { %3931 = vmatpush2.bf16.msra.mxu0 %v13235_v41  ;;  %v15104_v41 = vpop.f32.mrf.mxu1 }
 0x184   :  { %4001 = vmatpush1.bf16.msra.mxu1 %v13238_v35  ;;  %3932 = vmatprep.subr.bf16.mxu0 %v13243_v48  ;;  %v13313_v35 = vld [vmem:[#allocation5 + $0x9c8] ss:$40 sps:$4 sm:$0xff]  }
 0x185   :  { %4002 = vmatprep.subr.bf16.mxu1 %v13246_v36  ;;  %v13316_v48 = vld [vmem:[#allocation5 + $0xc48] ss:$40 sps:$4 sm:$0xff]  }
 0x187   :  { %3933 = vmatpush2.bf16.msra.mxu0 %v13241_v2  ;;  %v15106_v2 = vpop.f32.mrf.mxu0 }
 0x188   :  { %4003 = vmatpush1.bf16.msra.mxu1 %v13244_v3  ;;  %3934 = vmatprep.subr.bf16.mxu0 %v13249_v6  ;;  %v13321_v3 = vld [vmem:[#allocation5 + $0x97c] ss:$40 sps:$4 sm:$0xff]  }
 0x189   :  { %4004 = vmatprep.subr.bf16.mxu1 %v13252_v7  ;;  %v13324_v6 = vld [vmem:[#allocation5 + $0xbfc] ss:$40 sps:$4 sm:$0xff]  }
 0x18b   :  { %3935 = vmatpush2.bf16.msra.mxu0 %v13247_v8 }
 0x18c   :  { %4005 = vmatpush1.bf16.msra.mxu1 %v13250_v10  ;;  %3936 = vmatprep.subr.bf16.mxu0 %v13255_v11  ;;  %v13319_v11 = vld [vmem:[#allocation5 + $0x978] ss:$40 sps:$4 sm:$0xff]  }
 0x18d   :  { %4006 = vmatprep.subr.bf16.mxu1 %v13258_v13  ;;  %v13322_v13 = vld [vmem:[#allocation5 + $0xbf8] ss:$40 sps:$4 sm:$0xff]  }
 0x18f   :  { %3937 = vmatpush2.bf16.msra.mxu0 %v13253_v15 }
 0x190   :  { %4007 = vmatpush1.bf16.msra.mxu1 %v13256_v16  ;;  %3938 = vmatprep.subr.bf16.mxu0 %v13261_v17  ;;  %v13327_v16 = vld [vmem:[#allocation5 + $0x92c] ss:$40 sps:$4 sm:$0xff]  }
 0x191   :  { %4008 = vmatprep.subr.bf16.mxu1 %v13264_v18  ;;  %v13330_v17 = vld [vmem:[#allocation5 + $0xbac] ss:$40 sps:$4 sm:$0xff]  }
 0x193   :  { %3939 = vmatpush2.bf16.msra.mxu0 %v13259_v19 }
 0x194   :  { %4009 = vmatpush1.bf16.msra.mxu1 %v13262_v20  ;;  %4037 = vmatprep.subr.bf16.mxu0 %v13270_v22  ;;  %v13333_v22 = vld [vmem:[#allocation5 + $0x8dc] ss:$40 sps:$4 sm:$0xff]  }
 0x195   :  { %4010 = vmatprep.subr.bf16.mxu1 %v13267_v21  ;;  %v13328_v21 = vld [vmem:[#allocation5 + $0xba8] ss:$40 sps:$4 sm:$0xff]  }
 0x196   :  { %3941 = vmatmul.mubr.bf16.vlgmr.msra.gmra.mxu0 %v15098_v30 }
 0x197   :  { %4038 = vmatpush1.bf16.msra.mxu0 %v13268_v24  ;;  %4069 = vmatprep.mubr.bf16.mxu0 %v15101_v37  ;;  %v3684_v36 = vpop.f32.mrf.mxu1  ;;  %v13331_v24 = vld [vmem:[#allocation5 + $0x8d8] ss:$40 sps:$4 sm:$0xff]  }
 0x198   :  { %4011 = vmatpush2.bf16.msra.mxu1 %v13265_v23  ;;  %4039 = vmatprep.subr.bf16.mxu0 %v13276_v26  ;;  %v13336_v23 = vld [vmem:[#allocation5 + $0xb5c] ss:$40 sps:$4 sm:$0xff]   ;;  %v13339_v26 = vld [vmem:[#allocation5 + $0x88c] ss:$40 sps:$4 sm:$0xff]  }
 0x199   :  { %4012 = vmatprep.subr.bf16.mxu1 %v13273_v25  ;;  %v15108_v7 = vpop.f32.mrf.mxu1  ;;  %v13334_v25 = vld [vmem:[#allocation5 + $0xb58] ss:$40 sps:$4 sm:$0xff]  }
 0x19b   :  { %4040 = vmatpush1.bf16.msra.mxu0 %v13274_v29  ;;  %v3688_v18 = vpop.f32.mrf.mxu1  ;;  %v13340_v29 = vld [vmem:[#allocation5 + $0xb08] ss:$40 sps:$4 sm:$0xff]  }
 0x19c   :  { %4013 = vmatpush2.bf16.msra.mxu1 %v13271_v27  ;;  %4041 = vmatprep.subr.bf16.mxu0 %v13282_v32  ;;  %v13337_v27 = vld [vmem:[#allocation5 + $0x888] ss:$40 sps:$4 sm:$0xff]   ;;  %v13348_v32 = vld [vmem:[#allocation5 + $0xabc] ss:$40 sps:$4 sm:$0xff]  }
 0x19d   :  { %4014 = vmatprep.subr.bf16.mxu1 %v13279_v31  ;;  %v13345_v31 = vld [vmem:[#allocation5 + $0x83c] ss:$40 sps:$4 sm:$0xff]  }
 0x19f   :  { %4042 = vmatpush1.bf16.msra.mxu0 %v13280_v34  ;;  %v13346_v34 = vld [vmem:[#allocation5 + $0xab8] ss:$40 sps:$4 sm:$0xff]  }
 0x1a0   :  { %4015 = vmatpush2.bf16.msra.mxu1 %v13277_v33  ;;  %4043 = vmatprep.subr.bf16.mxu0 %v13288_v42  ;;  %v13343_v33 = vld [vmem:[#allocation5 + $0x838] ss:$40 sps:$4 sm:$0xff]   ;;  %v13354_v42 = vld [vmem:[#allocation5 + $0xa6c] ss:$40 sps:$4 sm:$0xff]  }
 0x1a1   :  { %4016 = vmatprep.subr.bf16.mxu1 %v13285_v38  ;;  %v13351_v38 = vld [vmem:[#allocation5 + $0x7ec] ss:$40 sps:$4 sm:$0xff]  }
 0x1a3   :  { %4044 = vmatpush1.bf16.msra.mxu0 %v13286_v44  ;;  %v13352_v44 = vld [vmem:[#allocation5 + $0xa68] ss:$40 sps:$4 sm:$0xff]  }
 0x1a4   :  { %4017 = vmatpush2.bf16.msra.mxu1 %v13283_v43  ;;  %4045 = vmatprep.subr.bf16.mxu0 %v13294_v46  ;;  %v13349_v43 = vld [vmem:[#allocation5 + $0x7e8] ss:$40 sps:$4 sm:$0xff]   ;;  %v13360_v46 = vld [vmem:[#allocation5 + $0xa1c] ss:$40 sps:$4 sm:$0xff]  }
 0x1a5   :  { %4018 = vmatprep.subr.bf16.mxu1 %v13291_v45  ;;  %v13357_v45 = vld [vmem:[#allocation5 + $0x79c] ss:$40 sps:$4 sm:$0xff]  }
 0x1a7   :  { %4046 = vmatpush1.bf16.msra.mxu0 %v13292_v49  ;;  %v13358_v49 = vld [vmem:[#allocation5 + $0xa18] ss:$40 sps:$4 sm:$0xff]  }
 0x1a8   :  { %4019 = vmatpush2.bf16.msra.mxu1 %v13289_v47  ;;  %4047 = vmatprep.subr.bf16.mxu0 %v13300_v54  ;;  %v13355_v47 = vld [vmem:[#allocation5 + $0x798] ss:$40 sps:$4 sm:$0xff]   ;;  %v13366_v54 = vld [vmem:[#allocation5 + $0x114c] ss:$40 sps:$4 sm:$0xff]  }
 0x1a9   :  { %4020 = vmatprep.subr.bf16.mxu1 %v13297_v51  ;;  %v13363_v51 = vld [vmem:[#allocation5 + $0xecc] ss:$40 sps:$4 sm:$0xff]  }
 0x1ab   :  { %4048 = vmatpush1.bf16.msra.mxu0 %v13298_v56  ;;  %v13364_v56 = vld [vmem:[#allocation5 + $0x1148] ss:$40 sps:$4 sm:$0xff]  }
 0x1ac   :  { %4021 = vmatpush2.bf16.msra.mxu1 %v13295_v55  ;;  %4049 = vmatprep.subr.bf16.mxu0 %v13306_v58  ;;  %v13361_v55 = vld [vmem:[#allocation5 + $0xec8] ss:$40 sps:$4 sm:$0xff]  }
 0x1ad   :  { %4022 = vmatprep.subr.bf16.mxu1 %v13303_v57  ;;  %v15118_v57 = vpop.f32.mrf.mxu1 }
 0x1af   :  { %4050 = vmatpush1.bf16.msra.mxu0 %v13304_v59  ;;  %v13372_v59 = vld [vmem:[#allocation5 + $0x10fc] ss:$40 sps:$4 sm:$0xff]  }
 0x1b0   :  { %4023 = vmatpush2.bf16.msra.mxu1 %v13301_v28  ;;  %4051 = vmatprep.subr.bf16.mxu0 %v13312_v4  ;;  %v13369_v28 = vld [vmem:[#allocation5 + $0xe7c] ss:$40 sps:$4 sm:$0xff]   ;;  %v13370_v4 = vld [vmem:[#allocation5 + $0x10f8] ss:$40 sps:$4 sm:$0xff]  }
 0x1b1   :  { %4024 = vmatprep.subr.bf16.mxu1 %v13309_v60  ;;  %v13367_v60 = vld [vmem:[#allocation5 + $0xe78] ss:$40 sps:$4 sm:$0xff]  }
 0x1b3   :  { %4052 = vmatpush1.bf16.msra.mxu0 %v13310_v61 }
 0x1b4   :  { %4025 = vmatpush2.bf16.msra.mxu1 %v13307_v12  ;;  %4053 = vmatprep.subr.bf16.mxu0 %v13315_v62  ;;  %v15122_v62 = vld [vmem:[#allocation2 + $0x8] ss:$28 sps:$4 sm:$0xff]  }
 0x1b5   :  { %4080 = vmatprep.subr.bf16.mxu1 %v13318_v63  ;;  %v13375_v63 = vld [vmem:[#allocation5 + $0xe2c] ss:$40 sps:$4 sm:$0xff]  }
 0x1b6   :  { %v3727_v8 = vpop.f32.mrf.mxu0 }
 0x1b7   :  { %4027 = vmatmul.mubr.bf16.vlgmr.msra.gmra.mxu1 %v15078_v1  ;;  %v15111_v10 = vadd.f32 %v3727_v8, %v3684_v36  ;;  %4054 = vmatpush2.bf16.msra.mxu0 %v13313_v35  ;;  %v13325_v1 = vld [vmem:[#allocation5 + $0x928] ss:$40 sps:$4 sm:$0xff]   ;;  %v13378_v35 = vld [vmem:[#allocation5 + $0x10ac] ss:$40 sps:$4 sm:$0xff]  }
 0x1b8   :  { %4081 = vmatpush1.bf16.msra.mxu1 %v13316_v48  ;;  %v15113_v15 = vpop.f32.mrf.mxu0  ;;  %4055 = vmatprep.subr.bf16.mxu0 %v13321_v3  ;;  %v13373_v8 = vld [vmem:[#allocation5 + $0xe28] ss:$40 sps:$4 sm:$0xff]  }
 0x1b9   :  { %4082 = vmatprep.subr.bf16.mxu1 %v13324_v6  ;;  %4112 = vmatprep.mubr.bf16.mxu1 %v15082_v9  ;;  %v13342_v9 = vld [vmem:[#allocation5 + $0xb0c] ss:$40 sps:$4 sm:$0xff]  }
 0x1ba   :  { %v3731_v19 = vpop.f32.mrf.mxu0 }
 0x1bb   :  { %v15116_v20 = vadd.f32 %v3731_v19, %v3688_v18  ;;  %4056 = vmatpush2.bf16.msra.mxu0 %v13319_v11  ;;  %v13376_v11 = vld [vmem:[#allocation5 + $0x10a8] ss:$40 sps:$4 sm:$0xff]  }
 0x1bc   :  { %4083 = vmatpush1.bf16.msra.mxu1 %v13322_v13  ;;  %4057 = vmatprep.subr.bf16.mxu0 %v13327_v16  ;;  %v15120_v58 = vpop.f32.mrf.mxu0  ;;  %v13381_v16 = vld [vmem:[#allocation5 + $0xddc] ss:$40 sps:$4 sm:$0xff]  }
 0x1bd   :  { %4084 = vmatprep.subr.bf16.mxu1 %v13330_v17  ;;  %v13384_v17 = vld [vmem:[#allocation5 + $0x105c] ss:$40 sps:$4 sm:$0xff]  }
 0x1bf   :  { %4058 = vmatpush2.bf16.msra.mxu0 %v13325_v1  ;;  %v13379_v1 = vld [vmem:[#allocation5 + $0xdd8] ss:$40 sps:$4 sm:$0xff]  }
 0x1c0   :  { %4085 = vmatpush1.bf16.msra.mxu1 %v13328_v21  ;;  %4059 = vmatprep.subr.bf16.mxu0 %v13333_v22  ;;  %v13382_v21 = vld [vmem:[#allocation5 + $0x1058] ss:$40 sps:$4 sm:$0xff]   ;;  %v13387_v22 = vld [vmem:[#allocation5 + $0xd8c] ss:$40 sps:$4 sm:$0xff]  }
 0x1c1   :  { %4086 = vmatprep.subr.bf16.mxu1 %v13336_v23  ;;  %v13390_v23 = vld [vmem:[#allocation5 + $0x100c] ss:$40 sps:$4 sm:$0xff]  }
 0x1c3   :  { %4060 = vmatpush2.bf16.msra.mxu0 %v13331_v24 }
 0x1c4   :  { %4087 = vmatpush1.bf16.msra.mxu1 %v13334_v25  ;;  %4061 = vmatprep.subr.bf16.mxu0 %v13339_v26 }
 0x1c5   :  { %4088 = vmatprep.subr.bf16.mxu1 %v13342_v9  ;;  %v13388_v9 = vld [vmem:[#allocation5 + $0x1008] ss:$40 sps:$4 sm:$0xff]  }
 0x1c7   :  { %4062 = vmatpush2.bf16.msra.mxu0 %v13337_v27  ;;  %v13393_v27 = vld [vmem:[#allocation5 + $0xd3c] ss:$40 sps:$4 sm:$0xff]  }
 0x1c8   :  { %4089 = vmatpush1.bf16.msra.mxu1 %v13340_v29  ;;  %4063 = vmatprep.subr.bf16.mxu0 %v13345_v31  ;;  %v13396_v29 = vld [vmem:[#allocation5 + $0xfbc] ss:$40 sps:$4 sm:$0xff]   ;;  %v13391_v31 = vld [vmem:[#allocation5 + $0xd38] ss:$40 sps:$4 sm:$0xff]  }
 0x1c9   :  { %4090 = vmatprep.subr.bf16.mxu1 %v13348_v32  ;;  %v13394_v32 = vld [vmem:[#allocation5 + $0xfb8] ss:$40 sps:$4 sm:$0xff]  }
 0x1cb   :  { %4064 = vmatpush2.bf16.msra.mxu0 %v13343_v33  ;;  %v13399_v33 = vld [vmem:[#allocation5 + $0xcec] ss:$40 sps:$4 sm:$0xff]  }
 0x1cc   :  { %4091 = vmatpush1.bf16.msra.mxu1 %v13346_v34  ;;  %4065 = vmatprep.subr.bf16.mxu0 %v13351_v38  ;;  %v13402_v34 = vld [vmem:[#allocation5 + $0xf6c] ss:$40 sps:$4 sm:$0xff]   ;;  %v13397_v38 = vld [vmem:[#allocation5 + $0xce8] ss:$40 sps:$4 sm:$0xff]  }
 0x1cd   :  { %4092 = vmatprep.subr.bf16.mxu1 %v13354_v42  ;;  %v13400_v42 = vld [vmem:[#allocation5 + $0xf68] ss:$40 sps:$4 sm:$0xff]  }
 0x1cf   :  { %4066 = vmatpush2.bf16.msra.mxu0 %v13349_v43  ;;  %v13405_v43 = vld [vmem:[#allocation5 + $0xc9c] ss:$40 sps:$4 sm:$0xff]  }
 0x1d0   :  { %4093 = vmatpush1.bf16.msra.mxu1 %v13352_v44  ;;  %4067 = vmatprep.subr.bf16.mxu0 %v13357_v45  ;;  %v13408_v44 = vld [vmem:[#allocation5 + $0xf1c] ss:$40 sps:$4 sm:$0xff]   ;;  %v13403_v45 = vld [vmem:[#allocation5 + $0xc98] ss:$40 sps:$4 sm:$0xff]  }
 0x1d1   :  { %4094 = vmatprep.subr.bf16.mxu1 %v13360_v46  ;;  %v13406_v46 = vld [vmem:[#allocation5 + $0xf18] ss:$40 sps:$4 sm:$0xff]  }
 0x1d3   :  { %4068 = vmatpush2.bf16.msra.mxu0 %v13355_v47  ;;  %v13411_v47 = vld [vmem:[#allocation5 + $0x254] ss:$40 sps:$4 sm:$0xff]  }
 0x1d4   :  { %4095 = vmatpush1.bf16.msra.mxu1 %v13358_v49  ;;  %4123 = vmatprep.subr.bf16.mxu0 %v13366_v54  ;;  %v13414_v49 = vld [vmem:[#allocation5 + $0x754] ss:$40 sps:$4 sm:$0xff]   ;;  %v13412_v54 = vld [vmem:[#allocation5 + $0x750] ss:$40 sps:$4 sm:$0xff]  }
 0x1d5   :  { %4096 = vmatprep.subr.bf16.mxu1 %v13363_v51  ;;  %v13409_v51 = vld [vmem:[#allocation5 + $0x250] ss:$40 sps:$4 sm:$0xff]  }
 0x1d6   :  { %v3813_v61 = vpop.f32.mrf.mxu0  ;;  %4070 = vmatmul.mubr.bf16.vlgmr.msra.gmra.mxu0 %v15122_v62 }
 0x1d7   :  { %v3770_v12 = vpop.f32.mrf.mxu1  ;;  %4124 = vmatpush1.bf16.msra.mxu0 %v13364_v56  ;;  %4155 = vmatprep.mubr.bf16.mxu0 %v14989_v14  ;;  %v13420_v56 = vld [vmem:[#allocation5 + $0x704] ss:$40 sps:$4 sm:$0xff]  }
 0x1d8   :  { %v3771_v48 = vadd.f32 %v3770_v12, %v15111_v10  ;;  %4097 = vmatpush2.bf16.msra.mxu1 %v13361_v55  ;;  %v15128_v3 = vpop.f32.mrf.mxu0  ;;  %4125 = vmatprep.subr.bf16.mxu0 %v13372_v59  ;;  %v13417_v55 = vld [vmem:[#allocation5 + $0x204] ss:$40 sps:$4 sm:$0xff]   ;;  %v13415_v59 = vld [vmem:[#allocation5 + $0x200] ss:$40 sps:$4 sm:$0xff]   ;;  %v13426_v12 = vld [vmem:[#allocation5 + $0x6b4] ss:$40 sps:$4 sm:$0xff]  }
 0x1d9   :  { %v15126_v36 = vpop.f32.mrf.mxu1  ;;  %4098 = vmatprep.subr.bf16.mxu1 %v13369_v28  ;;  %v15135_v28 = vld [vmem:[#allocation2 + $0x18] ss:$28 sps:$4 sm:$0xff]  }
 0x1da   :  { %v3814_v6 = vadd.f32 %v3813_v61, %v3771_v48  ;;  %v3817_v10 = vpop.f32.mrf.mxu0  ;;  %v14867_v61 = vld [vmem:[#allocation2 + $0x4] ss:$28 sps:$4 sm:$0xff]  }
 0x1db   :  { %v3774_v13 = vpop.f32.mrf.mxu1  ;;  %4126 = vmatpush1.bf16.msra.mxu0 %v13370_v4  ;;  %v13423_v4 = vld [vmem:[#allocation5 + $0x1b4] ss:$40 sps:$4 sm:$0xff]   ;;  %v13432_v48 = vld [vmem:[#allocation5 + $0x664] ss:$40 sps:$4 sm:$0xff]  }
 0x1dc   :  { %v3775_v18 = vadd.f32 %v3774_v13, %v15116_v20  ;;  %4099 = vmatpush2.bf16.msra.mxu1 %v13367_v60  ;;  %4127 = vmatprep.subr.bf16.mxu0 %v13378_v35  ;;  %v4340_v24 = vmax.f32 %v3814_v6, 0.0  ;;  %v13385_v20 = vld [vmem:[#allocation5 + $0xd88] ss:$40 sps:$4 sm:$0xff]   ;;  %v13429_v35 = vld [vmem:[#allocation5 + $0x164] ss:$40 sps:$4 sm:$0xff]  }
 0x1dd   :  { %4100 = vmatprep.subr.bf16.mxu1 %v13375_v63  ;;  %v13418_v60 = vld [vmem:[#allocation5 + $0x700] ss:$40 sps:$4 sm:$0xff]   ;;  %v13421_v63 = vld [vmem:[#allocation5 + $0x1b0] ss:$40 sps:$4 sm:$0xff]   ;;  %v13438_v13 = vld [vmem:[#allocation5 + $0x614] ss:$40 sps:$4 sm:$0xff]  }
 0x1de   :  { %v3818_v19 = vadd.f32 %v3817_v10, %v3775_v18  ;;  %v13427_v6 = vld [vmem:[#allocation5 + $0x160] ss:$40 sps:$4 sm:$0xff]   ;;  %v13444_v18 = vld [vmem:[#allocation5 + $0x5c4] ss:$40 sps:$4 sm:$0xff]  }
 0x1df   :  { %4128 = vmatpush1.bf16.msra.mxu0 %v13376_v11  ;;  %v13435_v11 = vld [vmem:[#allocation5 + $0x114] ss:$40 sps:$4 sm:$0xff]   ;;  %v13439_v10 = vld [vmem:[#allocation5 + $0xc0] ss:$40 sps:$4 sm:$0xff]  }
 0x1e0   :  { %v4350_v25 = vmax.f32 %v3818_v19, 0.0  ;;  %4101 = vmatpush2.bf16.msra.mxu1 %v13373_v8  ;;  %4129 = vmatprep.subr.bf16.mxu0 %v13384_v17  ;;  %v13430_v8 = vld [vmem:[#allocation5 + $0x660] ss:$40 sps:$4 sm:$0xff]   ;;  %v13441_v17 = vld [vmem:[#allocation5 + $0xc4] ss:$40 sps:$4 sm:$0xff]  }
 0x1e1   :  { %4102 = vmatprep.subr.bf16.mxu1 %v13381_v16  ;;  %v13433_v16 = vld [vmem:[#allocation5 + $0x110] ss:$40 sps:$4 sm:$0xff]   ;;  %v13442_v19 = vld [vmem:[#allocation5 + $0x5c0] ss:$40 sps:$4 sm:$0xff]  }
 0x1e2   :  { %v15132_v26 = vpack.c.bf16 %v4350_v25, %v4340_v24  ;;  %v13453_v24 = vld [vmem:[#allocation5 + $0x24] ss:$40 sps:$4 sm:$0xff]  }
 0x1e3   :  { %4130 = vmatpush1.bf16.msra.mxu0 %v13382_v21  ;;  %v13450_v21 = vld [vmem:[#allocation5 + $0x574] ss:$40 sps:$4 sm:$0xff]   ;;  %v13456_v25 = vld [vmem:[#allocation5 + $0x524] ss:$40 sps:$4 sm:$0xff]  }
 0x1e4   :  { %4103 = vmatpush2.bf16.msra.mxu1 %v13379_v1  ;;  %4131 = vmatprep.subr.bf16.mxu0 %v13390_v23  ;;  %v13447_v1 = vld [vmem:[#allocation5 + $0x74] ss:$40 sps:$4 sm:$0xff]   ;;  %v13448_v23 = vld [vmem:[#allocation5 + $0x570] ss:$40 sps:$4 sm:$0xff]  }
 0x1e5   :  { %4104 = vmatprep.subr.bf16.mxu1 %v13387_v22  ;;  %v13445_v22 = vld [vmem:[#allocation5 + $0x70] ss:$40 sps:$4 sm:$0xff]  }
 0x1e7   :  { %4132 = vmatpush1.bf16.msra.mxu0 %v13388_v9  ;;  %v13454_v9 = vld [vmem:[#allocation5 + $0x520] ss:$40 sps:$4 sm:$0xff]  }
 0x1e8   :  { %4105 = vmatpush2.bf16.msra.mxu1 %v13385_v20  ;;  %4133 = vmatprep.subr.bf16.mxu0 %v13396_v29  ;;  %v13451_v20 = vld [vmem:[#allocation5 + $0x20] ss:$40 sps:$4 sm:$0xff]   ;;  %v13462_v29 = vld [vmem:[#allocation5 + $0x9d4] ss:$40 sps:$4 sm:$0xff]  }
 0x1e9   :  { %4106 = vmatprep.subr.bf16.mxu1 %v13393_v27  ;;  %v13459_v27 = vld [vmem:[#allocation5 + $0x4d4] ss:$40 sps:$4 sm:$0xff]  }
 0x1eb   :  { %4134 = vmatpush1.bf16.msra.mxu0 %v13394_v32  ;;  %v13460_v32 = vld [vmem:[#allocation5 + $0x9d0] ss:$40 sps:$4 sm:$0xff]  }
 0x1ec   :  { %4107 = vmatpush2.bf16.msra.mxu1 %v13391_v31  ;;  %4135 = vmatprep.subr.bf16.mxu0 %v13402_v34  ;;  %v13457_v31 = vld [vmem:[#allocation5 + $0x4d0] ss:$40 sps:$4 sm:$0xff]   ;;  %v13468_v34 = vld [vmem:[#allocation5 + $0x984] ss:$40 sps:$4 sm:$0xff]  }
 0x1ed   :  { %4108 = vmatprep.subr.bf16.mxu1 %v13399_v33  ;;  %v13465_v33 = vld [vmem:[#allocation5 + $0x484] ss:$40 sps:$4 sm:$0xff]  }
 0x1ef   :  { %4136 = vmatpush1.bf16.msra.mxu0 %v13400_v42  ;;  %v15141_v42 = vpop.f32.mrf.mxu0 }
 0x1f0   :  { %4109 = vmatpush2.bf16.msra.mxu1 %v13397_v38  ;;  %4137 = vmatprep.subr.bf16.mxu0 %v13408_v44  ;;  %v15139_v38 = vpop.f32.mrf.mxu1  ;;  %v13466_v44 = vld [vmem:[#allocation5 + $0x980] ss:$40 sps:$4 sm:$0xff]  }
 0x1f1   :  { %4110 = vmatprep.subr.bf16.mxu1 %v13405_v43  ;;  %v13463_v43 = vld [vmem:[#allocation5 + $0x480] ss:$40 sps:$4 sm:$0xff]  }
 0x1f3   :  { %4138 = vmatpush1.bf16.msra.mxu0 %v13406_v46 }
 0x1f4   :  { %4111 = vmatpush2.bf16.msra.mxu1 %v13403_v45  ;;  %4166 = vmatprep.subr.bf16.mxu0 %v13411_v47  ;;  %v13471_v47 = vld [vmem:[#allocation5 + $0x434] ss:$40 sps:$4 sm:$0xff]  }
 0x1f5   :  { %4209 = vmatprep.subr.bf16.mxu1 %v13414_v49  ;;  %v13474_v49 = vld [vmem:[#allocation5 + $0x934] ss:$40 sps:$4 sm:$0xff]  }
 0x1f6   :  { %4156 = vmatmul.mubr.bf16.vlgmr.msra.gmra.mxu0 %v15135_v28 }
 0x1f7   :  { %4113 = vmatmul.mubr.bf16.vlgmr.msra.gmra.mxu1 %v15098_v30  ;;  %4167 = vmatpush1.bf16.msra.mxu0 %v13409_v51  ;;  %v13424_v30 = vld [vmem:[#allocation5 + $0x6b0] ss:$40 sps:$4 sm:$0xff]  }
 0x1f8   :  { %4210 = vmatpush1.bf16.msra.mxu1 %v13412_v54  ;;  %4168 = vmatprep.subr.bf16.mxu0 %v13417_v55 }
 0x1f9   :  { %4211 = vmatprep.subr.bf16.mxu1 %v13420_v56  ;;  %4198 = vmatprep.mubr.bf16.mxu0 %v14867_v61  ;;  %v13469_v56 = vld [vmem:[#allocation5 + $0x430] ss:$40 sps:$4 sm:$0xff]   ;;  %v13480_v61 = vld [vmem:[#allocation5 + $0x8e4] ss:$40 sps:$4 sm:$0xff]  }
 0x1fa   :  { %4241 = vmatprep.mubr.bf16.mxu1 %v15101_v37  ;;  %v13436_v37 = vld [vmem:[#allocation5 + $0x610] ss:$40 sps:$4 sm:$0xff]  }
 0x1fb   :  { %4169 = vmatpush1.bf16.msra.mxu0 %v13415_v59  ;;  %v13472_v59 = vld [vmem:[#allocation5 + $0x930] ss:$40 sps:$4 sm:$0xff]  }
 0x1fc   :  { %4212 = vmatpush1.bf16.msra.mxu1 %v13418_v60  ;;  %4170 = vmatprep.subr.bf16.mxu0 %v13423_v4 }
 0x1fd   :  { %4213 = vmatprep.subr.bf16.mxu1 %v13426_v12  ;;  %v13477_v12 = vld [vmem:[#allocation5 + $0x3e4] ss:$40 sps:$4 sm:$0xff]  }
 0x1ff   :  { %4171 = vmatpush1.bf16.msra.mxu0 %v13421_v63 }
 0x200   :  { %4214 = vmatpush1.bf16.msra.mxu1 %v13424_v30  ;;  %4172 = vmatprep.subr.bf16.mxu0 %v13429_v35  ;;  %v13475_v30 = vld [vmem:[#allocation5 + $0x3e0] ss:$40 sps:$4 sm:$0xff]  }
 0x201   :  { %4215 = vmatprep.subr.bf16.mxu1 %v13432_v48  ;;  %v13478_v35 = vld [vmem:[#allocation5 + $0x8e0] ss:$40 sps:$4 sm:$0xff]   ;;  %v13483_v48 = vld [vmem:[#allocation5 + $0x394] ss:$40 sps:$4 sm:$0xff]  }
 0x203   :  { %4173 = vmatpush1.bf16.msra.mxu0 %v13427_v6  ;;  %v13486_v6 = vld [vmem:[#allocation5 + $0x894] ss:$40 sps:$4 sm:$0xff]  }
 0x204   :  { %4216 = vmatpush1.bf16.msra.mxu1 %v13430_v8  ;;  %4174 = vmatprep.subr.bf16.mxu0 %v13435_v11  ;;  %v13481_v8 = vld [vmem:[#allocation5 + $0x390] ss:$40 sps:$4 sm:$0xff]  }
 0x205   :  { %4217 = vmatprep.subr.bf16.mxu1 %v13438_v13  ;;  %v13484_v11 = vld [vmem:[#allocation5 + $0x890] ss:$40 sps:$4 sm:$0xff]   ;;  %v13489_v13 = vld [vmem:[#allocation5 + $0x344] ss:$40 sps:$4 sm:$0xff]  }
 0x207   :  { %4175 = vmatpush1.bf16.msra.mxu0 %v13433_v16  ;;  %v13492_v16 = vld [vmem:[#allocation5 + $0x844] ss:$40 sps:$4 sm:$0xff]  }
 0x208   :  { %4218 = vmatpush1.bf16.msra.mxu1 %v13436_v37  ;;  %4176 = vmatprep.subr.bf16.mxu0 %v13441_v17  ;;  %v13487_v37 = vld [vmem:[#allocation5 + $0x340] ss:$40 sps:$4 sm:$0xff]  }
 0x209   :  { %4219 = vmatprep.subr.bf16.mxu1 %v13444_v18  ;;  %v13490_v17 = vld [vmem:[#allocation5 + $0x840] ss:$40 sps:$4 sm:$0xff]   ;;  %v13495_v18 = vld [vmem:[#allocation5 + $0x2f4] ss:$40 sps:$4 sm:$0xff]  }
 0x20b   :  { %4177 = vmatpush1.bf16.msra.mxu0 %v13439_v10  ;;  %v13498_v10 = vld [vmem:[#allocation5 + $0x7f4] ss:$40 sps:$4 sm:$0xff]  }
 0x20c   :  { %4220 = vmatpush1.bf16.msra.mxu1 %v13442_v19  ;;  %4178 = vmatprep.subr.bf16.mxu0 %v13447_v1  ;;  %v13493_v19 = vld [vmem:[#allocation5 + $0x2f0] ss:$40 sps:$4 sm:$0xff]  }
 0x20d   :  { %4221 = vmatprep.subr.bf16.mxu1 %v13450_v21  ;;  %v13496_v1 = vld [vmem:[#allocation5 + $0x7f0] ss:$40 sps:$4 sm:$0xff]   ;;  %v13501_v21 = vld [vmem:[#allocation5 + $0x2a4] ss:$40 sps:$4 sm:$0xff]  }
 0x20f   :  { %4179 = vmatpush1.bf16.msra.mxu0 %v13445_v22  ;;  %v13504_v22 = vld [vmem:[#allocation5 + $0x7a4] ss:$40 sps:$4 sm:$0xff]  }
 0x210   :  { %4222 = vmatpush1.bf16.msra.mxu1 %v13448_v23  ;;  %4180 = vmatprep.subr.bf16.mxu0 %v13453_v24  ;;  %v13499_v23 = vld [vmem:[#allocation5 + $0x2a0] ss:$40 sps:$4 sm:$0xff]  }
 0x211   :  { %4223 = vmatprep.subr.bf16.mxu1 %v13456_v25  ;;  %v13502_v24 = vld [vmem:[#allocation5 + $0x7a0] ss:$40 sps:$4 sm:$0xff]   ;;  %v13507_v25 = vld [vmem:[#allocation5 + $0xc54] ss:$40 sps:$4 sm:$0xff]  }
 0x213   :  { %4181 = vmatpush1.bf16.msra.mxu0 %v13451_v20  ;;  %v13510_v20 = vld [vmem:[#allocation5 + $0x1154] ss:$40 sps:$4 sm:$0xff]  }
 0x214   :  { %4224 = vmatpush1.bf16.msra.mxu1 %v13454_v9  ;;  %4182 = vmatprep.subr.bf16.mxu0 %v13459_v27  ;;  %v13505_v9 = vld [vmem:[#allocation5 + $0xc50] ss:$40 sps:$4 sm:$0xff]  }
 0x215   :  { %4225 = vmatprep.subr.bf16.mxu1 %v13462_v29  ;;  %v13508_v27 = vld [vmem:[#allocation5 + $0x1150] ss:$40 sps:$4 sm:$0xff]   ;;  %v13513_v29 = vld [vmem:[#allocation5 + $0xc04] ss:$40 sps:$4 sm:$0xff]  }
 0x216   :  { %v3856_v45 = vpop.f32.mrf.mxu0 }
 0x217   :  { %v3899_v46 = vpop.f32.mrf.mxu1  ;;  %4183 = vmatpush2.bf16.msra.mxu0 %v13457_v31  ;;  %v13516_v31 = vld [vmem:[#allocation5 + $0x1104] ss:$40 sps:$4 sm:$0xff]  }
 0x218   :  { %v15143_v51 = vadd.f32 %v3899_v46, %v3856_v45  ;;  %4226 = vmatpush2.bf16.msra.mxu1 %v13460_v32  ;;  %v15145_v54 = vpop.f32.mrf.mxu0  ;;  %4184 = vmatprep.subr.bf16.mxu0 %v13465_v33  ;;  %v13511_v32 = vld [vmem:[#allocation5 + $0xc00] ss:$40 sps:$4 sm:$0xff]   ;;  %v13517_v45 = vld [vmem:[#allocation5 + $0xbb0] ss:$40 sps:$4 sm:$0xff]  }
 0x219   :  { %v15147_v55 = vpop.f32.mrf.mxu1  ;;  %4227 = vmatprep.subr.bf16.mxu1 %v13468_v34  ;;  %v13514_v33 = vld [vmem:[#allocation5 + $0x1100] ss:$40 sps:$4 sm:$0xff]   ;;  %v13520_v46 = vld [vmem:[#allocation5 + $0x10b0] ss:$40 sps:$4 sm:$0xff]  }
 0x21a   :  { %v3860_v60 = vpop.f32.mrf.mxu0  ;;  %v14868_v34 = vld [vmem:[#allocation2] ss:$28 sps:$4 sm:$0xff]  }
 0x21b   :  { %v3903_v4 = vpop.f32.mrf.mxu1  ;;  %4185 = vmatpush2.bf16.msra.mxu0 %v13463_v43  ;;  %v13519_v43 = vld [vmem:[#allocation5 + $0xbb4] ss:$40 sps:$4 sm:$0xff]  }
 0x21c   :  { %v15149_v63 = vadd.f32 %v3903_v4, %v3860_v60  ;;  %4228 = vmatpush2.bf16.msra.mxu1 %v13466_v44  ;;  %4186 = vmatprep.subr.bf16.mxu0 %v13471_v47  ;;  %v13522_v44 = vld [vmem:[#allocation5 + $0x10b4] ss:$40 sps:$4 sm:$0xff]  }
 0x21d   :  { %4229 = vmatprep.subr.bf16.mxu1 %v13474_v49  ;;  %v14869_v47 = vld [vmem:[#allocation2 + $0x14] ss:$28 sps:$4 sm:$0xff]   ;;  %v13525_v49 = vld [vmem:[#allocation5 + $0xb64] ss:$40 sps:$4 sm:$0xff]  }
 0x21e   :  { %v13531_v60 = vld [vmem:[#allocation5 + $0xb14] ss:$40 sps:$4 sm:$0xff]  }
 0x21f   :  { %4187 = vmatpush2.bf16.msra.mxu0 %v13469_v56  ;;  %v13528_v56 = vld [vmem:[#allocation5 + $0x1064] ss:$40 sps:$4 sm:$0xff]   ;;  %v13534_v4 = vld [vmem:[#allocation5 + $0x1014] ss:$40 sps:$4 sm:$0xff]  }
 0x220   :  { %4230 = vmatpush2.bf16.msra.mxu1 %v13472_v59  ;;  %4188 = vmatprep.subr.bf16.mxu0 %v13477_v12  ;;  %v13523_v59 = vld [vmem:[#allocation5 + $0xb60] ss:$40 sps:$4 sm:$0xff]   ;;  %v13529_v12 = vld [vmem:[#allocation5 + $0xb10] ss:$40 sps:$4 sm:$0xff]  }
 0x221   :  { %4231 = vmatprep.subr.bf16.mxu1 %v13480_v61  ;;  %v13532_v61 = vld [vmem:[#allocation5 + $0x1010] ss:$40 sps:$4 sm:$0xff]  }
 0x223   :  { %4189 = vmatpush2.bf16.msra.mxu0 %v13475_v30  ;;  %v13537_v30 = vld [vmem:[#allocation5 + $0xac4] ss:$40 sps:$4 sm:$0xff]  }
 0x224   :  { %4232 = vmatpush2.bf16.msra.mxu1 %v13478_v35  ;;  %4190 = vmatprep.subr.bf16.mxu0 %v13483_v48  ;;  %v13535_v35 = vld [vmem:[#allocation5 + $0xac0] ss:$40 sps:$4 sm:$0xff]  }
 0x225   :  { %4233 = vmatprep.subr.bf16.mxu1 %v13486_v6  ;;  %v13538_v48 = vld [vmem:[#allocation5 + $0xfc0] ss:$40 sps:$4 sm:$0xff]   ;;  %v3562_v6 = vadd.f32 %v15085_v39, %v15087_v40 }
 0x226   :  { %v13547_v40 = vld [vmem:[#allocation5 + $0xa20] ss:$40 sps:$4 sm:$0xff]  }
 0x227   :  { %4191 = vmatpush2.bf16.msra.mxu0 %v13481_v8  ;;  %v13543_v8 = vld [vmem:[#allocation5 + $0xa74] ss:$40 sps:$4 sm:$0xff]  }
 0x228   :  { %4234 = vmatpush2.bf16.msra.mxu1 %v13484_v11  ;;  %4192 = vmatprep.subr.bf16.mxu0 %v13489_v13  ;;  %v13546_v11 = vld [vmem:[#allocation5 + $0xf74] ss:$40 sps:$4 sm:$0xff]   ;;  %v3558_v13 = vadd.f32 %v15074_v50, %v15072_v5 }
 0x229   :  { %4235 = vmatprep.subr.bf16.mxu1 %v13492_v16  ;;  %v3605_v16 = vadd.f32 %v15106_v2, %v3562_v6  ;;  %v13555_v50 = vld [vmem:[#allocation5 + $0xed4] ss:$40 sps:$4 sm:$0xff]   ;;  %v13585_v6 = vld [vmem:[#allocation5 + $0xd44] ss:$40 sps:$4 sm:$0xff]  }
 0x22a   :  { %v13558_v2 = vld [vmem:[#allocation7 + $0x234] ss:$40 sps:$4 sm:$0xff]  }
 0x22b   :  { %4193 = vmatpush2.bf16.msra.mxu0 %v13487_v37  ;;  %v13541_v37 = vld [vmem:[#allocation5 + $0xa70] ss:$40 sps:$4 sm:$0xff]   ;;  %v3648_v39 = vadd.f32 %v15104_v41, %v3605_v16  ;;  %v13591_v16 = vld [vmem:[#allocation5 + $0xcf4] ss:$40 sps:$4 sm:$0xff]  }
 0x22c   :  { %4236 = vmatpush2.bf16.msra.mxu1 %v13490_v17  ;;  %4194 = vmatprep.subr.bf16.mxu0 %v13495_v18  ;;  %v13544_v17 = vld [vmem:[#allocation5 + $0xf70] ss:$40 sps:$4 sm:$0xff]   ;;  %v3601_v18 = vadd.f32 %v15092_v53, %v3558_v13  ;;  %v15161_v53 = vpop.f32.mrf.mxu1  ;;  %v13586_v13 = vld [vmem:[#allocation7 + $0xa0] ss:$40 sps:$4 sm:$0xff]  }
 0x22d   :  { %4237 = vmatprep.subr.bf16.mxu1 %v13498_v10  ;;  %v13549_v10 = vld [vmem:[#allocation5 + $0xa24] ss:$40 sps:$4 sm:$0xff]  }
 0x22e   :  { %v3644_v5 = vadd.f32 %v15090_v52, %v3601_v18  ;;  %v13559_v52 = vld [vmem:[#allocation5 + $0xe80] ss:$40 sps:$4 sm:$0xff]   ;;  %v13589_v18 = vld [vmem:[#allocation5 + $0xcf0] ss:$40 sps:$4 sm:$0xff]  }
 0x22f   :  { %4195 = vmatpush2.bf16.msra.mxu0 %v13493_v19  ;;  %v13552_v19 = vld [vmem:[#allocation5 + $0xf24] ss:$40 sps:$4 sm:$0xff]  }
 0x230   :  { %4238 = vmatpush2.bf16.msra.mxu1 %v13496_v1  ;;  %4196 = vmatprep.subr.bf16.mxu0 %v13501_v21  ;;  %v13550_v1 = vld [vmem:[#allocation5 + $0xf20] ss:$40 sps:$4 sm:$0xff]   ;;  %v13553_v21 = vld [vmem:[#allocation5 + $0xed0] ss:$40 sps:$4 sm:$0xff]   ;;  %v4339_v41 = vmax.f32 %v3644_v5, 0.0 }
 0x231   :  { %4239 = vmatprep.subr.bf16.mxu1 %v13504_v22  ;;  %v13556_v22 = vld [vmem:[#allocation7 + $0x230] ss:$40 sps:$4 sm:$0xff]  }
 0x233   :  { %4197 = vmatpush2.bf16.msra.mxu0 %v13499_v23  ;;  %v4349_v23 = vmax.f32 %v3648_v39, 0.0 }
 0x234   :  { %4240 = vmatpush2.bf16.msra.mxu1 %v13502_v24  ;;  %4252 = vmatprep.subr.bf16.mxu0 %v13507_v25  ;;  %v13561_v24 = vld [vmem:[#allocation5 + $0xe84] ss:$40 sps:$4 sm:$0xff]  }
 0x235   :  { %4295 = vmatprep.subr.bf16.mxu1 %v13510_v20  ;;  %v13564_v25 = vld [vmem:[#allocation7 + $0x1e4] ss:$40 sps:$4 sm:$0xff]   ;;  %v15163_v20 = vpop.f32.mrf.mxu0 }
 0x236   :  { %4199 = vmatmul.mubr.bf16.vlgmr.msra.gmra.mxu0 %v14868_v34  ;;  %v13570_v34 = vld [vmem:[#allocation7 + $0x194] ss:$40 sps:$4 sm:$0xff]  }
 0x237   :  { %4242 = vmatmul.mubr.bf16.vlgmr.msra.gmra.mxu1 %v15122_v62  ;;  %4253 = vmatpush1.bf16.msra.mxu0 %v13505_v9  ;;  %v13526_v62 = vld [vmem:[#allocation5 + $0x1060] ss:$40 sps:$4 sm:$0xff]   ;;  %v3985_v9 = vpop.f32.mrf.mxu1 }
 0x238   :  { %4296 = vmatpush1.bf16.msra.mxu1 %v13508_v27  ;;  %4254 = vmatprep.subr.bf16.mxu0 %v13513_v29  ;;  %v15165_v27 = vpack.c.bf16 %v4349_v23, %v4339_v41  ;;  %v13609_v23 = vld [vmem:[#allocation7 + $0x464] ss:$40 sps:$4 sm:$0xff]  }
 0x239   :  { %4297 = vmatprep.subr.bf16.mxu1 %v13516_v31  ;;  %4327 = vmatprep.mubr.bf16.mxu1 %v14989_v14  ;;  %v13540_v14 = vld [vmem:[#allocation5 + $0xfc4] ss:$40 sps:$4 sm:$0xff]   ;;  %v13562_v31 = vld [vmem:[#allocation7 + $0x1e0] ss:$40 sps:$4 sm:$0xff]  }
 0x23a   :  { %4284 = vmatprep.mubr.bf16.mxu0 %v14869_v47  ;;  %v13568_v47 = vld [vmem:[#allocation7 + $0x190] ss:$40 sps:$4 sm:$0xff]  }
 0x23b   :  { %4255 = vmatpush1.bf16.msra.mxu0 %v13511_v32 }
 0x23c   :  { %4298 = vmatpush1.bf16.msra.mxu1 %v13514_v33  ;;  %4256 = vmatprep.subr.bf16.mxu0 %v13519_v43  ;;  %v13567_v33 = vld [vmem:[#allocation5 + $0xe34] ss:$40 sps:$4 sm:$0xff]   ;;  %v15169_v43 = vpop.f32.mrf.mxu1 }
 0x23d   :  { %4299 = vmatprep.subr.bf16.mxu1 %v13522_v44 }
 0x23f   :  { %4257 = vmatpush1.bf16.msra.mxu0 %v13517_v45 }
 0x240   :  { %4300 = vmatpush1.bf16.msra.mxu1 %v13520_v46  ;;  %4258 = vmatprep.subr.bf16.mxu0 %v13525_v49  ;;  %v13565_v46 = vld [vmem:[#allocation5 + $0xe30] ss:$40 sps:$4 sm:$0xff]  }
 0x241   :  { %4301 = vmatprep.subr.bf16.mxu1 %v13528_v56  ;;  %v13576_v56 = vld [vmem:[#allocation7 + $0x144] ss:$40 sps:$4 sm:$0xff]  }
 0x243   :  { %4259 = vmatpush1.bf16.msra.mxu0 %v13523_v59  ;;  %v3989_v59 = vpop.f32.mrf.mxu1 }
 0x244   :  { %4302 = vmatpush1.bf16.msra.mxu1 %v13526_v62  ;;  %4260 = vmatprep.subr.bf16.mxu0 %v13531_v60  ;;  %v13571_v60 = vld [vmem:[#allocation5 + $0xde0] ss:$40 sps:$4 sm:$0xff]  }
 0x245   :  { %4303 = vmatprep.subr.bf16.mxu1 %v13534_v4  ;;  %v13574_v4 = vld [vmem:[#allocation7 + $0x140] ss:$40 sps:$4 sm:$0xff]  }
 0x247   :  { %4261 = vmatpush1.bf16.msra.mxu0 %v13529_v12  ;;  %v13579_v12 = vld [vmem:[#allocation5 + $0xd94] ss:$40 sps:$4 sm:$0xff]  }
 0x248   :  { %4304 = vmatpush1.bf16.msra.mxu1 %v13532_v61  ;;  %4262 = vmatprep.subr.bf16.mxu0 %v13537_v30 }
 0x249   :  { %4305 = vmatprep.subr.bf16.mxu1 %v13540_v14  ;;  %v13582_v14 = vld [vmem:[#allocation7 + $0xf4] ss:$40 sps:$4 sm:$0xff]  }
 0x24b   :  { %4263 = vmatpush1.bf16.msra.mxu0 %v13535_v35 }
 0x24c   :  { %4306 = vmatpush1.bf16.msra.mxu1 %v13538_v48  ;;  %4264 = vmatprep.subr.bf16.mxu0 %v13543_v8  ;;  %v13580_v48 = vld [vmem:[#allocation7 + $0xf0] ss:$40 sps:$4 sm:$0xff]   ;;  %v13588_v8 = vld [vmem:[#allocation7 + $0xa4] ss:$40 sps:$4 sm:$0xff]  }
 0x24d   :  { %4307 = vmatprep.subr.bf16.mxu1 %v13546_v11  ;;  %v13583_v11 = vld [vmem:[#allocation5 + $0xd40] ss:$40 sps:$4 sm:$0xff]  }
 0x24f   :  { %4265 = vmatpush1.bf16.msra.mxu0 %v13541_v37  ;;  %v13594_v37 = vld [vmem:[#allocation7 + $0x54] ss:$40 sps:$4 sm:$0xff]  }
 0x250   :  { %4308 = vmatpush1.bf16.msra.mxu1 %v13544_v17  ;;  %4266 = vmatprep.subr.bf16.mxu0 %v13549_v10  ;;  %v3734_v17 = vadd.f32 %v15120_v58, %v15118_v57  ;;  %v13592_v10 = vld [vmem:[#allocation7 + $0x50] ss:$40 sps:$4 sm:$0xff]   ;;  %v13603_v58 = vld [vmem:[#allocation7 + $0x4b4] ss:$40 sps:$4 sm:$0xff]  }
 0x251   :  { %4309 = vmatprep.subr.bf16.mxu1 %v13552_v19  ;;  %v3730_v19 = vadd.f32 %v15113_v15, %v15108_v7  ;;  %v13601_v15 = vld [vmem:[#allocation7 + $0x4b0] ss:$40 sps:$4 sm:$0xff]  }
 0x252   :  { %v3777_v39 = vadd.f32 %v15139_v38, %v3734_v17  ;;  %v13604_v38 = vld [vmem:[#allocation7 + $0x730] ss:$40 sps:$4 sm:$0xff]  }
 0x253   :  { %4267 = vmatpush1.bf16.msra.mxu0 %v13547_v40  ;;  %v13597_v40 = vld [vmem:[#allocation5 + $0xca4] ss:$40 sps:$4 sm:$0xff]   ;;  %v3773_v5 = vadd.f32 %v15126_v36, %v3730_v19 }
 0x254   :  { %4310 = vmatpush1.bf16.msra.mxu1 %v13550_v1  ;;  %4268 = vmatprep.subr.bf16.mxu0 %v13555_v50  ;;  %v13600_v1 = vld [vmem:[#allocation7 + $0x4] ss:$40 sps:$4 sm:$0xff]   ;;  %v13595_v50 = vld [vmem:[#allocation5 + $0xca0] ss:$40 sps:$4 sm:$0xff]   ;;  %v3820_v57 = vadd.f32 %v15141_v42, %v3777_v39 }
 0x255   :  { %9168 = vmatprep.subr.bf16.mxu1 %v13558_v2  ;;  %v13598_v2 = vld [vmem:[#allocation7] ss:$40 sps:$4 sm:$0xff]   ;;  %v3816_v7 = vadd.f32 %v15128_v3, %v3773_v5  ;;  %v13612_v42 = vld [vmem:[#allocation7 + $0x6e4] ss:$40 sps:$4 sm:$0xff]   ;;  %v13618_v3 = vld [vmem:[#allocation7 + $0x694] ss:$40 sps:$4 sm:$0xff]  }
 0x256   :  { %v3942_v29 = vpop.f32.mrf.mxu0  ;;  %v13660_v39 = vld [vmem:[#allocation7 + $0xbe4] ss:$40 sps:$4 sm:$0xff]   ;;  %v13663_v5 = vld [vmem:[#allocation7 + $0x914] ss:$40 sps:$4 sm:$0xff]  }
 0x257   :  { %4328 = vmatmul.mubr.bf16.vlgmr.msra.gmra.mxu1 %v15135_v28  ;;  %v3943_v32 = vadd.f32 %v3942_v29, %v15143_v51  ;;  %4269 = vmatpush2.bf16.msra.mxu0 %v13553_v21  ;;  %v13573_v51 = vld [vmem:[#allocation5 + $0xde4] ss:$40 sps:$4 sm:$0xff]   ;;  %v13606_v21 = vld [vmem:[#allocation7 + $0x734] ss:$40 sps:$4 sm:$0xff]   ;;  %v4341_v36 = vmax.f32 %v3816_v7, 0.0 }
 0x258   :  { %9169 = vmatpush1.bf16.msra.mxu1 %v13556_v22  ;;  %9200 = vmatprep.mubr.bf16.mxu1 %v15165_v27  ;;  %v15172_v44 = vpop.f32.mrf.mxu0  ;;  %v4351_v22 = vmax.f32 %v3820_v57, 0.0  ;;  %v13613_v29 = vld [vmem:[#allocation7 + $0x410] ss:$40 sps:$4 sm:$0xff]   ;;  %v13667_v7 = vld [vmem:[#allocation7 + $0x8c0] ss:$40 sps:$4 sm:$0xff]  }
 0x259   :  { %4270 = vmatprep.subr.bf16.mxu0 %v13561_v24  ;;  %v3986_v45 = vadd.f32 %v3985_v9, %v3943_v32  ;;  %9170 = vmatprep.subr.bf16.mxu1 %v13564_v25  ;;  %v13607_v24 = vld [vmem:[#allocation7 + $0x460] ss:$40 sps:$4 sm:$0xff]   ;;  %v14870_v9 = vld [vmem:[#allocation2 + $0x10] ss:$28 sps:$4 sm:$0xff]   ;;  %v13621_v32 = vld [vmem:[#allocation7 + $0x3c4] ss:$40 sps:$4 sm:$0xff]  }
 0x25a   :  { %v3946_v49 = vpop.f32.mrf.mxu0  ;;  %v13610_v25 = vld [vmem:[#allocation7 + $0x6e0] ss:$40 sps:$4 sm:$0xff]   ;;  %v15185_v41 = vpack.c.bf16 %v4351_v22, %v4341_v36  ;;  %v13664_v57 = vld [vmem:[#allocation7 + $0xb90] ss:$40 sps:$4 sm:$0xff]   ;;  %v13678_v22 = vld [vmem:[#allocation7 + $0xaf4] ss:$40 sps:$4 sm:$0xff]  }
 0x25b   :  { %v3947_v28 = vadd.f32 %v3946_v49, %v15149_v63  ;;  %4271 = vmatpush2.bf16.msra.mxu0 %v13559_v52  ;;  %v4342_v61 = vmax.f32 %v3986_v45, 0.0  ;;  %v13577_v63 = vld [vmem:[#allocation5 + $0xd90] ss:$40 sps:$4 sm:$0xff]   ;;  %v13615_v52 = vld [vmem:[#allocation7 + $0x414] ss:$40 sps:$4 sm:$0xff]  }
 0x25c   :  { %9171 = vmatpush1.bf16.msra.mxu1 %v13562_v31  ;;  %4272 = vmatprep.subr.bf16.mxu0 %v13567_v33  ;;  %v13616_v31 = vld [vmem:[#allocation7 + $0x690] ss:$40 sps:$4 sm:$0xff]   ;;  %v13624_v33 = vld [vmem:[#allocation7 + $0x644] ss:$40 sps:$4 sm:$0xff]   ;;  %v13622_v45 = vld [vmem:[#allocation7 + $0x640] ss:$40 sps:$4 sm:$0xff]  }
 0x25d   :  { %9172 = vmatprep.subr.bf16.mxu1 %v13570_v34  ;;  %v3990_v62 = vadd.f32 %v3989_v59, %v3947_v28  ;;  %v13619_v34 = vld [vmem:[#allocation7 + $0x3c0] ss:$40 sps:$4 sm:$0xff]   ;;  %v13625_v49 = vld [vmem:[#allocation7 + $0x370] ss:$40 sps:$4 sm:$0xff]   ;;  %v3948_v59 = vpop.f32.mrf.mxu0 }
 0x25e   :  { %v13628_v28 = vld [vmem:[#allocation7 + $0x5f0] ss:$40 sps:$4 sm:$0xff]  }
 0x25f   :  { %v4352_v30 = vmax.f32 %v3990_v62, 0.0  ;;  %4273 = vmatpush2.bf16.msra.mxu0 %v13565_v46  ;;  %v13627_v46 = vld [vmem:[#allocation7 + $0x374] ss:$40 sps:$4 sm:$0xff]   ;;  %v13631_v62 = vld [vmem:[#allocation7 + $0x320] ss:$40 sps:$4 sm:$0xff]  }
 0x260   :  { %9173 = vmatpush1.bf16.msra.mxu1 %v13568_v47  ;;  %4274 = vmatprep.subr.bf16.mxu0 %v13573_v51  ;;  %v13630_v47 = vld [vmem:[#allocation7 + $0x5f4] ss:$40 sps:$4 sm:$0xff]   ;;  %v13633_v51 = vld [vmem:[#allocation7 + $0x324] ss:$40 sps:$4 sm:$0xff]   ;;  %v13676_v36 = vld [vmem:[#allocation7 + $0xaf0] ss:$40 sps:$4 sm:$0xff]  }
 0x261   :  { %9174 = vmatprep.subr.bf16.mxu1 %v13576_v56  ;;  %v15175_v35 = vpack.c.bf16 %v4352_v30, %v4342_v61  ;;  %v13636_v56 = vld [vmem:[#allocation7 + $0x5a4] ss:$40 sps:$4 sm:$0xff]   ;;  %v13642_v61 = vld [vmem:[#allocation7 + $0x554] ss:$40 sps:$4 sm:$0xff]   ;;  %v3902_v30 = vadd.f32 %v15147_v55, %v15145_v54 }
 0x262   :  { %v13654_v55 = vld [vmem:[#allocation7 + $0xc34] ss:$40 sps:$4 sm:$0xff]  }
 0x263   :  { %4275 = vmatpush2.bf16.msra.mxu0 %v13571_v60  ;;  %v13634_v60 = vld [vmem:[#allocation7 + $0x5a0] ss:$40 sps:$4 sm:$0xff]  }
 0x264   :  { %9175 = vmatpush1.bf16.msra.mxu1 %v13574_v4  ;;  %4276 = vmatprep.subr.bf16.mxu0 %v13579_v12  ;;  %v13639_v4 = vld [vmem:[#allocation7 + $0x2d4] ss:$40 sps:$4 sm:$0xff]   ;;  %v3906_v12 = vadd.f32 %v15161_v53, %v15163_v20  ;;  %v13643_v53 = vld [vmem:[#allocation7 + $0x280] ss:$40 sps:$4 sm:$0xff]  }
 0x265   :  { %9176 = vmatprep.subr.bf16.mxu1 %v13582_v14  ;;  %v13646_v20 = vld [vmem:[#allocation7 + $0x500] ss:$40 sps:$4 sm:$0xff]  }
 0x266   :  { %v3949_v14 = vadd.f32 %v3948_v59, %v3906_v12  ;;  %v13705_v12 = vld [vmem:[#allocation7 + $0xe64] ss:$40 sps:$4 sm:$0xff]  }
 0x267   :  { %4277 = vmatpush2.bf16.msra.mxu0 %v13577_v63  ;;  %v13637_v63 = vld [vmem:[#allocation7 + $0x2d0] ss:$40 sps:$4 sm:$0xff]  }
 0x268   :  { %9177 = vmatpush1.bf16.msra.mxu1 %v13580_v48  ;;  %4278 = vmatprep.subr.bf16.mxu0 %v13585_v6  ;;  %v13640_v48 = vld [vmem:[#allocation7 + $0x550] ss:$40 sps:$4 sm:$0xff]   ;;  %v13645_v6 = vld [vmem:[#allocation7 + $0x284] ss:$40 sps:$4 sm:$0xff]  }
 0x269   :  { %9178 = vmatprep.subr.bf16.mxu1 %v13588_v8  ;;  %v3945_v8 = vadd.f32 %v15172_v44, %v3902_v30  ;;  %v13652_v44 = vld [vmem:[#allocation7 + $0xc30] ss:$40 sps:$4 sm:$0xff]  }
 0x26b   :  { %4279 = vmatpush2.bf16.msra.mxu0 %v13583_v11  ;;  %v13648_v11 = vld [vmem:[#allocation7 + $0x504] ss:$40 sps:$4 sm:$0xff]   ;;  %v3988_v54 = vadd.f32 %v15169_v43, %v3945_v8  ;;  %v13655_v43 = vld [vmem:[#allocation7 + $0x960] ss:$40 sps:$4 sm:$0xff]  }
 0x26c   :  { %9179 = vmatpush1.bf16.msra.mxu1 %v13586_v13  ;;  %4280 = vmatprep.subr.bf16.mxu0 %v13591_v16  ;;  %v3991_v13 = vpop.f32.mrf.mxu1 }
 0x26d   :  { %9180 = vmatprep.subr.bf16.mxu1 %v13594_v37  ;;  %v3992_v16 = vadd.f32 %v3991_v13, %v3949_v14  ;;  %v13651_v37 = vld [vmem:[#allocation7 + $0x9b4] ss:$40 sps:$4 sm:$0xff]   ;;  %v4343_v19 = vmax.f32 %v3988_v54, 0.0  ;;  %v13709_v54 = vld [vmem:[#allocation7 + $0xe10] ss:$40 sps:$4 sm:$0xff]  }
 0x26f   :  { %4281 = vmatpush2.bf16.msra.mxu0 %v13589_v18  ;;  %v4353_v17 = vmax.f32 %v3992_v16, 0.0  ;;  %v13649_v18 = vld [vmem:[#allocation7 + $0x9b0] ss:$40 sps:$4 sm:$0xff]  }
 0x270   :  { %9181 = vmatpush1.bf16.msra.mxu1 %v13592_v10  ;;  %4282 = vmatprep.subr.bf16.mxu0 %v13597_v40  ;;  %v13657_v10 = vld [vmem:[#allocation7 + $0x964] ss:$40 sps:$4 sm:$0xff]  }
 0x271   :  { %9182 = vmatprep.subr.bf16.mxu1 %v13600_v1  ;;  %v15194_v40 = vpack.c.bf16 %v4353_v17, %v4343_v19  ;;  %v13658_v1 = vld [vmem:[#allocation7 + $0xbe0] ss:$40 sps:$4 sm:$0xff]  }
 0x273   :  { %4283 = vmatpush2.bf16.msra.mxu0 %v13595_v50  ;;  %v13666_v50 = vld [vmem:[#allocation7 + $0xb94] ss:$40 sps:$4 sm:$0xff]  }
 0x274   :  { %9183 = vmatpush1.bf16.msra.mxu1 %v13598_v2  ;;  %9211 = vmatprep.subr.bf16.mxu0 %v13606_v21  ;;  %v13661_v2 = vld [vmem:[#allocation7 + $0x910] ss:$40 sps:$4 sm:$0xff]   ;;  %v13672_v21 = vld [vmem:[#allocation7 + $0xb44] ss:$40 sps:$4 sm:$0xff]  }
 0x275   :  { %9184 = vmatprep.subr.bf16.mxu1 %v13603_v58  ;;  %v13669_v58 = vld [vmem:[#allocation7 + $0x8c4] ss:$40 sps:$4 sm:$0xff]  }
 0x276   :  { %4285 = vmatmul.mubr.bf16.vlgmr.msra.gmra.mxu0 %v14870_v9  ;;  %v13682_v9 = vld [vmem:[#allocation7 + $0xaa0] ss:$40 sps:$4 sm:$0xff]  }
 0x277   :  { %9212 = vmatpush1.bf16.msra.mxu0 %v13604_v38  ;;  %9243 = vmatprep.mubr.bf16.mxu0 %v15185_v41  ;;  %v13675_v38 = vld [vmem:[#allocation7 + $0x874] ss:$40 sps:$4 sm:$0xff]  }
 0x278   :  { %9185 = vmatpush2.bf16.msra.mxu1 %v13601_v15  ;;  %9213 = vmatprep.subr.bf16.mxu0 %v13612_v42  ;;  %v13670_v15 = vld [vmem:[#allocation7 + $0xb40] ss:$40 sps:$4 sm:$0xff]  }
 0x279   :  { %9186 = vmatprep.subr.bf16.mxu1 %v13609_v23  ;;  %v13673_v23 = vld [vmem:[#allocation7 + $0x870] ss:$40 sps:$4 sm:$0xff]   ;;  %v13679_v42 = vld [vmem:[#allocation7 + $0x820] ss:$40 sps:$4 sm:$0xff]  }
 0x27b   :  { %9214 = vmatpush1.bf16.msra.mxu0 %v13610_v25  ;;  %v13684_v25 = vld [vmem:[#allocation7 + $0xaa4] ss:$40 sps:$4 sm:$0xff]  }
 0x27c   :  { %9187 = vmatpush2.bf16.msra.mxu1 %v13607_v24  ;;  %9215 = vmatprep.subr.bf16.mxu0 %v13618_v3  ;;  %v13681_v24 = vld [vmem:[#allocation7 + $0x824] ss:$40 sps:$4 sm:$0xff]   ;;  %v15198_v3 = vpop.f32.mrf.mxu1 }
 0x27d   :  { %9188 = vmatprep.subr.bf16.mxu1 %v13615_v52  ;;  %v13687_v52 = vld [vmem:[#allocation7 + $0x7d4] ss:$40 sps:$4 sm:$0xff]  }
 0x27f   :  { %9216 = vmatpush1.bf16.msra.mxu0 %v13616_v31  ;;  %v13690_v31 = vld [vmem:[#allocation7 + $0xa54] ss:$40 sps:$4 sm:$0xff]  }
 0x280   :  { %9189 = vmatpush2.bf16.msra.mxu1 %v13613_v29  ;;  %9217 = vmatprep.subr.bf16.mxu0 %v13624_v33  ;;  %v13688_v33 = vld [vmem:[#allocation7 + $0xa50] ss:$40 sps:$4 sm:$0xff]  }
 0x281   :  { %9190 = vmatprep.subr.bf16.mxu1 %v13621_v32  ;;  %v13685_v32 = vld [vmem:[#allocation7 + $0x7d0] ss:$40 sps:$4 sm:$0xff]  }
 0x283   :  { %9218 = vmatpush1.bf16.msra.mxu0 %v13622_v45  ;;  %v4030_v45 = vpop.f32.mrf.mxu1 }
 0x284   :  { %9191 = vmatpush2.bf16.msra.mxu1 %v13619_v34  ;;  %9219 = vmatprep.subr.bf16.mxu0 %v13630_v47  ;;  %v13693_v34 = vld [vmem:[#allocation7 + $0x784] ss:$40 sps:$4 sm:$0xff]  }
 0x285   :  { %9192 = vmatprep.subr.bf16.mxu1 %v13627_v46  ;;  %v13696_v47 = vld [vmem:[#allocation7 + $0xa04] ss:$40 sps:$4 sm:$0xff]  }
 0x287   :  { %9220 = vmatpush1.bf16.msra.mxu0 %v13628_v28  ;;  %v13694_v28 = vld [vmem:[#allocation7 + $0xa00] ss:$40 sps:$4 sm:$0xff]  }
 0x288   :  { %9193 = vmatpush2.bf16.msra.mxu1 %v13625_v49  ;;  %9221 = vmatprep.subr.bf16.mxu0 %v13636_v56  ;;  %v13691_v49 = vld [vmem:[#allocation7 + $0x780] ss:$40 sps:$4 sm:$0xff]   ;;  %v15202_v56 = vpop.f32.mrf.mxu1 }
 0x289   :  { %9194 = vmatprep.subr.bf16.mxu1 %v13633_v51  ;;  %v13699_v51 = vld [vmem:[#allocation7 + $0xeb4] ss:$40 sps:$4 sm:$0xff]  }
 0x28a   :  { %v4034_v30 = vpop.f32.mrf.mxu1 }
 0x28b   :  { %9222 = vmatpush1.bf16.msra.mxu0 %v13634_v60  ;;  %v13697_v60 = vld [vmem:[#allocation7 + $0xeb0] ss:$40 sps:$4 sm:$0xff]  }
 0x28c   :  { %9195 = vmatpush2.bf16.msra.mxu1 %v13631_v62  ;;  %9223 = vmatprep.subr.bf16.mxu0 %v13642_v61  ;;  %v13702_v62 = vld [vmem:[#allocation7 + $0x1134] ss:$40 sps:$4 sm:$0xff]   ;;  %v13708_v61 = vld [vmem:[#allocation7 + $0x10e4] ss:$40 sps:$4 sm:$0xff]  }
 0x28d   :  { %9196 = vmatprep.subr.bf16.mxu1 %v13639_v4  ;;  %v13700_v4 = vld [vmem:[#allocation7 + $0x1130] ss:$40 sps:$4 sm:$0xff]  }
 0x28f   :  { %9224 = vmatpush1.bf16.msra.mxu0 %v13640_v48  ;;  %v13706_v48 = vld [vmem:[#allocation7 + $0x10e0] ss:$40 sps:$4 sm:$0xff]  }
 0x290   :  { %9197 = vmatpush2.bf16.msra.mxu1 %v13637_v63  ;;  %9225 = vmatprep.subr.bf16.mxu0 %v13648_v11  ;;  %v13703_v63 = vld [vmem:[#allocation7 + $0xe60] ss:$40 sps:$4 sm:$0xff]   ;;  %v13711_v11 = vld [vmem:[#allocation7 + $0xe14] ss:$40 sps:$4 sm:$0xff]  }
 0x291   :  { %9198 = vmatprep.subr.bf16.mxu1 %v13645_v6 }
 0x293   :  { %9226 = vmatpush1.bf16.msra.mxu0 %v13646_v20  ;;  %v13714_v20 = vld [vmem:[#allocation7 + $0x1094] ss:$40 sps:$4 sm:$0xff]  }
 0x294   :  { %9199 = vmatpush2.bf16.msra.mxu1 %v13643_v53  ;;  %9227 = vmatprep.subr.bf16.mxu0 %v13651_v37 }
 0x295   :  { %9254 = vmatprep.subr.bf16.mxu1 %v13654_v55  ;;  %v13712_v55 = vld [vmem:[#allocation7 + $0x1090] ss:$40 sps:$4 sm:$0xff]  }
 0x296   :  { %v15200_v29 = vpop.f32.mrf.mxu0 }
 0x297   :  { %9201 = vmatmul.mubr.bf16.vlgmr.msra.gmra.mxu1 %v15096_v0  ;;  %9228 = vmatpush2.bf16.msra.mxu0 %v13649_v18 }
 0x298   :  { %9255 = vmatpush1.bf16.msra.mxu1 %v13652_v44  ;;  %9286 = vmatprep.mubr.bf16.mxu1 %v15194_v40  ;;  %v4073_v46 = vpop.f32.mrf.mxu0  ;;  %v13717_v44 = vld [vmem:[#allocation7 + $0xdc4] ss:$40 sps:$4 sm:$0xff]  }
 0x299   :  { %9229 = vmatprep.subr.bf16.mxu0 %v13657_v10  ;;  %9256 = vmatprep.subr.bf16.mxu1 %v13660_v39  ;;  %v4074_v13 = vadd.f32 %v4073_v46, %v4030_v45  ;;  %v13720_v39 = vld [vmem:[#allocation7 + $0x1044] ss:$40 sps:$4 sm:$0xff]   ;;  %v13739_v45 = vld [vmem:[#allocation7 + $0xc80] ss:$40 sps:$4 sm:$0xff]  }
 0x29a   :  { %v15204_v59 = vpop.f32.mrf.mxu0  ;;  %v13742_v46 = vld [vmem:[#allocation7 + $0xf00] ss:$40 sps:$4 sm:$0xff]  }
 0x29b   :  { %9230 = vmatpush2.bf16.msra.mxu0 %v13655_v43 }
 0x29c   :  { %9257 = vmatpush1.bf16.msra.mxu1 %v13658_v1  ;;  %9231 = vmatprep.subr.bf16.mxu0 %v13663_v5  ;;  %v4077_v14 = vpop.f32.mrf.mxu0  ;;  %v13715_v5 = vld [vmem:[#allocation7 + $0xdc0] ss:$40 sps:$4 sm:$0xff]  }
 0x29d   :  { %9258 = vmatprep.subr.bf16.mxu1 %v13666_v50  ;;  %v4078_v10 = vadd.f32 %v4077_v14, %v4034_v30  ;;  %v13718_v50 = vld [vmem:[#allocation7 + $0x1040] ss:$40 sps:$4 sm:$0xff]   ;;  %v13795_v30 = vld [vmem:[#allocation7 + $0x1594] ss:$40 sps:$4 sm:$0xff]   ;;  %v13751_v14 = vld [vmem:[#allocation7 + $0x1310] ss:$40 sps:$4 sm:$0xff]  }
 0x29f   :  { %9232 = vmatpush2.bf16.msra.mxu0 %v13661_v2 }
 0x2a0   :  { %9259 = vmatpush1.bf16.msra.mxu1 %v13664_v57  ;;  %9233 = vmatprep.subr.bf16.mxu0 %v13669_v58  ;;  %v13723_v57 = vld [vmem:[#allocation7 + $0xd74] ss:$40 sps:$4 sm:$0xff]  }
 0x2a1   :  { %9260 = vmatprep.subr.bf16.mxu1 %v13672_v21  ;;  %v13726_v21 = vld [vmem:[#allocation7 + $0xff4] ss:$40 sps:$4 sm:$0xff]  }
 0x2a3   :  { %9234 = vmatpush2.bf16.msra.mxu0 %v13667_v7 }
 0x2a4   :  { %9261 = vmatpush1.bf16.msra.mxu1 %v13670_v15  ;;  %9235 = vmatprep.subr.bf16.mxu0 %v13675_v38  ;;  %v13721_v38 = vld [vmem:[#allocation7 + $0xd70] ss:$40 sps:$4 sm:$0xff]  }
 0x2a5   :  { %9262 = vmatprep.subr.bf16.mxu1 %v13678_v22  ;;  %v13724_v22 = vld [vmem:[#allocation7 + $0xff0] ss:$40 sps:$4 sm:$0xff]  }
 0x2a7   :  { %9236 = vmatpush2.bf16.msra.mxu0 %v13673_v23  ;;  %v13729_v23 = vld [vmem:[#allocation7 + $0xd24] ss:$40 sps:$4 sm:$0xff]  }
 0x2a8   :  { %9263 = vmatpush1.bf16.msra.mxu1 %v13676_v36  ;;  %9237 = vmatprep.subr.bf16.mxu0 %v13681_v24  ;;  %v13732_v24 = vld [vmem:[#allocation7 + $0xfa4] ss:$40 sps:$4 sm:$0xff]  }
 0x2a9   :  { %9264 = vmatprep.subr.bf16.mxu1 %v13684_v25  ;;  %v13727_v25 = vld [vmem:[#allocation7 + $0xd20] ss:$40 sps:$4 sm:$0xff]  }
 0x2ab   :  { %9238 = vmatpush2.bf16.msra.mxu0 %v13679_v42  ;;  %v13730_v42 = vld [vmem:[#allocation7 + $0xfa0] ss:$40 sps:$4 sm:$0xff]  }
 0x2ac   :  { %9265 = vmatpush1.bf16.msra.mxu1 %v13682_v9  ;;  %9239 = vmatprep.subr.bf16.mxu0 %v13687_v52  ;;  %v13735_v9 = vld [vmem:[#allocation7 + $0xcd4] ss:$40 sps:$4 sm:$0xff]  }
 0x2ad   :  { %9266 = vmatprep.subr.bf16.mxu1 %v13690_v31  ;;  %v13738_v52 = vld [vmem:[#allocation7 + $0xf54] ss:$40 sps:$4 sm:$0xff]   ;;  %v13733_v31 = vld [vmem:[#allocation7 + $0xcd0] ss:$40 sps:$4 sm:$0xff]  }
 0x2af   :  { %9240 = vmatpush2.bf16.msra.mxu0 %v13685_v32  ;;  %v13736_v32 = vld [vmem:[#allocation7 + $0xf50] ss:$40 sps:$4 sm:$0xff]  }
 0x2b0   :  { %9267 = vmatpush1.bf16.msra.mxu1 %v13688_v33  ;;  %9241 = vmatprep.subr.bf16.mxu0 %v13693_v34  ;;  %v13741_v33 = vld [vmem:[#allocation7 + $0xc84] ss:$40 sps:$4 sm:$0xff]  }
 0x2b1   :  { %9268 = vmatprep.subr.bf16.mxu1 %v13696_v47  ;;  %v13744_v34 = vld [vmem:[#allocation7 + $0xf04] ss:$40 sps:$4 sm:$0xff]   ;;  %v13747_v47 = vld [vmem:[#allocation7 + $0x13b4] ss:$40 sps:$4 sm:$0xff]  }
 0x2b3   :  { %9242 = vmatpush2.bf16.msra.mxu0 %v13691_v49  ;;  %v13783_v49 = vld [vmem:[#allocation7 + $0x1634] ss:$40 sps:$4 sm:$0xff]  }
 0x2b4   :  { %9269 = vmatpush1.bf16.msra.mxu1 %v13694_v28  ;;  %9297 = vmatprep.subr.bf16.mxu0 %v13702_v62  ;;  %v13745_v28 = vld [vmem:[#allocation7 + $0x13b0] ss:$40 sps:$4 sm:$0xff]   ;;  %v13750_v62 = vld [vmem:[#allocation7 + $0x1364] ss:$40 sps:$4 sm:$0xff]  }
 0x2b5   :  { %9270 = vmatprep.subr.bf16.mxu1 %v13699_v51  ;;  %v13781_v51 = vld [vmem:[#allocation7 + $0x1630] ss:$40 sps:$4 sm:$0xff]  }
 0x2b6   :  { %v15208_v8 = vpop.f32.mrf.mxu0  ;;  %9244 = vmatmul.mubr.bf16.vlgmr.msra.gmra.mxu0 %v15132_v26 }
 0x2b7   :  { %v15206_v6 = vpop.f32.mrf.mxu1  ;;  %9298 = vmatpush1.bf16.msra.mxu0 %v13700_v4  ;;  %v13748_v4 = vld [vmem:[#allocation7 + $0x1360] ss:$40 sps:$4 sm:$0xff]  }
 0x2b8   :  { %9271 = vmatpush2.bf16.msra.mxu1 %v13697_v60  ;;  %v4159_v53 = vpop.f32.mrf.mxu0  ;;  %9299 = vmatprep.subr.bf16.mxu0 %v13708_v61  ;;  %v13789_v60 = vld [vmem:[#allocation7 + $0x15e4] ss:$40 sps:$4 sm:$0xff]   ;;  %v13753_v61 = vld [vmem:[#allocation7 + $0x1314] ss:$40 sps:$4 sm:$0xff]  }
 0x2b9   :  { %v4116_v16 = vpop.f32.mrf.mxu1  ;;  %9272 = vmatprep.subr.bf16.mxu1 %v13705_v12  ;;  %v13787_v12 = vld [vmem:[#allocation7 + $0x15e0] ss:$40 sps:$4 sm:$0xff]  }
 0x2ba   :  { %v4117_v37 = vadd.f32 %v4116_v16, %v4074_v13  ;;  %v15213_v18 = vpop.f32.mrf.mxu0  ;;  %v13754_v13 = vld [vmem:[#allocation7 + $0x12c0] ss:$40 sps:$4 sm:$0xff]  }
 0x2bb   :  { %v15211_v17 = vpop.f32.mrf.mxu1  ;;  %9300 = vmatpush1.bf16.msra.mxu0 %v13706_v48  ;;  %v13756_v48 = vld [vmem:[#allocation7 + $0x12c4] ss:$40 sps:$4 sm:$0xff]   ;;  %v13799_v16 = vld [vmem:[#allocation7 + $0x1540] ss:$40 sps:$4 sm:$0xff]  }
 0x2bc   :  { %9273 = vmatpush2.bf16.msra.mxu1 %v13703_v63  ;;  %9301 = vmatprep.subr.bf16.mxu0 %v13714_v20  ;;  %v4160_v43 = vadd.f32 %v4159_v53, %v4117_v37  ;;  %v4163_v2 = vpop.f32.mrf.mxu0  ;;  %v13793_v63 = vld [vmem:[#allocation7 + $0x1590] ss:$40 sps:$4 sm:$0xff]   ;;  %v13759_v53 = vld [vmem:[#allocation7 + $0x1274] ss:$40 sps:$4 sm:$0xff]  }
 0x2bd   :  { %v4120_v19 = vpop.f32.mrf.mxu1  ;;  %9274 = vmatprep.subr.bf16.mxu1 %v13711_v11  ;;  %v13801_v11 = vld [vmem:[#allocation7 + $0x1544] ss:$40 sps:$4 sm:$0xff]   ;;  %v13807_v20 = vld [vmem:[#allocation7 + $0x14f4] ss:$40 sps:$4 sm:$0xff]   ;;  %v13757_v37 = vld [vmem:[#allocation7 + $0x1270] ss:$40 sps:$4 sm:$0xff]  }
 0x2be   :  { %v4121_v1 = vadd.f32 %v4120_v19, %v4078_v10  ;;  %v4345_v7 = vmax.f32 %v4160_v43, 0.0  ;;  %v13760_v10 = vld [vmem:[#allocation7 + $0x1220] ss:$40 sps:$4 sm:$0xff]   ;;  %v4076_v19 = vadd.f32 %v15204_v59, %v15202_v56  ;;  %v4072_v43 = vadd.f32 %v15200_v29, %v15198_v3  ;;  %v13768_v59 = vld [vmem:[#allocation7 + $0x1184] ss:$40 sps:$4 sm:$0xff]  }
 0x2bf   :  { %9302 = vmatpush1.bf16.msra.mxu0 %v13712_v55  ;;  %v13762_v55 = vld [vmem:[#allocation7 + $0x1224] ss:$40 sps:$4 sm:$0xff]   ;;  %v13823_v29 = vld [vmem:[#allocation7 + $0x1400] ss:$40 sps:$4 sm:$0xff]  }
 0x2c0   :  { %v4164_v58 = vadd.f32 %v4163_v2, %v4121_v1  ;;  %9275 = vmatpush2.bf16.msra.mxu1 %v13709_v54  ;;  %9303 = vmatprep.subr.bf16.mxu0 %v13720_v39  ;;  %v13805_v54 = vld [vmem:[#allocation7 + $0x14f0] ss:$40 sps:$4 sm:$0xff]   ;;  %v13811_v39 = vld [vmem:[#allocation7 + $0x14a0] ss:$40 sps:$4 sm:$0xff]   ;;  %v4119_v1 = vadd.f32 %v15211_v17, %v4076_v19  ;;  %v13828_v19 = vld [vmem:[#allocation7 + $0x3cc] ss:$40 sps:$4 sm:$0xff]  }
 0x2c1   :  { %9276 = vmatprep.subr.bf16.mxu1 %v13717_v44  ;;  %v13813_v44 = vld [vmem:[#allocation7 + $0x14a4] ss:$40 sps:$4 sm:$0xff]   ;;  %v13763_v2 = vld [vmem:[#allocation7 + $0x11d0] ss:$40 sps:$4 sm:$0xff]  }
 0x2c2   :  { %v4355_v15 = vmax.f32 %v4164_v58, 0.0  ;;  %v13817_v58 = vld [vmem:[#allocation7 + $0x1450] ss:$40 sps:$4 sm:$0xff]   ;;  %v4162_v56 = vadd.f32 %v15213_v18, %v4119_v1 }
 0x2c3   :  { %9304 = vmatpush1.bf16.msra.mxu0 %v13718_v50  ;;  %v13819_v50 = vld [vmem:[#allocation7 + $0x1454] ss:$40 sps:$4 sm:$0xff]   ;;  %v13832_v1 = vld [vmem:[#allocation7 + $0x378] ss:$40 sps:$4 sm:$0xff]  }
 0x2c4   :  { %v15215_v36 = vpack.c.bf16 %v4355_v15, %v4345_v7  ;;  %9277 = vmatpush2.bf16.msra.mxu1 %v13715_v5  ;;  %9305 = vmatprep.subr.bf16.mxu0 %v13726_v21  ;;  %v13765_v5 = vld [vmem:[#allocation7 + $0x11d4] ss:$40 sps:$4 sm:$0xff]   ;;  %v13825_v21 = vld [vmem:[#allocation7 + $0x1404] ss:$40 sps:$4 sm:$0xff]   ;;  %v13766_v7 = vld [vmem:[#allocation7 + $0x1180] ss:$40 sps:$4 sm:$0xff]  }
 0x2c5   :  { %9278 = vmatprep.subr.bf16.mxu1 %v13723_v57  ;;  %v4115_v57 = vadd.f32 %v15206_v6, %v4072_v43  ;;  %v4354_v17 = vmax.f32 %v4162_v56, 0.0  ;;  %v13771_v15 = vld [vmem:[#allocation7 + $0x23c] ss:$40 sps:$4 sm:$0xff]  }
 0x2c6   :  { %9329 = vmatprep.mubr.bf16.mxu0 %v15215_v36  ;;  %v13831_v6 = vld [vmem:[#allocation7 + $0x18b4] ss:$40 sps:$4 sm:$0xff]  }
 0x2c7   :  { %9306 = vmatpush1.bf16.msra.mxu0 %v13724_v22  ;;  %v4158_v3 = vadd.f32 %v15208_v8, %v4115_v57  ;;  %v13769_v22 = vld [vmem:[#allocation7 + $0x238] ss:$40 sps:$4 sm:$0xff]   ;;  %v13837_v8 = vld [vmem:[#allocation7 + $0x1864] ss:$40 sps:$4 sm:$0xff]  }
 0x2c8   :  { %9279 = vmatpush2.bf16.msra.mxu1 %v13721_v38  ;;  %9307 = vmatprep.subr.bf16.mxu0 %v13732_v24  ;;  %v13829_v24 = vld [vmem:[#allocation7 + $0x18b0] ss:$40 sps:$4 sm:$0xff]   ;;  %v13834_v43 = vld [vmem:[#allocation7 + $0x37c] ss:$40 sps:$4 sm:$0xff]  }
 0x2c9   :  { %9280 = vmatprep.subr.bf16.mxu1 %v13729_v23  ;;  %v4344_v38 = vmax.f32 %v4158_v3, 0.0  ;;  %v13774_v23 = vld [vmem:[#allocation7 + $0x1ec] ss:$40 sps:$4 sm:$0xff]   ;;  %v13846_v56 = vld [vmem:[#allocation7 + $0x2dc] ss:$40 sps:$4 sm:$0xff]  }
 0x2ca   :  { %v13852_v3 = vld [vmem:[#allocation7 + $0x28c] ss:$40 sps:$4 sm:$0xff]  }
 0x2cb   :  { %9308 = vmatpush1.bf16.msra.mxu0 %v13730_v42  ;;  %v15227_v18 = vpack.c.bf16 %v4354_v17, %v4344_v38  ;;  %v13777_v42 = vld [vmem:[#allocation7 + $0x19c] ss:$40 sps:$4 sm:$0xff]  }
 0x2cc   :  { %9281 = vmatpush2.bf16.msra.mxu1 %v13727_v25  ;;  %9309 = vmatprep.subr.bf16.mxu0 %v13738_v52  ;;  %v13772_v25 = vld [vmem:[#allocation7 + $0x1e8] ss:$40 sps:$4 sm:$0xff]   ;;  %v13775_v52 = vld [vmem:[#allocation7 + $0x198] ss:$40 sps:$4 sm:$0xff]  }
 0x2cd   :  { %9282 = vmatprep.subr.bf16.mxu1 %v13735_v9  ;;  %v13835_v9 = vld [vmem:[#allocation7 + $0x1860] ss:$40 sps:$4 sm:$0xff]  }
 0x2cf   :  { %9310 = vmatpush1.bf16.msra.mxu0 %v13736_v32  ;;  %v13780_v32 = vld [vmem:[#allocation7 + $0x14c] ss:$40 sps:$4 sm:$0xff]  }
 0x2d0   :  { %9283 = vmatpush2.bf16.msra.mxu1 %v13733_v31  ;;  %9311 = vmatprep.subr.bf16.mxu0 %v13744_v34  ;;  %v13843_v31 = vld [vmem:[#allocation7 + $0x1814] ss:$40 sps:$4 sm:$0xff]   ;;  %v13849_v34 = vld [vmem:[#allocation7 + $0x17c4] ss:$40 sps:$4 sm:$0xff]  }
 0x2d1   :  { %9284 = vmatprep.subr.bf16.mxu1 %v13741_v33  ;;  %v13841_v33 = vld [vmem:[#allocation7 + $0x1810] ss:$40 sps:$4 sm:$0xff]  }
 0x2d3   :  { %9312 = vmatpush1.bf16.msra.mxu0 %v13742_v46  ;;  %v13786_v46 = vld [vmem:[#allocation7 + $0xfc] ss:$40 sps:$4 sm:$0xff]  }
 0x2d4   :  { %9285 = vmatpush2.bf16.msra.mxu1 %v13739_v45  ;;  %9313 = vmatprep.subr.bf16.mxu0 %v13747_v47  ;;  %v13778_v45 = vld [vmem:[#allocation7 + $0x148] ss:$40 sps:$4 sm:$0xff]  }
 0x2d5   :  { %9340 = vmatprep.subr.bf16.mxu1 %v13783_v49  ;;  %v13847_v47 = vld [vmem:[#allocation7 + $0x17c0] ss:$40 sps:$4 sm:$0xff]  }
 0x2d6   :  { %v13784_v49 = vld [vmem:[#allocation7 + $0xf8] ss:$40 sps:$4 sm:$0xff]  }
 0x2d7   :  { %9287 = vmatmul.mubr.bf16.vlgmr.msra.gmra.mxu1 %v15175_v35  ;;  %9314 = vmatpush2.bf16.msra.mxu0 %v13745_v28  ;;  %v13855_v28 = vld [vmem:[#allocation7 + $0x1774] ss:$40 sps:$4 sm:$0xff]  }
 0x2d8   :  { %9341 = vmatpush1.bf16.msra.mxu1 %v13781_v51  ;;  %9315 = vmatprep.subr.bf16.mxu0 %v13750_v62  ;;  %v13792_v51 = vld [vmem:[#allocation7 + $0xac] ss:$40 sps:$4 sm:$0xff]   ;;  %v13853_v62 = vld [vmem:[#allocation7 + $0x1770] ss:$40 sps:$4 sm:$0xff]  }
 0x2d9   :  { %9342 = vmatprep.subr.bf16.mxu1 %v13789_v60  ;;  %v13861_v60 = vld [vmem:[#allocation7 + $0x1724] ss:$40 sps:$4 sm:$0xff]  }
 0x2db   :  { %9316 = vmatpush2.bf16.msra.mxu0 %v13748_v4  ;;  %v13790_v4 = vld [vmem:[#allocation7 + $0xa8] ss:$40 sps:$4 sm:$0xff]  }
 0x2dc   :  { %9343 = vmatpush1.bf16.msra.mxu1 %v13787_v12  ;;  %9317 = vmatprep.subr.bf16.mxu0 %v13753_v61  ;;  %v13798_v12 = vld [vmem:[#allocation7 + $0x5c] ss:$40 sps:$4 sm:$0xff]   ;;  %v13859_v61 = vld [vmem:[#allocation7 + $0x1720] ss:$40 sps:$4 sm:$0xff]  }
 0x2dd   :  { %9344 = vmatprep.subr.bf16.mxu1 %v13795_v30  ;;  %v13867_v30 = vld [vmem:[#allocation7 + $0x16d4] ss:$40 sps:$4 sm:$0xff]  }
 0x2df   :  { %9318 = vmatpush2.bf16.msra.mxu0 %v13751_v14  ;;  %v13796_v14 = vld [vmem:[#allocation7 + $0x58] ss:$40 sps:$4 sm:$0xff]  }
 0x2e0   :  { %9345 = vmatpush1.bf16.msra.mxu1 %v13793_v63  ;;  %9319 = vmatprep.subr.bf16.mxu0 %v13756_v48  ;;  %v13804_v63 = vld [vmem:[#allocation7 + $0xc] ss:$40 sps:$4 sm:$0xff]   ;;  %v13865_v48 = vld [vmem:[#allocation7 + $0x16d0] ss:$40 sps:$4 sm:$0xff]  }
 0x2e1   :  { %9346 = vmatprep.subr.bf16.mxu1 %v13801_v11  ;;  %v13873_v11 = vld [vmem:[#allocation7 + $0x1684] ss:$40 sps:$4 sm:$0xff]  }
 0x2e3   :  { %9320 = vmatpush2.bf16.msra.mxu0 %v13754_v13  ;;  %v13802_v13 = vld [vmem:[#allocation7 + $0x8] ss:$40 sps:$4 sm:$0xff]  }
 0x2e4   :  { %9347 = vmatpush1.bf16.msra.mxu1 %v13799_v16  ;;  %9321 = vmatprep.subr.bf16.mxu0 %v13759_v53  ;;  %v13810_v16 = vld [vmem:[#allocation7 + $0x4bc] ss:$40 sps:$4 sm:$0xff]   ;;  %v13871_v53 = vld [vmem:[#allocation7 + $0x1680] ss:$40 sps:$4 sm:$0xff]  }
 0x2e5   :  { %9348 = vmatprep.subr.bf16.mxu1 %v13807_v20  ;;  %v13879_v20 = vld [vmem:[#allocation7 + $0x73c] ss:$40 sps:$4 sm:$0xff]  }
 0x2e7   :  { %9322 = vmatpush2.bf16.msra.mxu0 %v13757_v37  ;;  %v13808_v37 = vld [vmem:[#allocation7 + $0x4b8] ss:$40 sps:$4 sm:$0xff]  }
 0x2e8   :  { %9349 = vmatpush1.bf16.msra.mxu1 %v13805_v54  ;;  %9323 = vmatprep.subr.bf16.mxu0 %v13762_v55  ;;  %v13816_v54 = vld [vmem:[#allocation7 + $0x46c] ss:$40 sps:$4 sm:$0xff]   ;;  %v13814_v55 = vld [vmem:[#allocation7 + $0x468] ss:$40 sps:$4 sm:$0xff]  }
 0x2e9   :  { %9350 = vmatprep.subr.bf16.mxu1 %v13813_v44  ;;  %v13822_v44 = vld [vmem:[#allocation7 + $0x41c] ss:$40 sps:$4 sm:$0xff]  }
 0x2eb   :  { %9324 = vmatpush2.bf16.msra.mxu0 %v13760_v10  ;;  %v13820_v10 = vld [vmem:[#allocation7 + $0x418] ss:$40 sps:$4 sm:$0xff]  }
 0x2ec   :  { %9351 = vmatpush1.bf16.msra.mxu1 %v13811_v39  ;;  %9325 = vmatprep.subr.bf16.mxu0 %v13765_v5  ;;  %v13826_v39 = vld [vmem:[#allocation7 + $0x3c8] ss:$40 sps:$4 sm:$0xff]  }
 0x2ed   :  { %9352 = vmatprep.subr.bf16.mxu1 %v13819_v50  ;;  %v13840_v50 = vld [vmem:[#allocation7 + $0x32c] ss:$40 sps:$4 sm:$0xff]  }
 0x2ef   :  { %9326 = vmatpush2.bf16.msra.mxu0 %v13763_v2  ;;  %v13838_v2 = vld [vmem:[#allocation7 + $0x328] ss:$40 sps:$4 sm:$0xff]  }
 0x2f0   :  { %9353 = vmatpush1.bf16.msra.mxu1 %v13817_v58  ;;  %9327 = vmatprep.subr.bf16.mxu0 %v13768_v59  ;;  %v13844_v59 = vld [vmem:[#allocation7 + $0x2d8] ss:$40 sps:$4 sm:$0xff]  }
 0x2f1   :  { %9354 = vmatprep.subr.bf16.mxu1 %v13825_v21 }
 0x2f3   :  { %9328 = vmatpush2.bf16.msra.mxu0 %v13766_v7 }
 0x2f4   :  { %9355 = vmatpush1.bf16.msra.mxu1 %v13823_v29  ;;  %9383 = vmatprep.subr.bf16.mxu0 %v13771_v15  ;;  %v13850_v29 = vld [vmem:[#allocation7 + $0x288] ss:$40 sps:$4 sm:$0xff]  }
 0x2f5   :  { %9356 = vmatprep.subr.bf16.mxu1 %v13831_v6  ;;  %v13858_v6 = vld [vmem:[#allocation7 + $0xc3c] ss:$40 sps:$4 sm:$0xff]  }
 0x2f6   :  { %9330 = vmatmul.mubr.bf16.vlgmr.msra.gmra.mxu0 %v15227_v18  ;;  %v4200_v57 = vpop.f32.mrf.mxu0 }
 0x2f7   :  { %9384 = vmatpush1.bf16.msra.mxu0 %v13769_v22  ;;  %9415 = vmatprep.mubr.bf16.mxu0 %v15165_v27  ;;  %v4243_v5 = vpop.f32.mrf.mxu1  ;;  %v13856_v22 = vld [vmem:[#allocation7 + $0xc38] ss:$40 sps:$4 sm:$0xff]  }
 0x2f8   :  { %9385 = vmatprep.subr.bf16.mxu0 %v13774_v23  ;;  %9357 = vmatpush2.bf16.msra.mxu1 %v13829_v24  ;;  %v4202_v21 = vpop.f32.mrf.mxu0  ;;  %v13864_v24 = vld [vmem:[#allocation7 + $0xbec] ss:$40 sps:$4 sm:$0xff]  }
 0x2f9   :  { %9358 = vmatprep.subr.bf16.mxu1 %v13837_v8  ;;  %v4245_v58 = vpop.f32.mrf.mxu1 }
 0x2fa   :  { %v4204_v17 = vpop.f32.mrf.mxu0 }
 0x2fb   :  { %9386 = vmatpush1.bf16.msra.mxu0 %v13772_v25  ;;  %v4247_v7 = vpop.f32.mrf.mxu1 }
 0x2fc   :  { %9387 = vmatprep.subr.bf16.mxu0 %v13777_v42  ;;  %9359 = vmatpush2.bf16.msra.mxu1 %v13835_v9  ;;  %v4206_v23 = vpop.f32.mrf.mxu0  ;;  %v13862_v42 = vld [vmem:[#allocation7 + $0xbe8] ss:$40 sps:$4 sm:$0xff]   ;;  %v4246_v9 = vadd.f32 %v4245_v58, %v4202_v21  ;;  %v13900_v58 = vld [vmem:[#allocation7 + $0xa0c] ss:$40 sps:$4 sm:$0xff]   ;;  %v13903_v21 = vld [vmem:[#allocation7 + $0x5fc] ss:$40 sps:$4 sm:$0xff]  }
 0x2fd   :  { %9360 = vmatprep.subr.bf16.mxu1 %v13843_v31  ;;  %v4249_v15 = vpop.f32.mrf.mxu1 }
 0x2ff   :  { %9388 = vmatpush1.bf16.msra.mxu0 %v13775_v52  ;;  %v4244_v52 = vadd.f32 %v4243_v5, %v4200_v57  ;;  %v13894_v5 = vld [vmem:[#allocation7 + $0xa5c] ss:$40 sps:$4 sm:$0xff]   ;;  %v13897_v57 = vld [vmem:[#allocation7 + $0x64c] ss:$40 sps:$4 sm:$0xff]  }
 0x300   :  { %9389 = vmatprep.subr.bf16.mxu0 %v13780_v32  ;;  %9361 = vmatpush2.bf16.msra.mxu1 %v13841_v33  ;;  %v13870_v32 = vld [vmem:[#allocation7 + $0xb9c] ss:$40 sps:$4 sm:$0xff]   ;;  %v4248_v33 = vadd.f32 %v4247_v7, %v4204_v17  ;;  %v13909_v17 = vld [vmem:[#allocation7 + $0x5ac] ss:$40 sps:$4 sm:$0xff]  }
 0x301   :  { %9362 = vmatprep.subr.bf16.mxu1 %v13849_v34  ;;  %v13906_v7 = vld [vmem:[#allocation7 + $0xebc] ss:$40 sps:$4 sm:$0xff]  }
 0x303   :  { %9390 = vmatpush1.bf16.msra.mxu0 %v13778_v45 }
 0x304   :  { %9391 = vmatprep.subr.bf16.mxu0 %v13786_v46  ;;  %9363 = vmatpush2.bf16.msra.mxu1 %v13847_v47 }
 0x305   :  { %9364 = vmatprep.subr.bf16.mxu1 %v13855_v28  ;;  %v4250_v28 = vadd.f32 %v4249_v15, %v4206_v23  ;;  %v13912_v15 = vld [vmem:[#allocation7 + $0xe6c] ss:$40 sps:$4 sm:$0xff]   ;;  %v13918_v23 = vld [vmem:[#allocation7 + $0xe1c] ss:$40 sps:$4 sm:$0xff]  }
 0x307   :  { %9392 = vmatpush1.bf16.msra.mxu0 %v13784_v49  ;;  %v13868_v49 = vld [vmem:[#allocation7 + $0xb98] ss:$40 sps:$4 sm:$0xff]  }
 0x308   :  { %9393 = vmatprep.subr.bf16.mxu0 %v13792_v51  ;;  %9365 = vmatpush2.bf16.msra.mxu1 %v13853_v62 }
 0x309   :  { %9366 = vmatprep.subr.bf16.mxu1 %v13861_v60  ;;  %v13876_v60 = vld [vmem:[#allocation7 + $0xb4c] ss:$40 sps:$4 sm:$0xff]  }
 0x30b   :  { %9394 = vmatpush1.bf16.msra.mxu0 %v13790_v4 }
 0x30c   :  { %9395 = vmatprep.subr.bf16.mxu0 %v13798_v12  ;;  %9367 = vmatpush2.bf16.msra.mxu1 %v13859_v61 }
 0x30d   :  { %9368 = vmatprep.subr.bf16.mxu1 %v13867_v30 }
 0x30f   :  { %9396 = vmatpush1.bf16.msra.mxu0 %v13796_v14 }
 0x310   :  { %9397 = vmatprep.subr.bf16.mxu0 %v13804_v63  ;;  %9369 = vmatpush2.bf16.msra.mxu1 %v13865_v48  ;;  %v13874_v48 = vld [vmem:[#allocation7 + $0xb48] ss:$40 sps:$4 sm:$0xff]  }
 0x311   :  { %9370 = vmatprep.subr.bf16.mxu1 %v13873_v11 }
 0x313   :  { %9398 = vmatpush1.bf16.msra.mxu0 %v13802_v13  ;;  %v13882_v13 = vld [vmem:[#allocation7 + $0xafc] ss:$40 sps:$4 sm:$0xff]  }
 0x314   :  { %9399 = vmatprep.subr.bf16.mxu0 %v13810_v16  ;;  %9371 = vmatpush2.bf16.msra.mxu1 %v13871_v53 }
 0x315   :  { %9426 = vmatprep.subr.bf16.mxu1 %v13879_v20  ;;  %v13877_v20 = vld [vmem:[#allocation7 + $0x738] ss:$40 sps:$4 sm:$0xff]  }
 0x317   :  { %9400 = vmatpush2.bf16.msra.mxu0 %v13808_v37  ;;  %v4329_v38 = vpop.f32.mrf.mxu1 }
 0x318   :  { %9401 = vmatprep.subr.bf16.mxu0 %v13816_v54  ;;  %v13880_v54 = vld [vmem:[#allocation7 + $0xaf8] ss:$40 sps:$4 sm:$0xff]  }
 0x319   :  { %v4331_v25 = vpop.f32.mrf.mxu1 }
 0x31b   :  { %9402 = vmatpush2.bf16.msra.mxu0 %v13814_v55  ;;  %v4333_v46 = vpop.f32.mrf.mxu1 }
 0x31c   :  { %9403 = vmatprep.subr.bf16.mxu0 %v13822_v44 }
 0x31d   :  { %v4335_v14 = vpop.f32.mrf.mxu1 }
 0x31f   :  { %9404 = vmatpush2.bf16.msra.mxu0 %v13820_v10  ;;  %v13885_v10 = vld [vmem:[#allocation7 + $0x6ec] ss:$40 sps:$4 sm:$0xff]  }
 0x320   :  { %9405 = vmatprep.subr.bf16.mxu0 %v13828_v19  ;;  %v13888_v19 = vld [vmem:[#allocation7 + $0xaac] ss:$40 sps:$4 sm:$0xff]  }
 0x323   :  { %9406 = vmatpush2.bf16.msra.mxu0 %v13826_v39  ;;  %v13883_v39 = vld [vmem:[#allocation7 + $0x6e8] ss:$40 sps:$4 sm:$0xff]  }
 0x324   :  { %9407 = vmatprep.subr.bf16.mxu0 %v13834_v43  ;;  %v13886_v43 = vld [vmem:[#allocation7 + $0xaa8] ss:$40 sps:$4 sm:$0xff]  }
 0x327   :  { %9408 = vmatpush2.bf16.msra.mxu0 %v13832_v1  ;;  %v13891_v1 = vld [vmem:[#allocation7 + $0x69c] ss:$40 sps:$4 sm:$0xff]  }
 0x328   :  { %9409 = vmatprep.subr.bf16.mxu0 %v13840_v50  ;;  %v13889_v50 = vld [vmem:[#allocation7 + $0x698] ss:$40 sps:$4 sm:$0xff]  }
 0x32b   :  { %9410 = vmatpush2.bf16.msra.mxu0 %v13838_v2  ;;  %v13892_v2 = vld [vmem:[#allocation7 + $0xa58] ss:$40 sps:$4 sm:$0xff]  }
 0x32c   :  { %9411 = vmatprep.subr.bf16.mxu0 %v13846_v56  ;;  %v13895_v56 = vld [vmem:[#allocation7 + $0x648] ss:$40 sps:$4 sm:$0xff]  }
 0x32f   :  { %9412 = vmatpush2.bf16.msra.mxu0 %v13844_v59  ;;  %v13898_v59 = vld [vmem:[#allocation7 + $0xa08] ss:$40 sps:$4 sm:$0xff]  }
 0x330   :  { %9413 = vmatprep.subr.bf16.mxu0 %v13852_v3  ;;  %v13901_v3 = vld [vmem:[#allocation7 + $0x5f8] ss:$40 sps:$4 sm:$0xff]  }
 0x333   :  { %9414 = vmatpush2.bf16.msra.mxu0 %v13850_v29  ;;  %v13904_v29 = vld [vmem:[#allocation7 + $0xeb8] ss:$40 sps:$4 sm:$0xff]  }
 0x334   :  { %9469 = vmatprep.subr.bf16.mxu0 %v13858_v6  ;;  %v13907_v6 = vld [vmem:[#allocation7 + $0x5a8] ss:$40 sps:$4 sm:$0xff]  }
 0x336   :  { %v4286_v8 = vpop.f32.mrf.mxu0  ;;  %9416 = vmatmul.mubr.bf16.vlgmr.msra.gmra.mxu0 %v15096_v0 }
 0x337   :  { %9470 = vmatpush1.bf16.msra.mxu0 %v13856_v22  ;;  %9501 = vmatprep.mubr.bf16.mxu0 %v15194_v40  ;;  %v4287_v45 = vadd.f32 %v4286_v8, %v4244_v52  ;;  %v13915_v22 = vld [vmem:[#allocation7 + $0x55c] ss:$40 sps:$4 sm:$0xff]   ;;  %v13921_v8 = vld [vmem:[#allocation7 + $0x50c] ss:$40 sps:$4 sm:$0xff]   ;;  %v13922_v52 = vld [vmem:[#allocation7 + $0xdc8] ss:$40 sps:$4 sm:$0xff]  }
 0x338   :  { %v4288_v31 = vpop.f32.mrf.mxu0  ;;  %9471 = vmatprep.subr.bf16.mxu0 %v13864_v24  ;;  %v13913_v24 = vld [vmem:[#allocation7 + $0x558] ss:$40 sps:$4 sm:$0xff]  }
 0x339   :  { %v4289_v34 = vadd.f32 %v4288_v31, %v4246_v9  ;;  %v4330_v30 = vadd.f32 %v4329_v38, %v4287_v45  ;;  %v13910_v38 = vld [vmem:[#allocation7 + $0xe68] ss:$40 sps:$4 sm:$0xff]   ;;  %v13927_v31 = vld [vmem:[#allocation7 + $0x9bc] ss:$40 sps:$4 sm:$0xff]   ;;  %v13933_v45 = vld [vmem:[#allocation7 + $0x96c] ss:$40 sps:$4 sm:$0xff]  }
 0x33a   :  { %v4290_v47 = vpop.f32.mrf.mxu0  ;;  %v13919_v9 = vld [vmem:[#allocation7 + $0x508] ss:$40 sps:$4 sm:$0xff]  }
 0x33b   :  { %v4291_v51 = vadd.f32 %v4290_v47, %v4248_v33  ;;  %9472 = vmatpush1.bf16.msra.mxu0 %v13862_v42  ;;  %v4332_v4 = vadd.f32 %v4331_v25, %v4289_v34  ;;  %v4346_v37 = vmax.f32 %v4330_v30, 0.0  ;;  %v13916_v25 = vld [vmem:[#allocation7 + $0xe18] ss:$40 sps:$4 sm:$0xff]   ;;  %v13924_v42 = vld [vmem:[#allocation7 + $0xdcc] ss:$40 sps:$4 sm:$0xff]  }
 0x33c   :  { %v4292_v62 = vpop.f32.mrf.mxu0  ;;  %9473 = vmatprep.subr.bf16.mxu0 %v13870_v32  ;;  %v13930_v32 = vld [vmem:[#allocation7 + $0xd7c] ss:$40 sps:$4 sm:$0xff]   ;;  %v13925_v33 = vld [vmem:[#allocation7 + $0x9b8] ss:$40 sps:$4 sm:$0xff]   ;;  %v13931_v47 = vld [vmem:[#allocation7 + $0x968] ss:$40 sps:$4 sm:$0xff]  }
 0x33d   :  { %v4334_v12 = vadd.f32 %v4333_v46, %v4291_v51  ;;  %v4293_v61 = vadd.f32 %v4292_v62, %v4250_v28  ;;  %v4347_v16 = vmax.f32 %v4332_v4, 0.0  ;;  %v13928_v34 = vld [vmem:[#allocation7 + $0xd78] ss:$40 sps:$4 sm:$0xff]   ;;  %v13936_v46 = vld [vmem:[#allocation7 + $0xd2c] ss:$40 sps:$4 sm:$0xff]  }
 0x33e   :  { %v13939_v28 = vld [vmem:[#allocation7 + $0x91c] ss:$40 sps:$4 sm:$0xff]   ;;  %v13937_v62 = vld [vmem:[#allocation7 + $0x918] ss:$40 sps:$4 sm:$0xff]   ;;  %v13945_v4 = vld [vmem:[#allocation7 + $0x8cc] ss:$40 sps:$4 sm:$0xff]  }
 0x33f   :  { %v4336_v63 = vadd.f32 %v4335_v14, %v4293_v61  ;;  %9474 = vmatpush1.bf16.msra.mxu0 %v13868_v49  ;;  %v4356_v11 = vmax.f32 %v4334_v12, 0.0  ;;  %v13934_v49 = vld [vmem:[#allocation7 + $0xd28] ss:$40 sps:$4 sm:$0xff]   ;;  %v13942_v51 = vld [vmem:[#allocation7 + $0xcdc] ss:$40 sps:$4 sm:$0xff]  }
 0x340   :  { %9475 = vmatprep.subr.bf16.mxu0 %v13876_v60  ;;  %v13940_v60 = vld [vmem:[#allocation7 + $0xcd8] ss:$40 sps:$4 sm:$0xff]   ;;  %v13948_v12 = vld [vmem:[#allocation7 + $0xc8c] ss:$40 sps:$4 sm:$0xff]   ;;  %v13943_v61 = vld [vmem:[#allocation7 + $0x8c8] ss:$40 sps:$4 sm:$0xff]  }
 0x341   :  { %v4357_v53 = vmax.f32 %v4336_v63, 0.0  ;;  %v15235_v44 = vpack.c.bf16 %v4356_v11, %v4346_v37  ;;  %v13946_v30 = vld [vmem:[#allocation7 + $0xc88] ss:$40 sps:$4 sm:$0xff]   ;;  %v13951_v14 = vld [vmem:[#allocation7 + $0x87c] ss:$40 sps:$4 sm:$0xff]  }
 0x342   :  { %v13954_v63 = vld [vmem:[#allocation7 + $0x163c] ss:$40 sps:$4 sm:$0xff]   ;;  %v13952_v11 = vld [vmem:[#allocation7 + $0x1638] ss:$40 sps:$4 sm:$0xff]  }
 0x343   :  { %v15233_v55 = vpack.c.bf16 %v4357_v53, %v4347_v16  ;;  %9476 = vmatpush1.bf16.msra.mxu0 %v13874_v48  ;;  %v13949_v48 = vld [vmem:[#allocation7 + $0x878] ss:$40 sps:$4 sm:$0xff]   ;;  %v13960_v16 = vld [vmem:[#allocation7 + $0x15ec] ss:$40 sps:$4 sm:$0xff]   ;;  %v13955_v53 = vld [vmem:[#allocation7 + $0x828] ss:$40 sps:$4 sm:$0xff]  }
 0x344   :  { %9477 = vmatprep.subr.bf16.mxu0 %v13882_v13  ;;  %v13957_v13 = vld [vmem:[#allocation7 + $0x82c] ss:$40 sps:$4 sm:$0xff]   ;;  %v13963_v37 = vld [vmem:[#allocation7 + $0x7dc] ss:$40 sps:$4 sm:$0xff]  }
 0x345   :  { %9372 = vmatprep.mubr.bf16.mxu1 %v15233_v55 }
 0x346   :  { %9373 = vmatmul.mubr.bf16.vlgmr.msra.gmra.mxu1 %v15235_v44 }
 0x347   :  { %9427 = vmatpush1.bf16.msra.mxu1 %v13877_v20  ;;  %9458 = vmatprep.mubr.bf16.mxu1 %v15185_v41  ;;  %v13958_v20 = vld [vmem:[#allocation7 + $0x15e8] ss:$40 sps:$4 sm:$0xff]  }
 0x348   :  { %9478 = vmatpush1.bf16.msra.mxu0 %v13880_v54  ;;  %9428 = vmatprep.subr.bf16.mxu1 %v13885_v10  ;;  %v13966_v54 = vld [vmem:[#allocation7 + $0x159c] ss:$40 sps:$4 sm:$0xff]   ;;  %v13961_v10 = vld [vmem:[#allocation7 + $0x7d8] ss:$40 sps:$4 sm:$0xff]  }
 0x349   :  { %9479 = vmatprep.subr.bf16.mxu0 %v13888_v19  ;;  %v13964_v19 = vld [vmem:[#allocation7 + $0x1598] ss:$40 sps:$4 sm:$0xff]  }
 0x34b   :  { %9429 = vmatpush1.bf16.msra.mxu1 %v13883_v39  ;;  %v13969_v39 = vld [vmem:[#allocation7 + $0x78c] ss:$40 sps:$4 sm:$0xff]  }
 0x34c   :  { %9480 = vmatpush1.bf16.msra.mxu0 %v13886_v43  ;;  %9430 = vmatprep.subr.bf16.mxu1 %v13891_v1  ;;  %v13972_v43 = vld [vmem:[#allocation7 + $0x154c] ss:$40 sps:$4 sm:$0xff]   ;;  %v13967_v1 = vld [vmem:[#allocation7 + $0x788] ss:$40 sps:$4 sm:$0xff]  }
 0x34d   :  { %9481 = vmatprep.subr.bf16.mxu0 %v13894_v5  ;;  %v13970_v5 = vld [vmem:[#allocation7 + $0x1548] ss:$40 sps:$4 sm:$0xff]  }
 0x34f   :  { %9431 = vmatpush1.bf16.msra.mxu1 %v13889_v50  ;;  %v13975_v50 = vld [vmem:[#allocation7 + $0x113c] ss:$40 sps:$4 sm:$0xff]  }
 0x350   :  { %9482 = vmatpush1.bf16.msra.mxu0 %v13892_v2  ;;  %9432 = vmatprep.subr.bf16.mxu1 %v13897_v57  ;;  %v13978_v2 = vld [vmem:[#allocation7 + $0x14fc] ss:$40 sps:$4 sm:$0xff]   ;;  %v13973_v57 = vld [vmem:[#allocation7 + $0x1138] ss:$40 sps:$4 sm:$0xff]  }
 0x351   :  { %9483 = vmatprep.subr.bf16.mxu0 %v13900_v58  ;;  %v13976_v58 = vld [vmem:[#allocation7 + $0x14f8] ss:$40 sps:$4 sm:$0xff]  }
 0x353   :  { %9433 = vmatpush1.bf16.msra.mxu1 %v13895_v56  ;;  %v13981_v56 = vld [vmem:[#allocation7 + $0x10ec] ss:$40 sps:$4 sm:$0xff]  }
 0x354   :  { %9484 = vmatpush1.bf16.msra.mxu0 %v13898_v59  ;;  %9434 = vmatprep.subr.bf16.mxu1 %v13903_v21  ;;  %v13984_v59 = vld [vmem:[#allocation7 + $0x14ac] ss:$40 sps:$4 sm:$0xff]   ;;  %v13979_v21 = vld [vmem:[#allocation7 + $0x10e8] ss:$40 sps:$4 sm:$0xff]  }
 0x355   :  { %9485 = vmatprep.subr.bf16.mxu0 %v13906_v7  ;;  %v13982_v7 = vld [vmem:[#allocation7 + $0x14a8] ss:$40 sps:$4 sm:$0xff]  }
 0x357   :  { %9435 = vmatpush1.bf16.msra.mxu1 %v13901_v3  ;;  %v13987_v3 = vld [vmem:[#allocation7 + $0x109c] ss:$40 sps:$4 sm:$0xff]  }
 0x358   :  { %9486 = vmatpush2.bf16.msra.mxu0 %v13904_v29  ;;  %9436 = vmatprep.subr.bf16.mxu1 %v13909_v17  ;;  %v13990_v29 = vld [vmem:[#allocation7 + $0x145c] ss:$40 sps:$4 sm:$0xff]   ;;  %v13985_v17 = vld [vmem:[#allocation7 + $0x1098] ss:$40 sps:$4 sm:$0xff]  }
 0x359   :  { %9487 = vmatprep.subr.bf16.mxu0 %v13912_v15  ;;  %v13988_v15 = vld [vmem:[#allocation7 + $0x1458] ss:$40 sps:$4 sm:$0xff]  }
 0x35b   :  { %9437 = vmatpush1.bf16.msra.mxu1 %v13907_v6  ;;  %v13993_v6 = vld [vmem:[#allocation7 + $0x104c] ss:$40 sps:$4 sm:$0xff]  }
 0x35c   :  { %9488 = vmatpush2.bf16.msra.mxu0 %v13910_v38  ;;  %9438 = vmatprep.subr.bf16.mxu1 %v13915_v22  ;;  %v13996_v38 = vld [vmem:[#allocation7 + $0x140c] ss:$40 sps:$4 sm:$0xff]   ;;  %v13991_v22 = vld [vmem:[#allocation7 + $0x1048] ss:$40 sps:$4 sm:$0xff]  }
 0x35d   :  { %9489 = vmatprep.subr.bf16.mxu0 %v13918_v23  ;;  %v13994_v23 = vld [vmem:[#allocation7 + $0x1408] ss:$40 sps:$4 sm:$0xff]  }
 0x35f   :  { %9439 = vmatpush1.bf16.msra.mxu1 %v13913_v24  ;;  %v13999_v24 = vld [vmem:[#allocation7 + $0xffc] ss:$40 sps:$4 sm:$0xff]  }
 0x360   :  { %9490 = vmatpush2.bf16.msra.mxu0 %v13916_v25  ;;  %9440 = vmatprep.subr.bf16.mxu1 %v13921_v8  ;;  %v14002_v25 = vld [vmem:[#allocation7 + $0x18bc] ss:$40 sps:$4 sm:$0xff]   ;;  %v13997_v8 = vld [vmem:[#allocation7 + $0xff8] ss:$40 sps:$4 sm:$0xff]  }
 0x361   :  { %9491 = vmatprep.subr.bf16.mxu0 %v13924_v42  ;;  %v14000_v42 = vld [vmem:[#allocation7 + $0x18b8] ss:$40 sps:$4 sm:$0xff]  }
 0x363   :  { %9441 = vmatpush1.bf16.msra.mxu1 %v13919_v9  ;;  %v14005_v9 = vld [vmem:[#allocation7 + $0xfac] ss:$40 sps:$4 sm:$0xff]  }
 0x364   :  { %9492 = vmatpush2.bf16.msra.mxu0 %v13922_v52  ;;  %9442 = vmatprep.subr.bf16.mxu1 %v13927_v31  ;;  %v14008_v52 = vld [vmem:[#allocation7 + $0x186c] ss:$40 sps:$4 sm:$0xff]   ;;  %v14003_v31 = vld [vmem:[#allocation7 + $0xfa8] ss:$40 sps:$4 sm:$0xff]  }
 0x365   :  { %9493 = vmatprep.subr.bf16.mxu0 %v13930_v32  ;;  %v14006_v32 = vld [vmem:[#allocation7 + $0x1868] ss:$40 sps:$4 sm:$0xff]  }
 0x367   :  { %9443 = vmatpush2.bf16.msra.mxu1 %v13925_v33  ;;  %v14011_v33 = vld [vmem:[#allocation7 + $0xf5c] ss:$40 sps:$4 sm:$0xff]  }
 0x368   :  { %9494 = vmatpush2.bf16.msra.mxu0 %v13928_v34  ;;  %9444 = vmatprep.subr.bf16.mxu1 %v13933_v45  ;;  %v14014_v34 = vld [vmem:[#allocation7 + $0x181c] ss:$40 sps:$4 sm:$0xff]   ;;  %v14009_v45 = vld [vmem:[#allocation7 + $0xf58] ss:$40 sps:$4 sm:$0xff]  }
 0x369   :  { %9495 = vmatprep.subr.bf16.mxu0 %v13936_v46  ;;  %v14012_v46 = vld [vmem:[#allocation7 + $0x1818] ss:$40 sps:$4 sm:$0xff]  }
 0x36b   :  { %9445 = vmatpush2.bf16.msra.mxu1 %v13931_v47  ;;  %v14017_v47 = vld [vmem:[#allocation7 + $0xf0c] ss:$40 sps:$4 sm:$0xff]  }
 0x36c   :  { %9496 = vmatpush2.bf16.msra.mxu0 %v13934_v49  ;;  %9446 = vmatprep.subr.bf16.mxu1 %v13939_v28  ;;  %v14020_v49 = vld [vmem:[#allocation7 + $0x17cc] ss:$40 sps:$4 sm:$0xff]   ;;  %v14015_v28 = vld [vmem:[#allocation7 + $0xf08] ss:$40 sps:$4 sm:$0xff]  }
 0x36d   :  { %9497 = vmatprep.subr.bf16.mxu0 %v13942_v51  ;;  %v14018_v51 = vld [vmem:[#allocation7 + $0x17c8] ss:$40 sps:$4 sm:$0xff]  }
 0x36f   :  { %9447 = vmatpush2.bf16.msra.mxu1 %v13937_v62  ;;  %v14023_v62 = vld [vmem:[#allocation7 + $0x13bc] ss:$40 sps:$4 sm:$0xff]  }
 0x370   :  { %9498 = vmatpush2.bf16.msra.mxu0 %v13940_v60  ;;  %9448 = vmatprep.subr.bf16.mxu1 %v13945_v4  ;;  %v14026_v60 = vld [vmem:[#allocation7 + $0x177c] ss:$40 sps:$4 sm:$0xff]   ;;  %v14021_v4 = vld [vmem:[#allocation7 + $0x13b8] ss:$40 sps:$4 sm:$0xff]  }
 0x371   :  { %9499 = vmatprep.subr.bf16.mxu0 %v13948_v12  ;;  %v14024_v12 = vld [vmem:[#allocation7 + $0x1778] ss:$40 sps:$4 sm:$0xff]  }
 0x373   :  { %9449 = vmatpush2.bf16.msra.mxu1 %v13943_v61  ;;  %v14029_v61 = vld [vmem:[#allocation7 + $0x136c] ss:$40 sps:$4 sm:$0xff]  }
 0x374   :  { %9500 = vmatpush2.bf16.msra.mxu0 %v13946_v30  ;;  %9450 = vmatprep.subr.bf16.mxu1 %v13951_v14  ;;  %v14032_v30 = vld [vmem:[#allocation7 + $0x172c] ss:$40 sps:$4 sm:$0xff]   ;;  %v14027_v14 = vld [vmem:[#allocation7 + $0x1368] ss:$40 sps:$4 sm:$0xff]  }
 0x375   :  { %9555 = vmatprep.subr.bf16.mxu0 %v13954_v63  ;;  %v14030_v63 = vld [vmem:[#allocation7 + $0x1728] ss:$40 sps:$4 sm:$0xff]  }
 0x377   :  { %9451 = vmatpush2.bf16.msra.mxu1 %v13949_v48  ;;  %9502 = vmatmul.mubr.bf16.vlgmr.msra.gmra.mxu0 %v15175_v35  ;;  %v14035_v48 = vld [vmem:[#allocation7 + $0x131c] ss:$40 sps:$4 sm:$0xff]  }
 0x378   :  { %9556 = vmatpush1.bf16.msra.mxu0 %v13952_v11  ;;  %9587 = vmatprep.mubr.bf16.mxu0 %v15233_v55  ;;  %v14038_v11 = vld [vmem:[#allocation7 + $0x16dc] ss:$40 sps:$4 sm:$0xff]  }
 0x379   :  { %9452 = vmatprep.subr.bf16.mxu1 %v13957_v13  ;;  %9557 = vmatprep.subr.bf16.mxu0 %v13960_v16  ;;  %v14033_v13 = vld [vmem:[#allocation7 + $0x1318] ss:$40 sps:$4 sm:$0xff]  }
 0x37a   :  { %v14036_v16 = vld [vmem:[#allocation7 + $0x16d8] ss:$40 sps:$4 sm:$0xff]  }
 0x37b   :  { %9453 = vmatpush2.bf16.msra.mxu1 %v13955_v53  ;;  %v14041_v53 = vld [vmem:[#allocation7 + $0x12cc] ss:$40 sps:$4 sm:$0xff]  }
 0x37c   :  { %9558 = vmatpush1.bf16.msra.mxu0 %v13958_v20  ;;  %9454 = vmatprep.subr.bf16.mxu1 %v13963_v37  ;;  %v14044_v20 = vld [vmem:[#allocation7 + $0x168c] ss:$40 sps:$4 sm:$0xff]   ;;  %v14039_v37 = vld [vmem:[#allocation7 + $0x12c8] ss:$40 sps:$4 sm:$0xff]  }
 0x37d   :  { %9559 = vmatprep.subr.bf16.mxu0 %v13966_v54  ;;  %v14042_v54 = vld [vmem:[#allocation7 + $0x1688] ss:$40 sps:$4 sm:$0xff]  }
 0x37f   :  { %9455 = vmatpush2.bf16.msra.mxu1 %v13961_v10  ;;  %v14047_v10 = vld [vmem:[#allocation7 + $0x127c] ss:$40 sps:$4 sm:$0xff]  }
 0x380   :  { %9560 = vmatpush1.bf16.msra.mxu0 %v13964_v19  ;;  %9456 = vmatprep.subr.bf16.mxu1 %v13969_v39  ;;  %v14050_v19 = vld [vmem:[#allocation7 + $0x744] ss:$40 sps:$4 sm:$0xff]   ;;  %v14045_v39 = vld [vmem:[#allocation7 + $0x1278] ss:$40 sps:$4 sm:$0xff]  }
 0x381   :  { %9561 = vmatprep.subr.bf16.mxu0 %v13972_v43  ;;  %v14048_v43 = vld [vmem:[#allocation7 + $0x740] ss:$40 sps:$4 sm:$0xff]  }
 0x383   :  { %9457 = vmatpush2.bf16.msra.mxu1 %v13967_v1  ;;  %v14053_v1 = vld [vmem:[#allocation7 + $0x122c] ss:$40 sps:$4 sm:$0xff]  }
 0x384   :  { %9562 = vmatpush1.bf16.msra.mxu0 %v13970_v5  ;;  %9512 = vmatprep.subr.bf16.mxu1 %v13975_v50  ;;  %v14056_v5 = vld [vmem:[#allocation7 + $0x6f4] ss:$40 sps:$4 sm:$0xff]   ;;  %v14051_v50 = vld [vmem:[#allocation7 + $0x1228] ss:$40 sps:$4 sm:$0xff]  }
 0x385   :  { %9563 = vmatprep.subr.bf16.mxu0 %v13978_v2  ;;  %v14054_v2 = vld [vmem:[#allocation7 + $0x6f0] ss:$40 sps:$4 sm:$0xff]  }
 0x386   :  { %9459 = vmatmul.mubr.bf16.vlgmr.msra.gmra.mxu1 %v15132_v26 }
 0x387   :  { %9513 = vmatpush1.bf16.msra.mxu1 %v13973_v57  ;;  %9544 = vmatprep.mubr.bf16.mxu1 %v15215_v36  ;;  %v14059_v57 = vld [vmem:[#allocation7 + $0x11dc] ss:$40 sps:$4 sm:$0xff]  }
 0x388   :  { %9564 = vmatpush1.bf16.msra.mxu0 %v13976_v58  ;;  %9514 = vmatprep.subr.bf16.mxu1 %v13981_v56  ;;  %v14062_v58 = vld [vmem:[#allocation7 + $0x6a4] ss:$40 sps:$4 sm:$0xff]   ;;  %v14057_v56 = vld [vmem:[#allocation7 + $0x11d8] ss:$40 sps:$4 sm:$0xff]  }
 0x389   :  { %9565 = vmatprep.subr.bf16.mxu0 %v13984_v59  ;;  %v14060_v59 = vld [vmem:[#allocation7 + $0x6a0] ss:$40 sps:$4 sm:$0xff]  }
 0x38b   :  { %9515 = vmatpush1.bf16.msra.mxu1 %v13979_v21  ;;  %v14065_v21 = vld [vmem:[#allocation7 + $0x118c] ss:$40 sps:$4 sm:$0xff]  }
 0x38c   :  { %9566 = vmatpush1.bf16.msra.mxu0 %v13982_v7  ;;  %9516 = vmatprep.subr.bf16.mxu1 %v13987_v3  ;;  %v14068_v7 = vld [vmem:[#allocation7 + $0x654] ss:$40 sps:$4 sm:$0xff]   ;;  %v14063_v3 = vld [vmem:[#allocation7 + $0x1188] ss:$40 sps:$4 sm:$0xff]  }
 0x38d   :  { %9567 = vmatprep.subr.bf16.mxu0 %v13990_v29  ;;  %v14066_v29 = vld [vmem:[#allocation7 + $0x650] ss:$40 sps:$4 sm:$0xff]  }
 0x38f   :  { %9517 = vmatpush1.bf16.msra.mxu1 %v13985_v17  ;;  %v14071_v17 = vld [vmem:[#allocation7 + $0x244] ss:$40 sps:$4 sm:$0xff]  }
 0x390   :  { %9568 = vmatpush1.bf16.msra.mxu0 %v13988_v15  ;;  %9518 = vmatprep.subr.bf16.mxu1 %v13993_v6  ;;  %v14074_v15 = vld [vmem:[#allocation7 + $0x604] ss:$40 sps:$4 sm:$0xff]   ;;  %v14069_v6 = vld [vmem:[#allocation7 + $0x240] ss:$40 sps:$4 sm:$0xff]  }
 0x391   :  { %9569 = vmatprep.subr.bf16.mxu0 %v13996_v38  ;;  %v14072_v38 = vld [vmem:[#allocation7 + $0x600] ss:$40 sps:$4 sm:$0xff]  }
 0x393   :  { %9519 = vmatpush1.bf16.msra.mxu1 %v13991_v22  ;;  %v14077_v22 = vld [vmem:[#allocation7 + $0x1f4] ss:$40 sps:$4 sm:$0xff]  }
 0x394   :  { %9570 = vmatpush1.bf16.msra.mxu0 %v13994_v23  ;;  %9520 = vmatprep.subr.bf16.mxu1 %v13999_v24  ;;  %v14080_v23 = vld [vmem:[#allocation7 + $0x5b4] ss:$40 sps:$4 sm:$0xff]   ;;  %v14075_v24 = vld [vmem:[#allocation7 + $0x1f0] ss:$40 sps:$4 sm:$0xff]  }
 0x395   :  { %9571 = vmatprep.subr.bf16.mxu0 %v14002_v25  ;;  %v14078_v25 = vld [vmem:[#allocation7 + $0x5b0] ss:$40 sps:$4 sm:$0xff]  }
 0x397   :  { %9521 = vmatpush1.bf16.msra.mxu1 %v13997_v8  ;;  %v14083_v8 = vld [vmem:[#allocation7 + $0x1a4] ss:$40 sps:$4 sm:$0xff]  }
 0x398   :  { %9572 = vmatpush2.bf16.msra.mxu0 %v14000_v42  ;;  %9522 = vmatprep.subr.bf16.mxu1 %v14005_v9  ;;  %v14086_v42 = vld [vmem:[#allocation7 + $0x564] ss:$40 sps:$4 sm:$0xff]   ;;  %v14081_v9 = vld [vmem:[#allocation7 + $0x1a0] ss:$40 sps:$4 sm:$0xff]  }
 0x399   :  { %9573 = vmatprep.subr.bf16.mxu0 %v14008_v52  ;;  %v14084_v52 = vld [vmem:[#allocation7 + $0x560] ss:$40 sps:$4 sm:$0xff]  }
 0x39b   :  { %9523 = vmatpush1.bf16.msra.mxu1 %v14003_v31  ;;  %v14089_v31 = vld [vmem:[#allocation7 + $0x154] ss:$40 sps:$4 sm:$0xff]  }
 0x39c   :  { %9574 = vmatpush2.bf16.msra.mxu0 %v14006_v32  ;;  %9524 = vmatprep.subr.bf16.mxu1 %v14011_v33  ;;  %v14092_v32 = vld [vmem:[#allocation7 + $0x514] ss:$40 sps:$4 sm:$0xff]   ;;  %v14087_v33 = vld [vmem:[#allocation7 + $0x150] ss:$40 sps:$4 sm:$0xff]  }
 0x39d   :  { %9575 = vmatprep.subr.bf16.mxu0 %v14014_v34  ;;  %v14090_v34 = vld [vmem:[#allocation7 + $0x510] ss:$40 sps:$4 sm:$0xff]  }
 0x39f   :  { %9525 = vmatpush1.bf16.msra.mxu1 %v14009_v45  ;;  %v14095_v45 = vld [vmem:[#allocation7 + $0x104] ss:$40 sps:$4 sm:$0xff]  }
 0x3a0   :  { %9576 = vmatpush2.bf16.msra.mxu0 %v14012_v46  ;;  %9526 = vmatprep.subr.bf16.mxu1 %v14017_v47  ;;  %v14098_v46 = vld [vmem:[#allocation7 + $0x9c4] ss:$40 sps:$4 sm:$0xff]   ;;  %v14093_v47 = vld [vmem:[#allocation7 + $0x100] ss:$40 sps:$4 sm:$0xff]  }
 0x3a1   :  { %9577 = vmatprep.subr.bf16.mxu0 %v14020_v49  ;;  %v14096_v49 = vld [vmem:[#allocation7 + $0x9c0] ss:$40 sps:$4 sm:$0xff]  }
 0x3a3   :  { %9527 = vmatpush1.bf16.msra.mxu1 %v14015_v28  ;;  %v14101_v28 = vld [vmem:[#allocation7 + $0xb4] ss:$40 sps:$4 sm:$0xff]  }
 0x3a4   :  { %9578 = vmatpush2.bf16.msra.mxu0 %v14018_v51  ;;  %9528 = vmatprep.subr.bf16.mxu1 %v14023_v62  ;;  %v14104_v51 = vld [vmem:[#allocation7 + $0x974] ss:$40 sps:$4 sm:$0xff]   ;;  %v14099_v62 = vld [vmem:[#allocation7 + $0xb0] ss:$40 sps:$4 sm:$0xff]  }
 0x3a5   :  { %9579 = vmatprep.subr.bf16.mxu0 %v14026_v60  ;;  %v14102_v60 = vld [vmem:[#allocation7 + $0x970] ss:$40 sps:$4 sm:$0xff]  }
 0x3a7   :  { %9529 = vmatpush2.bf16.msra.mxu1 %v14021_v4  ;;  %v14107_v4 = vld [vmem:[#allocation7 + $0x64] ss:$40 sps:$4 sm:$0xff]  }
 0x3a8   :  { %9580 = vmatpush2.bf16.msra.mxu0 %v14024_v12  ;;  %9530 = vmatprep.subr.bf16.mxu1 %v14029_v61  ;;  %v14110_v12 = vld [vmem:[#allocation7 + $0x924] ss:$40 sps:$4 sm:$0xff]   ;;  %v14105_v61 = vld [vmem:[#allocation7 + $0x60] ss:$40 sps:$4 sm:$0xff]  }
 0x3a9   :  { %9581 = vmatprep.subr.bf16.mxu0 %v14032_v30  ;;  %v14108_v30 = vld [vmem:[#allocation7 + $0x920] ss:$40 sps:$4 sm:$0xff]  }
 0x3ab   :  { %9531 = vmatpush2.bf16.msra.mxu1 %v14027_v14  ;;  %v14113_v14 = vld [vmem:[#allocation7 + $0x14] ss:$40 sps:$4 sm:$0xff]  }
 0x3ac   :  { %9582 = vmatpush2.bf16.msra.mxu0 %v14030_v63  ;;  %9532 = vmatprep.subr.bf16.mxu1 %v14035_v48  ;;  %v14116_v63 = vld [vmem:[#allocation7 + $0x8d4] ss:$40 sps:$4 sm:$0xff]   ;;  %v14111_v48 = vld [vmem:[#allocation7 + $0x10] ss:$40 sps:$4 sm:$0xff]  }
 0x3ad   :  { %9583 = vmatprep.subr.bf16.mxu0 %v14038_v11  ;;  %v14114_v11 = vld [vmem:[#allocation7 + $0x8d0] ss:$40 sps:$4 sm:$0xff]  }
 0x3af   :  { %9533 = vmatpush2.bf16.msra.mxu1 %v14033_v13  ;;  %v14119_v13 = vld [vmem:[#allocation7 + $0x4c4] ss:$40 sps:$4 sm:$0xff]  }
 0x3b0   :  { %9584 = vmatpush2.bf16.msra.mxu0 %v14036_v16  ;;  %9534 = vmatprep.subr.bf16.mxu1 %v14041_v53  ;;  %v14122_v16 = vld [vmem:[#allocation7 + $0x884] ss:$40 sps:$4 sm:$0xff]   ;;  %v14117_v53 = vld [vmem:[#allocation7 + $0x4c0] ss:$40 sps:$4 sm:$0xff]  }
 0x3b1   :  { %9585 = vmatprep.subr.bf16.mxu0 %v14044_v20  ;;  %v14120_v20 = vld [vmem:[#allocation7 + $0x880] ss:$40 sps:$4 sm:$0xff]  }
 0x3b3   :  { %9535 = vmatpush2.bf16.msra.mxu1 %v14039_v37  ;;  %v14125_v37 = vld [vmem:[#allocation7 + $0x474] ss:$40 sps:$4 sm:$0xff]  }
 0x3b4   :  { %9586 = vmatpush2.bf16.msra.mxu0 %v14042_v54  ;;  %9536 = vmatprep.subr.bf16.mxu1 %v14047_v10  ;;  %v14128_v54 = vld [vmem:[#allocation7 + $0x834] ss:$40 sps:$4 sm:$0xff]   ;;  %v14123_v10 = vld [vmem:[#allocation7 + $0x470] ss:$40 sps:$4 sm:$0xff]  }
 0x3b5   :  { %9641 = vmatprep.subr.bf16.mxu0 %v14050_v19  ;;  %v14126_v19 = vld [vmem:[#allocation7 + $0x830] ss:$40 sps:$4 sm:$0xff]  }
 0x3b7   :  { %9537 = vmatpush2.bf16.msra.mxu1 %v14045_v39  ;;  %9588 = vmatmul.mubr.bf16.vlgmr.msra.gmra.mxu0 %v15235_v44  ;;  %v14131_v39 = vld [vmem:[#allocation7 + $0x424] ss:$40 sps:$4 sm:$0xff]  }
 0x3b8   :  { %9642 = vmatpush1.bf16.msra.mxu0 %v14048_v43  ;;  %9673 = vmatprep.mubr.bf16.mxu0 %v15185_v41  ;;  %v14134_v43 = vld [vmem:[#allocation7 + $0x7e4] ss:$40 sps:$4 sm:$0xff]  }
 0x3b9   :  { %9538 = vmatprep.subr.bf16.mxu1 %v14053_v1  ;;  %9643 = vmatprep.subr.bf16.mxu0 %v14056_v5  ;;  %v14129_v1 = vld [vmem:[#allocation7 + $0x420] ss:$40 sps:$4 sm:$0xff]  }
 0x3ba   :  { %v14132_v5 = vld [vmem:[#allocation7 + $0x7e0] ss:$40 sps:$4 sm:$0xff]  }
 0x3bb   :  { %9539 = vmatpush2.bf16.msra.mxu1 %v14051_v50  ;;  %v14137_v50 = vld [vmem:[#allocation7 + $0x3d4] ss:$40 sps:$4 sm:$0xff]  }
 0x3bc   :  { %9644 = vmatpush1.bf16.msra.mxu0 %v14054_v2  ;;  %9540 = vmatprep.subr.bf16.mxu1 %v14059_v57  ;;  %v14140_v2 = vld [vmem:[#allocation7 + $0x794] ss:$40 sps:$4 sm:$0xff]   ;;  %v14135_v57 = vld [vmem:[#allocation7 + $0x3d0] ss:$40 sps:$4 sm:$0xff]  }
 0x3bd   :  { %9645 = vmatprep.subr.bf16.mxu0 %v14062_v58  ;;  %v14138_v58 = vld [vmem:[#allocation7 + $0x790] ss:$40 sps:$4 sm:$0xff]  }
 0x3bf   :  { %9541 = vmatpush2.bf16.msra.mxu1 %v14057_v56  ;;  %v14143_v56 = vld [vmem:[#allocation7 + $0x384] ss:$40 sps:$4 sm:$0xff]  }
 0x3c0   :  { %9646 = vmatpush1.bf16.msra.mxu0 %v14060_v59  ;;  %9542 = vmatprep.subr.bf16.mxu1 %v14065_v21  ;;  %v14146_v59 = vld [vmem:[#allocation7 + $0x1144] ss:$40 sps:$4 sm:$0xff]   ;;  %v14141_v21 = vld [vmem:[#allocation7 + $0x380] ss:$40 sps:$4 sm:$0xff]  }
 0x3c1   :  { %9647 = vmatprep.subr.bf16.mxu0 %v14068_v7  ;;  %v14144_v7 = vld [vmem:[#allocation7 + $0x1140] ss:$40 sps:$4 sm:$0xff]  }
 0x3c3   :  { %9543 = vmatpush2.bf16.msra.mxu1 %v14063_v3  ;;  %v14149_v3 = vld [vmem:[#allocation7 + $0x334] ss:$40 sps:$4 sm:$0xff]  }
 0x3c4   :  { %9648 = vmatpush1.bf16.msra.mxu0 %v14066_v29  ;;  %9598 = vmatprep.subr.bf16.mxu1 %v14071_v17  ;;  %v14152_v29 = vld [vmem:[#allocation7 + $0x10f4] ss:$40 sps:$4 sm:$0xff]   ;;  %v14147_v17 = vld [vmem:[#allocation7 + $0x330] ss:$40 sps:$4 sm:$0xff]  }
 0x3c5   :  { %9649 = vmatprep.subr.bf16.mxu0 %v14074_v15  ;;  %v14150_v15 = vld [vmem:[#allocation7 + $0x10f0] ss:$40 sps:$4 sm:$0xff]  }
 0x3c6   :  { %9545 = vmatmul.mubr.bf16.vlgmr.msra.gmra.mxu1 %v15227_v18 }
 0x3c7   :  { %9599 = vmatpush1.bf16.msra.mxu1 %v14069_v6  ;;  %9630 = vmatprep.mubr.bf16.mxu1 %v15165_v27  ;;  %v14155_v6 = vld [vmem:[#allocation7 + $0x2e4] ss:$40 sps:$4 sm:$0xff]  }
 0x3c8   :  { %9650 = vmatpush1.bf16.msra.mxu0 %v14072_v38  ;;  %9600 = vmatprep.subr.bf16.mxu1 %v14077_v22  ;;  %v14158_v38 = vld [vmem:[#allocation7 + $0x10a4] ss:$40 sps:$4 sm:$0xff]   ;;  %v14153_v22 = vld [vmem:[#allocation7 + $0x2e0] ss:$40 sps:$4 sm:$0xff]  }
 0x3c9   :  { %9651 = vmatprep.subr.bf16.mxu0 %v14080_v23  ;;  %v14156_v23 = vld [vmem:[#allocation7 + $0x10a0] ss:$40 sps:$4 sm:$0xff]  }
 0x3cb   :  { %9601 = vmatpush1.bf16.msra.mxu1 %v14075_v24  ;;  %v14161_v24 = vld [vmem:[#allocation7 + $0x294] ss:$40 sps:$4 sm:$0xff]  }
 0x3cc   :  { %9652 = vmatpush1.bf16.msra.mxu0 %v14078_v25  ;;  %9602 = vmatprep.subr.bf16.mxu1 %v14083_v8  ;;  %v14164_v25 = vld [vmem:[#allocation7 + $0x1054] ss:$40 sps:$4 sm:$0xff]   ;;  %v14159_v8 = vld [vmem:[#allocation7 + $0x290] ss:$40 sps:$4 sm:$0xff]  }
 0x3cd   :  { %9653 = vmatprep.subr.bf16.mxu0 %v14086_v42  ;;  %v14162_v42 = vld [vmem:[#allocation7 + $0x1050] ss:$40 sps:$4 sm:$0xff]  }
 0x3cf   :  { %9603 = vmatpush1.bf16.msra.mxu1 %v14081_v9  ;;  %v14167_v9 = vld [vmem:[#allocation7 + $0xc44] ss:$40 sps:$4 sm:$0xff]  }
 0x3d0   :  { %9654 = vmatpush1.bf16.msra.mxu0 %v14084_v52  ;;  %9604 = vmatprep.subr.bf16.mxu1 %v14089_v31  ;;  %v14170_v52 = vld [vmem:[#allocation7 + $0x1004] ss:$40 sps:$4 sm:$0xff]   ;;  %v14165_v31 = vld [vmem:[#allocation7 + $0xc40] ss:$40 sps:$4 sm:$0xff]  }
 0x3d1   :  { %9655 = vmatprep.subr.bf16.mxu0 %v14092_v32  ;;  %v14168_v32 = vld [vmem:[#allocation7 + $0x1000] ss:$40 sps:$4 sm:$0xff]  }
 0x3d3   :  { %9605 = vmatpush1.bf16.msra.mxu1 %v14087_v33  ;;  %v14173_v33 = vld [vmem:[#allocation7 + $0xbf4] ss:$40 sps:$4 sm:$0xff]  }
 0x3d4   :  { %9656 = vmatpush1.bf16.msra.mxu0 %v14090_v34  ;;  %9606 = vmatprep.subr.bf16.mxu1 %v14095_v45  ;;  %v14176_v34 = vld [vmem:[#allocation7 + $0xfb4] ss:$40 sps:$4 sm:$0xff]   ;;  %v14171_v45 = vld [vmem:[#allocation7 + $0xbf0] ss:$40 sps:$4 sm:$0xff]  }
 0x3d5   :  { %9657 = vmatprep.subr.bf16.mxu0 %v14098_v46  ;;  %v14174_v46 = vld [vmem:[#allocation7 + $0xfb0] ss:$40 sps:$4 sm:$0xff]  }
 0x3d7   :  { %9607 = vmatpush1.bf16.msra.mxu1 %v14093_v47  ;;  %v14179_v47 = vld [vmem:[#allocation7 + $0xba4] ss:$40 sps:$4 sm:$0xff]  }
 0x3d8   :  { %9658 = vmatpush2.bf16.msra.mxu0 %v14096_v49  ;;  %9608 = vmatprep.subr.bf16.mxu1 %v14101_v28  ;;  %v14182_v49 = vld [vmem:[#allocation7 + $0xf64] ss:$40 sps:$4 sm:$0xff]   ;;  %v14177_v28 = vld [vmem:[#allocation7 + $0xba0] ss:$40 sps:$4 sm:$0xff]  }
 0x3d9   :  { %9659 = vmatprep.subr.bf16.mxu0 %v14104_v51  ;;  %v14180_v51 = vld [vmem:[#allocation7 + $0xf60] ss:$40 sps:$4 sm:$0xff]  }
 0x3db   :  { %9609 = vmatpush1.bf16.msra.mxu1 %v14099_v62  ;;  %v14185_v62 = vld [vmem:[#allocation7 + $0xb54] ss:$40 sps:$4 sm:$0xff]  }
 0x3dc   :  { %9660 = vmatpush2.bf16.msra.mxu0 %v14102_v60  ;;  %9610 = vmatprep.subr.bf16.mxu1 %v14107_v4  ;;  %v14188_v60 = vld [vmem:[#allocation7 + $0xf14] ss:$40 sps:$4 sm:$0xff]   ;;  %v14183_v4 = vld [vmem:[#allocation7 + $0xb50] ss:$40 sps:$4 sm:$0xff]  }
 0x3dd   :  { %9661 = vmatprep.subr.bf16.mxu0 %v14110_v12  ;;  %v14186_v12 = vld [vmem:[#allocation7 + $0xf10] ss:$40 sps:$4 sm:$0xff]  }
 0x3df   :  { %9611 = vmatpush1.bf16.msra.mxu1 %v14105_v61  ;;  %v14191_v61 = vld [vmem:[#allocation7 + $0xb04] ss:$40 sps:$4 sm:$0xff]  }
 0x3e0   :  { %9662 = vmatpush2.bf16.msra.mxu0 %v14108_v30  ;;  %9612 = vmatprep.subr.bf16.mxu1 %v14113_v14  ;;  %v14194_v30 = vld [vmem:[#allocation7 + $0x13c4] ss:$40 sps:$4 sm:$0xff]   ;;  %v14189_v14 = vld [vmem:[#allocation7 + $0xb00] ss:$40 sps:$4 sm:$0xff]  }
 0x3e1   :  { %9663 = vmatprep.subr.bf16.mxu0 %v14116_v63  ;;  %v14192_v63 = vld [vmem:[#allocation7 + $0x13c0] ss:$40 sps:$4 sm:$0xff]  }
 0x3e3   :  { %9613 = vmatpush1.bf16.msra.mxu1 %v14111_v48  ;;  %v14197_v48 = vld [vmem:[#allocation7 + $0xab4] ss:$40 sps:$4 sm:$0xff]  }
 0x3e4   :  { %9664 = vmatpush2.bf16.msra.mxu0 %v14114_v11  ;;  %9614 = vmatprep.subr.bf16.mxu1 %v14119_v13  ;;  %v14200_v11 = vld [vmem:[#allocation7 + $0x1374] ss:$40 sps:$4 sm:$0xff]   ;;  %v14195_v13 = vld [vmem:[#allocation7 + $0xab0] ss:$40 sps:$4 sm:$0xff]  }
 0x3e5   :  { %9665 = vmatprep.subr.bf16.mxu0 %v14122_v16  ;;  %v14198_v16 = vld [vmem:[#allocation7 + $0x1370] ss:$40 sps:$4 sm:$0xff]  }
 0x3e7   :  { %9615 = vmatpush2.bf16.msra.mxu1 %v14117_v53  ;;  %v14203_v53 = vld [vmem:[#allocation7 + $0xa64] ss:$40 sps:$4 sm:$0xff]  }
 0x3e8   :  { %9666 = vmatpush2.bf16.msra.mxu0 %v14120_v20  ;;  %9616 = vmatprep.subr.bf16.mxu1 %v14125_v37  ;;  %v14206_v20 = vld [vmem:[#allocation7 + $0x1324] ss:$40 sps:$4 sm:$0xff]   ;;  %v14201_v37 = vld [vmem:[#allocation7 + $0xa60] ss:$40 sps:$4 sm:$0xff]  }
 0x3e9   :  { %9667 = vmatprep.subr.bf16.mxu0 %v14128_v54  ;;  %v14204_v54 = vld [vmem:[#allocation7 + $0x1320] ss:$40 sps:$4 sm:$0xff]  }
 0x3eb   :  { %9617 = vmatpush2.bf16.msra.mxu1 %v14123_v10  ;;  %v14209_v10 = vld [vmem:[#allocation7 + $0xa14] ss:$40 sps:$4 sm:$0xff]  }
 0x3ec   :  { %9668 = vmatpush2.bf16.msra.mxu0 %v14126_v19  ;;  %9618 = vmatprep.subr.bf16.mxu1 %v14131_v39  ;;  %v14212_v19 = vld [vmem:[#allocation7 + $0x12d4] ss:$40 sps:$4 sm:$0xff]   ;;  %v14207_v39 = vld [vmem:[#allocation7 + $0xa10] ss:$40 sps:$4 sm:$0xff]  }
 0x3ed   :  { %9669 = vmatprep.subr.bf16.mxu0 %v14134_v43  ;;  %v14210_v43 = vld [vmem:[#allocation7 + $0x12d0] ss:$40 sps:$4 sm:$0xff]  }
 0x3ef   :  { %9619 = vmatpush2.bf16.msra.mxu1 %v14129_v1  ;;  %v14215_v1 = vld [vmem:[#allocation7 + $0xec4] ss:$40 sps:$4 sm:$0xff]  }
 0x3f0   :  { %9670 = vmatpush2.bf16.msra.mxu0 %v14132_v5  ;;  %9620 = vmatprep.subr.bf16.mxu1 %v14137_v50  ;;  %v14218_v5 = vld [vmem:[#allocation7 + $0x1284] ss:$40 sps:$4 sm:$0xff]   ;;  %v14213_v50 = vld [vmem:[#allocation7 + $0xec0] ss:$40 sps:$4 sm:$0xff]  }
 0x3f1   :  { %9671 = vmatprep.subr.bf16.mxu0 %v14140_v2  ;;  %v14216_v2 = vld [vmem:[#allocation7 + $0x1280] ss:$40 sps:$4 sm:$0xff]  }
 0x3f3   :  { %9621 = vmatpush2.bf16.msra.mxu1 %v14135_v57  ;;  %v14221_v57 = vld [vmem:[#allocation7 + $0xe74] ss:$40 sps:$4 sm:$0xff]  }
 0x3f4   :  { %9672 = vmatpush2.bf16.msra.mxu0 %v14138_v58  ;;  %9622 = vmatprep.subr.bf16.mxu1 %v14143_v56  ;;  %v14224_v58 = vld [vmem:[#allocation7 + $0x1234] ss:$40 sps:$4 sm:$0xff]   ;;  %v14219_v56 = vld [vmem:[#allocation7 + $0xe70] ss:$40 sps:$4 sm:$0xff]  }
 0x3f5   :  { %9727 = vmatprep.subr.bf16.mxu0 %v14146_v59  ;;  %v14222_v59 = vld [vmem:[#allocation7 + $0x1230] ss:$40 sps:$4 sm:$0xff]  }
 0x3f7   :  { %9623 = vmatpush2.bf16.msra.mxu1 %v14141_v21  ;;  %9674 = vmatmul.mubr.bf16.vlgmr.msra.gmra.mxu0 %v15132_v26  ;;  %v14227_v21 = vld [vmem:[#allocation7 + $0xe24] ss:$40 sps:$4 sm:$0xff]  }
 0x3f8   :  { %9728 = vmatpush1.bf16.msra.mxu0 %v14144_v7  ;;  %9759 = vmatprep.mubr.bf16.mxu0 %v15215_v36  ;;  %v14230_v7 = vld [vmem:[#allocation7 + $0x11e4] ss:$40 sps:$4 sm:$0xff]  }
 0x3f9   :  { %9624 = vmatprep.subr.bf16.mxu1 %v14149_v3  ;;  %9729 = vmatprep.subr.bf16.mxu0 %v14152_v29  ;;  %v14225_v3 = vld [vmem:[#allocation7 + $0xe20] ss:$40 sps:$4 sm:$0xff]  }
 0x3fa   :  { %v14228_v29 = vld [vmem:[#allocation7 + $0x11e0] ss:$40 sps:$4 sm:$0xff]  }
 0x3fb   :  { %9625 = vmatpush2.bf16.msra.mxu1 %v14147_v17  ;;  %v14233_v17 = vld [vmem:[#allocation7 + $0xdd4] ss:$40 sps:$4 sm:$0xff]  }
 0x3fc   :  { %9730 = vmatpush1.bf16.msra.mxu0 %v14150_v15  ;;  %9626 = vmatprep.subr.bf16.mxu1 %v14155_v6  ;;  %v14236_v15 = vld [vmem:[#allocation7 + $0x1194] ss:$40 sps:$4 sm:$0xff]   ;;  %v14231_v6 = vld [vmem:[#allocation7 + $0xdd0] ss:$40 sps:$4 sm:$0xff]  }
 0x3fd   :  { %9731 = vmatprep.subr.bf16.mxu0 %v14158_v38  ;;  %v14234_v38 = vld [vmem:[#allocation7 + $0x1190] ss:$40 sps:$4 sm:$0xff]  }
 0x3ff   :  { %9627 = vmatpush2.bf16.msra.mxu1 %v14153_v22  ;;  %v14239_v22 = vld [vmem:[#allocation7 + $0xd84] ss:$40 sps:$4 sm:$0xff]  }
 0x400   :  { %9732 = vmatpush1.bf16.msra.mxu0 %v14156_v23  ;;  %9628 = vmatprep.subr.bf16.mxu1 %v14161_v24  ;;  %v14242_v23 = vld [vmem:[#allocation7 + $0x24c] ss:$40 sps:$4 sm:$0xff]   ;;  %v14237_v24 = vld [vmem:[#allocation7 + $0xd80] ss:$40 sps:$4 sm:$0xff]  }
 0x401   :  { %9733 = vmatprep.subr.bf16.mxu0 %v14164_v25  ;;  %v14240_v25 = vld [vmem:[#allocation7 + $0x248] ss:$40 sps:$4 sm:$0xff]  }
 0x403   :  { %9629 = vmatpush2.bf16.msra.mxu1 %v14159_v8  ;;  %v14245_v8 = vld [vmem:[#allocation7 + $0xd34] ss:$40 sps:$4 sm:$0xff]  }
 0x404   :  { %9734 = vmatpush1.bf16.msra.mxu0 %v14162_v42  ;;  %9684 = vmatprep.subr.bf16.mxu1 %v14167_v9  ;;  %v14248_v42 = vld [vmem:[#allocation7 + $0x1fc] ss:$40 sps:$4 sm:$0xff]   ;;  %v14243_v9 = vld [vmem:[#allocation7 + $0xd30] ss:$40 sps:$4 sm:$0xff]  }
 0x405   :  { %9735 = vmatprep.subr.bf16.mxu0 %v14170_v52  ;;  %v14246_v52 = vld [vmem:[#allocation7 + $0x1f8] ss:$40 sps:$4 sm:$0xff]  }
 0x406   :  { %9631 = vmatmul.mubr.bf16.vlgmr.msra.gmra.mxu1 %v15096_v0 }
 0x407   :  { %9685 = vmatpush1.bf16.msra.mxu1 %v14165_v31  ;;  %9716 = vmatprep.mubr.bf16.mxu1 %v15194_v40  ;;  %v14251_v31 = vld [vmem:[#allocation7 + $0xce4] ss:$40 sps:$4 sm:$0xff]  }
 0x408   :  { %9736 = vmatpush1.bf16.msra.mxu0 %v14168_v32  ;;  %9686 = vmatprep.subr.bf16.mxu1 %v14173_v33  ;;  %v14254_v32 = vld [vmem:[#allocation7 + $0x1ac] ss:$40 sps:$4 sm:$0xff]   ;;  %v14249_v33 = vld [vmem:[#allocation7 + $0xce0] ss:$40 sps:$4 sm:$0xff]  }
 0x409   :  { %9737 = vmatprep.subr.bf16.mxu0 %v14176_v34  ;;  %v14252_v34 = vld [vmem:[#allocation7 + $0x1a8] ss:$40 sps:$4 sm:$0xff]  }
 0x40b   :  { %9687 = vmatpush1.bf16.msra.mxu1 %v14171_v45  ;;  %v14257_v45 = vld [vmem:[#allocation7 + $0xc94] ss:$40 sps:$4 sm:$0xff]  }
 0x40c   :  { %9738 = vmatpush1.bf16.msra.mxu0 %v14174_v46  ;;  %9688 = vmatprep.subr.bf16.mxu1 %v14179_v47  ;;  %v14260_v46 = vld [vmem:[#allocation7 + $0x15c] ss:$40 sps:$4 sm:$0xff]   ;;  %v14255_v47 = vld [vmem:[#allocation7 + $0xc90] ss:$40 sps:$4 sm:$0xff]  }
 0x40d   :  { %9739 = vmatprep.subr.bf16.mxu0 %v14182_v49  ;;  %v14258_v49 = vld [vmem:[#allocation7 + $0x158] ss:$40 sps:$4 sm:$0xff]  }
 0x40f   :  { %9689 = vmatpush1.bf16.msra.mxu1 %v14177_v28  ;;  %v14263_v28 = vld [vmem:[#allocation7 + $0x1644] ss:$40 sps:$4 sm:$0xff]  }
 0x410   :  { %9740 = vmatpush1.bf16.msra.mxu0 %v14180_v51  ;;  %9690 = vmatprep.subr.bf16.mxu1 %v14185_v62  ;;  %v14266_v51 = vld [vmem:[#allocation7 + $0x10c] ss:$40 sps:$4 sm:$0xff]   ;;  %v14261_v62 = vld [vmem:[#allocation7 + $0x1640] ss:$40 sps:$4 sm:$0xff]  }
 0x411   :  { %9741 = vmatprep.subr.bf16.mxu0 %v14188_v60  ;;  %v14264_v60 = vld [vmem:[#allocation7 + $0x108] ss:$40 sps:$4 sm:$0xff]  }
 0x413   :  { %9691 = vmatpush1.bf16.msra.mxu1 %v14183_v4  ;;  %v14269_v4 = vld [vmem:[#allocation7 + $0x15f4] ss:$40 sps:$4 sm:$0xff]  }
 0x414   :  { %9742 = vmatpush1.bf16.msra.mxu0 %v14186_v12  ;;  %9692 = vmatprep.subr.bf16.mxu1 %v14191_v61  ;;  %v14272_v12 = vld [vmem:[#allocation7 + $0xbc] ss:$40 sps:$4 sm:$0xff]   ;;  %v14267_v61 = vld [vmem:[#allocation7 + $0x15f0] ss:$40 sps:$4 sm:$0xff]  }
 0x415   :  { %9743 = vmatprep.subr.bf16.mxu0 %v14194_v30  ;;  %v14270_v30 = vld [vmem:[#allocation7 + $0xb8] ss:$40 sps:$4 sm:$0xff]  }
 0x417   :  { %9693 = vmatpush1.bf16.msra.mxu1 %v14189_v14  ;;  %v14275_v14 = vld [vmem:[#allocation7 + $0x15a4] ss:$40 sps:$4 sm:$0xff]  }
 0x418   :  { %9744 = vmatpush2.bf16.msra.mxu0 %v14192_v63  ;;  %9694 = vmatprep.subr.bf16.mxu1 %v14197_v48  ;;  %v14278_v63 = vld [vmem:[#allocation7 + $0x6c] ss:$40 sps:$4 sm:$0xff]   ;;  %v14273_v48 = vld [vmem:[#allocation7 + $0x15a0] ss:$40 sps:$4 sm:$0xff]  }
 0x419   :  { %9745 = vmatprep.subr.bf16.mxu0 %v14200_v11  ;;  %v14276_v11 = vld [vmem:[#allocation7 + $0x68] ss:$40 sps:$4 sm:$0xff]  }
 0x41b   :  { %9695 = vmatpush1.bf16.msra.mxu1 %v14195_v13  ;;  %v14281_v13 = vld [vmem:[#allocation7 + $0x1554] ss:$40 sps:$4 sm:$0xff]  }
 0x41c   :  { %9746 = vmatpush2.bf16.msra.mxu0 %v14198_v16  ;;  %9696 = vmatprep.subr.bf16.mxu1 %v14203_v53  ;;  %v14284_v16 = vld [vmem:[#allocation7 + $0x1c] ss:$40 sps:$4 sm:$0xff]   ;;  %v14279_v53 = vld [vmem:[#allocation7 + $0x1550] ss:$40 sps:$4 sm:$0xff]  }
 0x41d   :  { %9747 = vmatprep.subr.bf16.mxu0 %v14206_v20  ;;  %v14282_v20 = vld [vmem:[#allocation7 + $0x18] ss:$40 sps:$4 sm:$0xff]  }
 0x41f   :  { %9697 = vmatpush1.bf16.msra.mxu1 %v14201_v37  ;;  %v14287_v37 = vld [vmem:[#allocation7 + $0x1504] ss:$40 sps:$4 sm:$0xff]  }
 0x420   :  { %9748 = vmatpush2.bf16.msra.mxu0 %v14204_v54  ;;  %9698 = vmatprep.subr.bf16.mxu1 %v14209_v10  ;;  %v14290_v54 = vld [vmem:[#allocation7 + $0x4cc] ss:$40 sps:$4 sm:$0xff]   ;;  %v14285_v10 = vld [vmem:[#allocation7 + $0x1500] ss:$40 sps:$4 sm:$0xff]  }
 0x421   :  { %9749 = vmatprep.subr.bf16.mxu0 %v14212_v19  ;;  %v14288_v19 = vld [vmem:[#allocation7 + $0x4c8] ss:$40 sps:$4 sm:$0xff]  }
 0x423   :  { %9699 = vmatpush1.bf16.msra.mxu1 %v14207_v39  ;;  %v14293_v39 = vld [vmem:[#allocation7 + $0x14b4] ss:$40 sps:$4 sm:$0xff]  }
 0x424   :  { %9750 = vmatpush2.bf16.msra.mxu0 %v14210_v43  ;;  %9700 = vmatprep.subr.bf16.mxu1 %v14215_v1  ;;  %v14296_v43 = vld [vmem:[#allocation7 + $0x47c] ss:$40 sps:$4 sm:$0xff]   ;;  %v14291_v1 = vld [vmem:[#allocation7 + $0x14b0] ss:$40 sps:$4 sm:$0xff]  }
 0x425   :  { %9751 = vmatprep.subr.bf16.mxu0 %v14218_v5  ;;  %v14294_v5 = vld [vmem:[#allocation7 + $0x478] ss:$40 sps:$4 sm:$0xff]  }
 0x427   :  { %9701 = vmatpush2.bf16.msra.mxu1 %v14213_v50  ;;  %v14299_v50 = vld [vmem:[#allocation7 + $0x1464] ss:$40 sps:$4 sm:$0xff]  }
 0x428   :  { %9752 = vmatpush2.bf16.msra.mxu0 %v14216_v2  ;;  %9702 = vmatprep.subr.bf16.mxu1 %v14221_v57  ;;  %v14302_v2 = vld [vmem:[#allocation7 + $0x42c] ss:$40 sps:$4 sm:$0xff]   ;;  %v14297_v57 = vld [vmem:[#allocation7 + $0x1460] ss:$40 sps:$4 sm:$0xff]  }
 0x429   :  { %9753 = vmatprep.subr.bf16.mxu0 %v14224_v58  ;;  %v14300_v58 = vld [vmem:[#allocation7 + $0x428] ss:$40 sps:$4 sm:$0xff]  }
 0x42b   :  { %9703 = vmatpush2.bf16.msra.mxu1 %v14219_v56  ;;  %v14305_v56 = vld [vmem:[#allocation7 + $0x1414] ss:$40 sps:$4 sm:$0xff]  }
 0x42c   :  { %9754 = vmatpush2.bf16.msra.mxu0 %v14222_v59  ;;  %9704 = vmatprep.subr.bf16.mxu1 %v14227_v21  ;;  %v14308_v59 = vld [vmem:[#allocation7 + $0x3dc] ss:$40 sps:$4 sm:$0xff]   ;;  %v14303_v21 = vld [vmem:[#allocation7 + $0x1410] ss:$40 sps:$4 sm:$0xff]  }
 0x42d   :  { %9755 = vmatprep.subr.bf16.mxu0 %v14230_v7  ;;  %v14306_v7 = vld [vmem:[#allocation7 + $0x3d8] ss:$40 sps:$4 sm:$0xff]  }
 0x42f   :  { %9705 = vmatpush2.bf16.msra.mxu1 %v14225_v3  ;;  %v14311_v3 = vld [vmem:[#allocation7 + $0x18c4] ss:$40 sps:$4 sm:$0xff]  }
 0x430   :  { %9756 = vmatpush2.bf16.msra.mxu0 %v14228_v29  ;;  %9706 = vmatprep.subr.bf16.mxu1 %v14233_v17  ;;  %v14314_v29 = vld [vmem:[#allocation7 + $0x38c] ss:$40 sps:$4 sm:$0xff]   ;;  %v14309_v17 = vld [vmem:[#allocation7 + $0x18c0] ss:$40 sps:$4 sm:$0xff]  }
 0x431   :  { %9757 = vmatprep.subr.bf16.mxu0 %v14236_v15  ;;  %v14312_v15 = vld [vmem:[#allocation7 + $0x388] ss:$40 sps:$4 sm:$0xff]  }
 0x433   :  { %9707 = vmatpush2.bf16.msra.mxu1 %v14231_v6  ;;  %v14317_v6 = vld [vmem:[#allocation7 + $0x1874] ss:$40 sps:$4 sm:$0xff]  }
 0x434   :  { %9758 = vmatpush2.bf16.msra.mxu0 %v14234_v38  ;;  %9708 = vmatprep.subr.bf16.mxu1 %v14239_v22  ;;  %v14320_v38 = vld [vmem:[#allocation7 + $0x33c] ss:$40 sps:$4 sm:$0xff]   ;;  %v14315_v22 = vld [vmem:[#allocation7 + $0x1870] ss:$40 sps:$4 sm:$0xff]  }
 0x435   :  { %9813 = vmatprep.subr.bf16.mxu0 %v14242_v23  ;;  %v14318_v23 = vld [vmem:[#allocation7 + $0x338] ss:$40 sps:$4 sm:$0xff]  }
 0x437   :  { %9709 = vmatpush2.bf16.msra.mxu1 %v14237_v24  ;;  %9760 = vmatmul.mubr.bf16.vlgmr.msra.gmra.mxu0 %v15227_v18  ;;  %v14323_v24 = vld [vmem:[#allocation7 + $0x1824] ss:$40 sps:$4 sm:$0xff]  }
 0x438   :  { %9814 = vmatpush1.bf16.msra.mxu0 %v14240_v25  ;;  %9845 = vmatprep.mubr.bf16.mxu0 %v15165_v27  ;;  %v14326_v25 = vld [vmem:[#allocation7 + $0x2ec] ss:$40 sps:$4 sm:$0xff]  }
 0x439   :  { %9710 = vmatprep.subr.bf16.mxu1 %v14245_v8  ;;  %9815 = vmatprep.subr.bf16.mxu0 %v14248_v42  ;;  %v14321_v8 = vld [vmem:[#allocation7 + $0x1820] ss:$40 sps:$4 sm:$0xff]  }
 0x43a   :  { %v14324_v42 = vld [vmem:[#allocation7 + $0x2e8] ss:$40 sps:$4 sm:$0xff]  }
 0x43b   :  { %9711 = vmatpush2.bf16.msra.mxu1 %v14243_v9  ;;  %v14329_v9 = vld [vmem:[#allocation7 + $0x17d4] ss:$40 sps:$4 sm:$0xff]  }
 0x43c   :  { %9816 = vmatpush1.bf16.msra.mxu0 %v14246_v52  ;;  %9712 = vmatprep.subr.bf16.mxu1 %v14251_v31  ;;  %v14332_v52 = vld [vmem:[#allocation7 + $0x29c] ss:$40 sps:$4 sm:$0xff]   ;;  %v14327_v31 = vld [vmem:[#allocation7 + $0x17d0] ss:$40 sps:$4 sm:$0xff]  }
 0x43d   :  { %9817 = vmatprep.subr.bf16.mxu0 %v14254_v32  ;;  %v14330_v32 = vld [vmem:[#allocation7 + $0x298] ss:$40 sps:$4 sm:$0xff]  }
 0x43f   :  { %9713 = vmatpush2.bf16.msra.mxu1 %v14249_v33  ;;  %v14335_v33 = vld [vmem:[#allocation7 + $0x1784] ss:$40 sps:$4 sm:$0xff]  }
 0x440   :  { %9818 = vmatpush1.bf16.msra.mxu0 %v14252_v34  ;;  %9714 = vmatprep.subr.bf16.mxu1 %v14257_v45  ;;  %v14338_v34 = vld [vmem:[#allocation7 + $0xc4c] ss:$40 sps:$4 sm:$0xff]   ;;  %v14333_v45 = vld [vmem:[#allocation7 + $0x1780] ss:$40 sps:$4 sm:$0xff]  }
 0x441   :  { %9819 = vmatprep.subr.bf16.mxu0 %v14260_v46  ;;  %v14336_v46 = vld [vmem:[#allocation7 + $0xc48] ss:$40 sps:$4 sm:$0xff]  }
 0x443   :  { %9715 = vmatpush2.bf16.msra.mxu1 %v14255_v47  ;;  %v14341_v47 = vld [vmem:[#allocation7 + $0x1734] ss:$40 sps:$4 sm:$0xff]  }
 0x444   :  { %9820 = vmatpush1.bf16.msra.mxu0 %v14258_v49  ;;  %9770 = vmatprep.subr.bf16.mxu1 %v14263_v28  ;;  %v14344_v49 = vld [vmem:[#allocation7 + $0xbfc] ss:$40 sps:$4 sm:$0xff]   ;;  %v14339_v28 = vld [vmem:[#allocation7 + $0x1730] ss:$40 sps:$4 sm:$0xff]  }
 0x445   :  { %9821 = vmatprep.subr.bf16.mxu0 %v14266_v51  ;;  %v14342_v51 = vld [vmem:[#allocation7 + $0xbf8] ss:$40 sps:$4 sm:$0xff]  }
 0x446   :  { %9717 = vmatmul.mubr.bf16.vlgmr.msra.gmra.mxu1 %v15175_v35 }
 0x447   :  { %9771 = vmatpush1.bf16.msra.mxu1 %v14261_v62  ;;  %9802 = vmatprep.mubr.bf16.mxu1 %v15233_v55  ;;  %v14347_v62 = vld [vmem:[#allocation7 + $0x16e4] ss:$40 sps:$4 sm:$0xff]  }
 0x448   :  { %9822 = vmatpush1.bf16.msra.mxu0 %v14264_v60  ;;  %9772 = vmatprep.subr.bf16.mxu1 %v14269_v4  ;;  %v14350_v60 = vld [vmem:[#allocation7 + $0xbac] ss:$40 sps:$4 sm:$0xff]   ;;  %v14345_v4 = vld [vmem:[#allocation7 + $0x16e0] ss:$40 sps:$4 sm:$0xff]  }
 0x449   :  { %9823 = vmatprep.subr.bf16.mxu0 %v14272_v12  ;;  %v14348_v12 = vld [vmem:[#allocation7 + $0xba8] ss:$40 sps:$4 sm:$0xff]  }
 0x44b   :  { %9773 = vmatpush1.bf16.msra.mxu1 %v14267_v61  ;;  %v14353_v61 = vld [vmem:[#allocation7 + $0x1694] ss:$40 sps:$4 sm:$0xff]  }
 0x44c   :  { %9824 = vmatpush1.bf16.msra.mxu0 %v14270_v30  ;;  %9774 = vmatprep.subr.bf16.mxu1 %v14275_v14  ;;  %v14356_v30 = vld [vmem:[#allocation7 + $0xb5c] ss:$40 sps:$4 sm:$0xff]   ;;  %v14351_v14 = vld [vmem:[#allocation7 + $0x1690] ss:$40 sps:$4 sm:$0xff]  }
 0x44d   :  { %9825 = vmatprep.subr.bf16.mxu0 %v14278_v63  ;;  %v14354_v63 = vld [vmem:[#allocation7 + $0xb58] ss:$40 sps:$4 sm:$0xff]  }
 0x44f   :  { %9775 = vmatpush1.bf16.msra.mxu1 %v14273_v48  ;;  %v14359_v48 = vld [vmem:[#allocation7 + $0x74c] ss:$40 sps:$4 sm:$0xff]  }
 0x450   :  { %9826 = vmatpush1.bf16.msra.mxu0 %v14276_v11  ;;  %9776 = vmatprep.subr.bf16.mxu1 %v14281_v13  ;;  %v14362_v11 = vld [vmem:[#allocation7 + $0xb0c] ss:$40 sps:$4 sm:$0xff]   ;;  %v14357_v13 = vld [vmem:[#allocation7 + $0x748] ss:$40 sps:$4 sm:$0xff]  }
 0x451   :  { %9827 = vmatprep.subr.bf16.mxu0 %v14284_v16  ;;  %v14360_v16 = vld [vmem:[#allocation7 + $0xb08] ss:$40 sps:$4 sm:$0xff]  }
 0x453   :  { %9777 = vmatpush1.bf16.msra.mxu1 %v14279_v53  ;;  %v14365_v53 = vld [vmem:[#allocation7 + $0x6fc] ss:$40 sps:$4 sm:$0xff]  }
 0x454   :  { %9828 = vmatpush1.bf16.msra.mxu0 %v14282_v20  ;;  %9778 = vmatprep.subr.bf16.mxu1 %v14287_v37  ;;  %v14368_v20 = vld [vmem:[#allocation7 + $0xabc] ss:$40 sps:$4 sm:$0xff]   ;;  %v14363_v37 = vld [vmem:[#allocation7 + $0x6f8] ss:$40 sps:$4 sm:$0xff]  }
 0x455   :  { %9829 = vmatprep.subr.bf16.mxu0 %v14290_v54  ;;  %v14366_v54 = vld [vmem:[#allocation7 + $0xab8] ss:$40 sps:$4 sm:$0xff]  }
 0x457   :  { %9779 = vmatpush1.bf16.msra.mxu1 %v14285_v10  ;;  %v14371_v10 = vld [vmem:[#allocation7 + $0x6ac] ss:$40 sps:$4 sm:$0xff]  }
 0x458   :  { %9830 = vmatpush2.bf16.msra.mxu0 %v14288_v19  ;;  %9780 = vmatprep.subr.bf16.mxu1 %v14293_v39  ;;  %v14374_v19 = vld [vmem:[#allocation7 + $0xa6c] ss:$40 sps:$4 sm:$0xff]   ;;  %v14369_v39 = vld [vmem:[#allocation7 + $0x6a8] ss:$40 sps:$4 sm:$0xff]  }
 0x459   :  { %9831 = vmatprep.subr.bf16.mxu0 %v14296_v43  ;;  %v14372_v43 = vld [vmem:[#allocation7 + $0xa68] ss:$40 sps:$4 sm:$0xff]  }
 0x45b   :  { %9781 = vmatpush1.bf16.msra.mxu1 %v14291_v1  ;;  %v14377_v1 = vld [vmem:[#allocation7 + $0x65c] ss:$40 sps:$4 sm:$0xff]  }
 0x45c   :  { %9832 = vmatpush2.bf16.msra.mxu0 %v14294_v5  ;;  %9782 = vmatprep.subr.bf16.mxu1 %v14299_v50  ;;  %v14380_v5 = vld [vmem:[#allocation7 + $0xa1c] ss:$40 sps:$4 sm:$0xff]   ;;  %v14375_v50 = vld [vmem:[#allocation7 + $0x658] ss:$40 sps:$4 sm:$0xff]  }
 0x45d   :  { %9833 = vmatprep.subr.bf16.mxu0 %v14302_v2  ;;  %v14378_v2 = vld [vmem:[#allocation7 + $0xa18] ss:$40 sps:$4 sm:$0xff]  }
 0x45f   :  { %9783 = vmatpush1.bf16.msra.mxu1 %v14297_v57  ;;  %v14383_v57 = vld [vmem:[#allocation7 + $0x60c] ss:$40 sps:$4 sm:$0xff]  }
 0x460   :  { %9834 = vmatpush2.bf16.msra.mxu0 %v14300_v58  ;;  %9784 = vmatprep.subr.bf16.mxu1 %v14305_v56  ;;  %v14386_v58 = vld [vmem:[#allocation7 + $0xecc] ss:$40 sps:$4 sm:$0xff]   ;;  %v14381_v56 = vld [vmem:[#allocation7 + $0x608] ss:$40 sps:$4 sm:$0xff]  }
 0x461   :  { %9835 = vmatprep.subr.bf16.mxu0 %v14308_v59  ;;  %v14384_v59 = vld [vmem:[#allocation7 + $0xec8] ss:$40 sps:$4 sm:$0xff]  }
 0x463   :  { %9785 = vmatpush1.bf16.msra.mxu1 %v14303_v21  ;;  %v14389_v21 = vld [vmem:[#allocation7 + $0x5bc] ss:$40 sps:$4 sm:$0xff]  }
 0x464   :  { %9836 = vmatpush2.bf16.msra.mxu0 %v14306_v7  ;;  %9786 = vmatprep.subr.bf16.mxu1 %v14311_v3  ;;  %v14392_v7 = vld [vmem:[#allocation7 + $0xe7c] ss:$40 sps:$4 sm:$0xff]   ;;  %v14387_v3 = vld [vmem:[#allocation7 + $0x5b8] ss:$40 sps:$4 sm:$0xff]  }
 0x465   :  { %9837 = vmatprep.subr.bf16.mxu0 %v14314_v29  ;;  %v14390_v29 = vld [vmem:[#allocation7 + $0xe78] ss:$40 sps:$4 sm:$0xff]  }
 0x467   :  { %9787 = vmatpush2.bf16.msra.mxu1 %v14309_v17  ;;  %v14395_v17 = vld [vmem:[#allocation7 + $0x56c] ss:$40 sps:$4 sm:$0xff]  }
 0x468   :  { %9838 = vmatpush2.bf16.msra.mxu0 %v14312_v15  ;;  %9788 = vmatprep.subr.bf16.mxu1 %v14317_v6  ;;  %v14398_v15 = vld [vmem:[#allocation7 + $0xe2c] ss:$40 sps:$4 sm:$0xff]   ;;  %v14393_v6 = vld [vmem:[#allocation7 + $0x568] ss:$40 sps:$4 sm:$0xff]  }
 0x469   :  { %9839 = vmatprep.subr.bf16.mxu0 %v14320_v38  ;;  %v14396_v38 = vld [vmem:[#allocation7 + $0xe28] ss:$40 sps:$4 sm:$0xff]  }
 0x46b   :  { %9789 = vmatpush2.bf16.msra.mxu1 %v14315_v22  ;;  %v14401_v22 = vld [vmem:[#allocation7 + $0x51c] ss:$40 sps:$4 sm:$0xff]  }
 0x46c   :  { %9840 = vmatpush2.bf16.msra.mxu0 %v14318_v23  ;;  %9790 = vmatprep.subr.bf16.mxu1 %v14323_v24  ;;  %v14404_v23 = vld [vmem:[#allocation7 + $0xddc] ss:$40 sps:$4 sm:$0xff]   ;;  %v14399_v24 = vld [vmem:[#allocation7 + $0x518] ss:$40 sps:$4 sm:$0xff]  }
 0x46d   :  { %9841 = vmatprep.subr.bf16.mxu0 %v14326_v25  ;;  %v14402_v25 = vld [vmem:[#allocation7 + $0xdd8] ss:$40 sps:$4 sm:$0xff]  }
 0x46f   :  { %9791 = vmatpush2.bf16.msra.mxu1 %v14321_v8  ;;  %v14407_v8 = vld [vmem:[#allocation7 + $0x9cc] ss:$40 sps:$4 sm:$0xff]  }
 0x470   :  { %9842 = vmatpush2.bf16.msra.mxu0 %v14324_v42  ;;  %9792 = vmatprep.subr.bf16.mxu1 %v14329_v9  ;;  %v14410_v42 = vld [vmem:[#allocation7 + $0xd8c] ss:$40 sps:$4 sm:$0xff]   ;;  %v14405_v9 = vld [vmem:[#allocation7 + $0x9c8] ss:$40 sps:$4 sm:$0xff]  }
 0x471   :  { %9843 = vmatprep.subr.bf16.mxu0 %v14332_v52  ;;  %v14408_v52 = vld [vmem:[#allocation7 + $0xd88] ss:$40 sps:$4 sm:$0xff]  }
 0x473   :  { %9793 = vmatpush2.bf16.msra.mxu1 %v14327_v31  ;;  %v14413_v31 = vld [vmem:[#allocation7 + $0x97c] ss:$40 sps:$4 sm:$0xff]  }
 0x474   :  { %9844 = vmatpush2.bf16.msra.mxu0 %v14330_v32  ;;  %9794 = vmatprep.subr.bf16.mxu1 %v14335_v33  ;;  %v14416_v32 = vld [vmem:[#allocation7 + $0xd3c] ss:$40 sps:$4 sm:$0xff]   ;;  %v14411_v33 = vld [vmem:[#allocation7 + $0x978] ss:$40 sps:$4 sm:$0xff]  }
 0x475   :  { %9899 = vmatprep.subr.bf16.mxu0 %v14338_v34  ;;  %v14414_v34 = vld [vmem:[#allocation7 + $0xd38] ss:$40 sps:$4 sm:$0xff]  }
 0x477   :  { %9795 = vmatpush2.bf16.msra.mxu1 %v14333_v45  ;;  %9846 = vmatmul.mubr.bf16.vlgmr.msra.gmra.mxu0 %v15096_v0  ;;  %v14419_v45 = vld [vmem:[#allocation7 + $0x92c] ss:$40 sps:$4 sm:$0xff]  }
 0x478   :  { %9900 = vmatpush1.bf16.msra.mxu0 %v14336_v46  ;;  %9931 = vmatprep.mubr.bf16.mxu0 %v15194_v40  ;;  %v14422_v46 = vld [vmem:[#allocation7 + $0xcec] ss:$40 sps:$4 sm:$0xff]  }
 0x479   :  { %9796 = vmatprep.subr.bf16.mxu1 %v14341_v47  ;;  %9901 = vmatprep.subr.bf16.mxu0 %v14344_v49  ;;  %v14417_v47 = vld [vmem:[#allocation7 + $0x928] ss:$40 sps:$4 sm:$0xff]  }
 0x47a   :  { %v14420_v49 = vld [vmem:[#allocation7 + $0xce8] ss:$40 sps:$4 sm:$0xff]  }
 0x47b   :  { %9797 = vmatpush2.bf16.msra.mxu1 %v14339_v28  ;;  %v14425_v28 = vld [vmem:[#allocation7 + $0x8dc] ss:$40 sps:$4 sm:$0xff]  }
 0x47c   :  { %9902 = vmatpush1.bf16.msra.mxu0 %v14342_v51  ;;  %9798 = vmatprep.subr.bf16.mxu1 %v14347_v62  ;;  %v14428_v51 = vld [vmem:[#allocation7 + $0xc9c] ss:$40 sps:$4 sm:$0xff]   ;;  %v14423_v62 = vld [vmem:[#allocation7 + $0x8d8] ss:$40 sps:$4 sm:$0xff]  }
 0x47d   :  { %9903 = vmatprep.subr.bf16.mxu0 %v14350_v60  ;;  %v14426_v60 = vld [vmem:[#allocation7 + $0xc98] ss:$40 sps:$4 sm:$0xff]  }
 0x47f   :  { %9799 = vmatpush2.bf16.msra.mxu1 %v14345_v4  ;;  %v14431_v4 = vld [vmem:[#allocation7 + $0x88c] ss:$40 sps:$4 sm:$0xff]  }
 0x480   :  { %9904 = vmatpush1.bf16.msra.mxu0 %v14348_v12  ;;  %9800 = vmatprep.subr.bf16.mxu1 %v14353_v61  ;;  %v14434_v12 = vld [vmem:[#allocation7 + $0x164c] ss:$40 sps:$4 sm:$0xff]   ;;  %v14429_v61 = vld [vmem:[#allocation7 + $0x888] ss:$40 sps:$4 sm:$0xff]  }
 0x481   :  { %9905 = vmatprep.subr.bf16.mxu0 %v14356_v30  ;;  %v14432_v30 = vld [vmem:[#allocation7 + $0x1648] ss:$40 sps:$4 sm:$0xff]  }
 0x483   :  { %9801 = vmatpush2.bf16.msra.mxu1 %v14351_v14  ;;  %v14437_v14 = vld [vmem:[#allocation7 + $0x83c] ss:$40 sps:$4 sm:$0xff]  }
 0x484   :  { %9906 = vmatpush1.bf16.msra.mxu0 %v14354_v63  ;;  %9856 = vmatprep.subr.bf16.mxu1 %v14359_v48  ;;  %v14440_v63 = vld [vmem:[#allocation7 + $0x15fc] ss:$40 sps:$4 sm:$0xff]   ;;  %v14435_v48 = vld [vmem:[#allocation7 + $0x838] ss:$40 sps:$4 sm:$0xff]  }
 0x485   :  { %9907 = vmatprep.subr.bf16.mxu0 %v14362_v11  ;;  %v14438_v11 = vld [vmem:[#allocation7 + $0x15f8] ss:$40 sps:$4 sm:$0xff]  }
 0x486   :  { %9803 = vmatmul.mubr.bf16.vlgmr.msra.gmra.mxu1 %v15235_v44 }
 0x487   :  { %9857 = vmatpush1.bf16.msra.mxu1 %v14357_v13  ;;  %9888 = vmatprep.mubr.bf16.mxu1 %v15185_v41  ;;  %v14443_v13 = vld [vmem:[#allocation7 + $0x7ec] ss:$40 sps:$4 sm:$0xff]  }
 0x488   :  { %9908 = vmatpush1.bf16.msra.mxu0 %v14360_v16  ;;  %9858 = vmatprep.subr.bf16.mxu1 %v14365_v53  ;;  %v14446_v16 = vld [vmem:[#allocation7 + $0x15ac] ss:$40 sps:$4 sm:$0xff]   ;;  %v14441_v53 = vld [vmem:[#allocation7 + $0x7e8] ss:$40 sps:$4 sm:$0xff]  }
 0x489   :  { %9909 = vmatprep.subr.bf16.mxu0 %v14368_v20  ;;  %v14444_v20 = vld [vmem:[#allocation7 + $0x15a8] ss:$40 sps:$4 sm:$0xff]  }
 0x48b   :  { %9859 = vmatpush1.bf16.msra.mxu1 %v14363_v37  ;;  %v14449_v37 = vld [vmem:[#allocation7 + $0x79c] ss:$40 sps:$4 sm:$0xff]  }
 0x48c   :  { %9910 = vmatpush1.bf16.msra.mxu0 %v14366_v54  ;;  %9860 = vmatprep.subr.bf16.mxu1 %v14371_v10  ;;  %v14452_v54 = vld [vmem:[#allocation7 + $0x155c] ss:$40 sps:$4 sm:$0xff]   ;;  %v14447_v10 = vld [vmem:[#allocation7 + $0x798] ss:$40 sps:$4 sm:$0xff]  }
 0x48d   :  { %9911 = vmatprep.subr.bf16.mxu0 %v14374_v19  ;;  %v14450_v19 = vld [vmem:[#allocation7 + $0x1558] ss:$40 sps:$4 sm:$0xff]  }
 0x48f   :  { %9861 = vmatpush1.bf16.msra.mxu1 %v14369_v39  ;;  %v14455_v39 = vld [vmem:[#allocation7 + $0x114c] ss:$40 sps:$4 sm:$0xff]  }
 0x490   :  { %9912 = vmatpush1.bf16.msra.mxu0 %v14372_v43  ;;  %9862 = vmatprep.subr.bf16.mxu1 %v14377_v1  ;;  %v14458_v43 = vld [vmem:[#allocation7 + $0x150c] ss:$40 sps:$4 sm:$0xff]   ;;  %v14453_v1 = vld [vmem:[#allocation7 + $0x1148] ss:$40 sps:$4 sm:$0xff]  }
 0x491   :  { %9913 = vmatprep.subr.bf16.mxu0 %v14380_v5  ;;  %v14456_v5 = vld [vmem:[#allocation7 + $0x1508] ss:$40 sps:$4 sm:$0xff]  }
 0x493   :  { %9863 = vmatpush1.bf16.msra.mxu1 %v14375_v50  ;;  %v14461_v50 = vld [vmem:[#allocation7 + $0x10fc] ss:$40 sps:$4 sm:$0xff]  }
 0x494   :  { %9914 = vmatpush1.bf16.msra.mxu0 %v14378_v2  ;;  %9864 = vmatprep.subr.bf16.mxu1 %v14383_v57  ;;  %v14464_v2 = vld [vmem:[#allocation7 + $0x14bc] ss:$40 sps:$4 sm:$0xff]   ;;  %v14459_v57 = vld [vmem:[#allocation7 + $0x10f8] ss:$40 sps:$4 sm:$0xff]  }
 0x495   :  { %9915 = vmatprep.subr.bf16.mxu0 %v14386_v58  ;;  %v14462_v58 = vld [vmem:[#allocation7 + $0x14b8] ss:$40 sps:$4 sm:$0xff]  }
 0x497   :  { %9865 = vmatpush1.bf16.msra.mxu1 %v14381_v56  ;;  %v14467_v56 = vld [vmem:[#allocation7 + $0x10ac] ss:$40 sps:$4 sm:$0xff]  }
 0x498   :  { %9916 = vmatpush2.bf16.msra.mxu0 %v14384_v59  ;;  %9866 = vmatprep.subr.bf16.mxu1 %v14389_v21  ;;  %v14470_v59 = vld [vmem:[#allocation7 + $0x146c] ss:$40 sps:$4 sm:$0xff]   ;;  %v14465_v21 = vld [vmem:[#allocation7 + $0x10a8] ss:$40 sps:$4 sm:$0xff]  }
 0x499   :  { %9917 = vmatprep.subr.bf16.mxu0 %v14392_v7  ;;  %v14468_v7 = vld [vmem:[#allocation7 + $0x1468] ss:$40 sps:$4 sm:$0xff]  }
 0x49b   :  { %9867 = vmatpush1.bf16.msra.mxu1 %v14387_v3  ;;  %v14473_v3 = vld [vmem:[#allocation7 + $0x105c] ss:$40 sps:$4 sm:$0xff]  }
 0x49c   :  { %9918 = vmatpush2.bf16.msra.mxu0 %v14390_v29  ;;  %9868 = vmatprep.subr.bf16.mxu1 %v14395_v17  ;;  %v14476_v29 = vld [vmem:[#allocation7 + $0x141c] ss:$40 sps:$4 sm:$0xff]   ;;  %v14471_v17 = vld [vmem:[#allocation7 + $0x1058] ss:$40 sps:$4 sm:$0xff]  }
 0x49d   :  { %9919 = vmatprep.subr.bf16.mxu0 %v14398_v15  ;;  %v14474_v15 = vld [vmem:[#allocation7 + $0x1418] ss:$40 sps:$4 sm:$0xff]  }
 0x49f   :  { %9869 = vmatpush1.bf16.msra.mxu1 %v14393_v6  ;;  %v14479_v6 = vld [vmem:[#allocation7 + $0x100c] ss:$40 sps:$4 sm:$0xff]  }
 0x4a0   :  { %9920 = vmatpush2.bf16.msra.mxu0 %v14396_v38  ;;  %9870 = vmatprep.subr.bf16.mxu1 %v14401_v22  ;;  %v14482_v38 = vld [vmem:[#allocation7 + $0x18cc] ss:$40 sps:$4 sm:$0xff]   ;;  %v14477_v22 = vld [vmem:[#allocation7 + $0x1008] ss:$40 sps:$4 sm:$0xff]  }
 0x4a1   :  { %9921 = vmatprep.subr.bf16.mxu0 %v14404_v23  ;;  %v14480_v23 = vld [vmem:[#allocation7 + $0x18c8] ss:$40 sps:$4 sm:$0xff]  }
 0x4a3   :  { %9871 = vmatpush1.bf16.msra.mxu1 %v14399_v24  ;;  %v14485_v24 = vld [vmem:[#allocation7 + $0xfbc] ss:$40 sps:$4 sm:$0xff]  }
 0x4a4   :  { %9922 = vmatpush2.bf16.msra.mxu0 %v14402_v25  ;;  %9872 = vmatprep.subr.bf16.mxu1 %v14407_v8  ;;  %v14488_v25 = vld [vmem:[#allocation7 + $0x187c] ss:$40 sps:$4 sm:$0xff]   ;;  %v14483_v8 = vld [vmem:[#allocation7 + $0xfb8] ss:$40 sps:$4 sm:$0xff]  }
 0x4a5   :  { %9923 = vmatprep.subr.bf16.mxu0 %v14410_v42  ;;  %v14486_v42 = vld [vmem:[#allocation7 + $0x1878] ss:$40 sps:$4 sm:$0xff]  }
 0x4a7   :  { %9873 = vmatpush2.bf16.msra.mxu1 %v14405_v9  ;;  %v14491_v9 = vld [vmem:[#allocation7 + $0xf6c] ss:$40 sps:$4 sm:$0xff]  }
 0x4a8   :  { %9924 = vmatpush2.bf16.msra.mxu0 %v14408_v52  ;;  %9874 = vmatprep.subr.bf16.mxu1 %v14413_v31  ;;  %v14494_v52 = vld [vmem:[#allocation7 + $0x182c] ss:$40 sps:$4 sm:$0xff]   ;;  %v14489_v31 = vld [vmem:[#allocation7 + $0xf68] ss:$40 sps:$4 sm:$0xff]  }
 0x4a9   :  { %9925 = vmatprep.subr.bf16.mxu0 %v14416_v32  ;;  %v14492_v32 = vld [vmem:[#allocation7 + $0x1828] ss:$40 sps:$4 sm:$0xff]  }
 0x4ab   :  { %9875 = vmatpush2.bf16.msra.mxu1 %v14411_v33  ;;  %v14497_v33 = vld [vmem:[#allocation7 + $0xf1c] ss:$40 sps:$4 sm:$0xff]  }
 0x4ac   :  { %9926 = vmatpush2.bf16.msra.mxu0 %v14414_v34  ;;  %9876 = vmatprep.subr.bf16.mxu1 %v14419_v45  ;;  %v14500_v34 = vld [vmem:[#allocation7 + $0x17dc] ss:$40 sps:$4 sm:$0xff]   ;;  %v14495_v45 = vld [vmem:[#allocation7 + $0xf18] ss:$40 sps:$4 sm:$0xff]  }
 0x4ad   :  { %9927 = vmatprep.subr.bf16.mxu0 %v14422_v46  ;;  %v14498_v46 = vld [vmem:[#allocation7 + $0x17d8] ss:$40 sps:$4 sm:$0xff]  }
 0x4af   :  { %9877 = vmatpush2.bf16.msra.mxu1 %v14417_v47  ;;  %v14503_v47 = vld [vmem:[#allocation7 + $0x13cc] ss:$40 sps:$4 sm:$0xff]  }
 0x4b0   :  { %9928 = vmatpush2.bf16.msra.mxu0 %v14420_v49  ;;  %9878 = vmatprep.subr.bf16.mxu1 %v14425_v28  ;;  %v14506_v49 = vld [vmem:[#allocation7 + $0x178c] ss:$40 sps:$4 sm:$0xff]   ;;  %v14501_v28 = vld [vmem:[#allocation7 + $0x13c8] ss:$40 sps:$4 sm:$0xff]  }
 0x4b1   :  { %9929 = vmatprep.subr.bf16.mxu0 %v14428_v51  ;;  %v14504_v51 = vld [vmem:[#allocation7 + $0x1788] ss:$40 sps:$4 sm:$0xff]  }
 0x4b3   :  { %9879 = vmatpush2.bf16.msra.mxu1 %v14423_v62  ;;  %v14509_v62 = vld [vmem:[#allocation7 + $0x137c] ss:$40 sps:$4 sm:$0xff]  }
 0x4b4   :  { %9930 = vmatpush2.bf16.msra.mxu0 %v14426_v60  ;;  %9880 = vmatprep.subr.bf16.mxu1 %v14431_v4  ;;  %v14512_v60 = vld [vmem:[#allocation7 + $0x173c] ss:$40 sps:$4 sm:$0xff]   ;;  %v14507_v4 = vld [vmem:[#allocation7 + $0x1378] ss:$40 sps:$4 sm:$0xff]  }
 0x4b5   :  { %9985 = vmatprep.subr.bf16.mxu0 %v14434_v12  ;;  %v14510_v12 = vld [vmem:[#allocation7 + $0x1738] ss:$40 sps:$4 sm:$0xff]  }
 0x4b7   :  { %9881 = vmatpush2.bf16.msra.mxu1 %v14429_v61  ;;  %9932 = vmatmul.mubr.bf16.vlgmr.msra.gmra.mxu0 %v15175_v35  ;;  %v14515_v61 = vld [vmem:[#allocation7 + $0x132c] ss:$40 sps:$4 sm:$0xff]  }
 0x4b8   :  { %9986 = vmatpush1.bf16.msra.mxu0 %v14432_v30  ;;  %10017 = vmatprep.mubr.bf16.mxu0 %v15233_v55  ;;  %v14518_v30 = vld [vmem:[#allocation7 + $0x16ec] ss:$40 sps:$4 sm:$0xff]  }
 0x4b9   :  { %9882 = vmatprep.subr.bf16.mxu1 %v14437_v14  ;;  %9987 = vmatprep.subr.bf16.mxu0 %v14440_v63  ;;  %v14513_v14 = vld [vmem:[#allocation7 + $0x1328] ss:$40 sps:$4 sm:$0xff]  }
 0x4ba   :  { %v14516_v63 = vld [vmem:[#allocation7 + $0x16e8] ss:$40 sps:$4 sm:$0xff]  }
 0x4bb   :  { %9883 = vmatpush2.bf16.msra.mxu1 %v14435_v48  ;;  %v14521_v48 = vld [vmem:[#allocation7 + $0x12dc] ss:$40 sps:$4 sm:$0xff]  }
 0x4bc   :  { %9988 = vmatpush1.bf16.msra.mxu0 %v14438_v11  ;;  %9884 = vmatprep.subr.bf16.mxu1 %v14443_v13  ;;  %v14524_v11 = vld [vmem:[#allocation7 + $0x169c] ss:$40 sps:$4 sm:$0xff]   ;;  %v14519_v13 = vld [vmem:[#allocation7 + $0x12d8] ss:$40 sps:$4 sm:$0xff]  }
 0x4bd   :  { %9989 = vmatprep.subr.bf16.mxu0 %v14446_v16  ;;  %v14522_v16 = vld [vmem:[#allocation7 + $0x1698] ss:$40 sps:$4 sm:$0xff]  }
 0x4bf   :  { %9885 = vmatpush2.bf16.msra.mxu1 %v14441_v53  ;;  %v14527_v53 = vld [vmem:[#allocation7 + $0x128c] ss:$40 sps:$4 sm:$0xff]  }
 0x4c0   :  { %9990 = vmatpush1.bf16.msra.mxu0 %v14444_v20  ;;  %9886 = vmatprep.subr.bf16.mxu1 %v14449_v37  ;;  %v14530_v20 = vld [vmem:[#allocation7 + $0x754] ss:$40 sps:$4 sm:$0xff]   ;;  %v14525_v37 = vld [vmem:[#allocation7 + $0x1288] ss:$40 sps:$4 sm:$0xff]  }
 0x4c1   :  { %9991 = vmatprep.subr.bf16.mxu0 %v14452_v54  ;;  %v14528_v54 = vld [vmem:[#allocation7 + $0x750] ss:$40 sps:$4 sm:$0xff]  }
 0x4c3   :  { %9887 = vmatpush2.bf16.msra.mxu1 %v14447_v10  ;;  %v14533_v10 = vld [vmem:[#allocation7 + $0x123c] ss:$40 sps:$4 sm:$0xff]  }
 0x4c4   :  { %9992 = vmatpush1.bf16.msra.mxu0 %v14450_v19  ;;  %9942 = vmatprep.subr.bf16.mxu1 %v14455_v39  ;;  %v14536_v19 = vld [vmem:[#allocation7 + $0x704] ss:$40 sps:$4 sm:$0xff]   ;;  %v14531_v39 = vld [vmem:[#allocation7 + $0x1238] ss:$40 sps:$4 sm:$0xff]  }
 0x4c5   :  { %9993 = vmatprep.subr.bf16.mxu0 %v14458_v43  ;;  %v14534_v43 = vld [vmem:[#allocation7 + $0x700] ss:$40 sps:$4 sm:$0xff]  }
 0x4c6   :  { %9889 = vmatmul.mubr.bf16.vlgmr.msra.gmra.mxu1 %v15132_v26 }
 0x4c7   :  { %9943 = vmatpush1.bf16.msra.mxu1 %v14453_v1  ;;  %9974 = vmatprep.mubr.bf16.mxu1 %v15215_v36  ;;  %v14539_v1 = vld [vmem:[#allocation7 + $0x11ec] ss:$40 sps:$4 sm:$0xff]  }
 0x4c8   :  { %9994 = vmatpush1.bf16.msra.mxu0 %v14456_v5  ;;  %9944 = vmatprep.subr.bf16.mxu1 %v14461_v50  ;;  %v14542_v5 = vld [vmem:[#allocation7 + $0x6b4] ss:$40 sps:$4 sm:$0xff]   ;;  %v14537_v50 = vld [vmem:[#allocation7 + $0x11e8] ss:$40 sps:$4 sm:$0xff]  }
 0x4c9   :  { %9995 = vmatprep.subr.bf16.mxu0 %v14464_v2  ;;  %v14540_v2 = vld [vmem:[#allocation7 + $0x6b0] ss:$40 sps:$4 sm:$0xff]  }
 0x4cb   :  { %9945 = vmatpush1.bf16.msra.mxu1 %v14459_v57  ;;  %v14545_v57 = vld [vmem:[#allocation7 + $0x119c] ss:$40 sps:$4 sm:$0xff]  }
 0x4cc   :  { %9996 = vmatpush1.bf16.msra.mxu0 %v14462_v58  ;;  %9946 = vmatprep.subr.bf16.mxu1 %v14467_v56  ;;  %v14548_v58 = vld [vmem:[#allocation7 + $0x664] ss:$40 sps:$4 sm:$0xff]   ;;  %v14543_v56 = vld [vmem:[#allocation7 + $0x1198] ss:$40 sps:$4 sm:$0xff]  }
 0x4cd   :  { %9997 = vmatprep.subr.bf16.mxu0 %v14470_v59  ;;  %v14546_v59 = vld [vmem:[#allocation7 + $0x660] ss:$40 sps:$4 sm:$0xff]  }
 0x4cf   :  { %9947 = vmatpush1.bf16.msra.mxu1 %v14465_v21  ;;  %v14551_v21 = vld [vmem:[#allocation7 + $0x254] ss:$40 sps:$4 sm:$0xff]  }
 0x4d0   :  { %9998 = vmatpush1.bf16.msra.mxu0 %v14468_v7  ;;  %9948 = vmatprep.subr.bf16.mxu1 %v14473_v3  ;;  %v14549_v7 = vld [vmem:[#allocation7 + $0x250] ss:$40 sps:$4 sm:$0xff]  }
 0x4d1   :  { %9999 = vmatprep.subr.bf16.mxu0 %v14476_v29  ;;  %v14552_v3 = vld [vmem:[#allocation7 + $0x610] ss:$40 sps:$4 sm:$0xff]   ;;  %v14557_v29 = vld [vmem:[#allocation7 + $0x204] ss:$40 sps:$4 sm:$0xff]  }
 0x4d3   :  { %9949 = vmatpush1.bf16.msra.mxu1 %v14471_v17  ;;  %v14560_v17 = vld [vmem:[#allocation7 + $0x5c4] ss:$40 sps:$4 sm:$0xff]  }
 0x4d4   :  { %10000 = vmatpush1.bf16.msra.mxu0 %v14474_v15  ;;  %9950 = vmatprep.subr.bf16.mxu1 %v14479_v6  ;;  %v14555_v15 = vld [vmem:[#allocation7 + $0x200] ss:$40 sps:$4 sm:$0xff]  }
 0x4d5   :  { %10001 = vmatprep.subr.bf16.mxu0 %v14482_v38  ;;  %v14558_v6 = vld [vmem:[#allocation7 + $0x5c0] ss:$40 sps:$4 sm:$0xff]   ;;  %v14563_v38 = vld [vmem:[#allocation7 + $0x1b4] ss:$40 sps:$4 sm:$0xff]  }
 0x4d7   :  { %9951 = vmatpush1.bf16.msra.mxu1 %v14477_v22  ;;  %v14566_v22 = vld [vmem:[#allocation7 + $0x574] ss:$40 sps:$4 sm:$0xff]  }
 0x4d8   :  { %10002 = vmatpush2.bf16.msra.mxu0 %v14480_v23  ;;  %9952 = vmatprep.subr.bf16.mxu1 %v14485_v24  ;;  %v14561_v23 = vld [vmem:[#allocation7 + $0x1b0] ss:$40 sps:$4 sm:$0xff]  }
 0x4d9   :  { %10003 = vmatprep.subr.bf16.mxu0 %v14488_v25  ;;  %v14564_v24 = vld [vmem:[#allocation7 + $0x570] ss:$40 sps:$4 sm:$0xff]   ;;  %v14569_v25 = vld [vmem:[#allocation7 + $0x164] ss:$40 sps:$4 sm:$0xff]  }
 0x4db   :  { %9953 = vmatpush1.bf16.msra.mxu1 %v14483_v8  ;;  %v14572_v8 = vld [vmem:[#allocation7 + $0x524] ss:$40 sps:$4 sm:$0xff]  }
 0x4dc   :  { %10004 = vmatpush2.bf16.msra.mxu0 %v14486_v42  ;;  %9954 = vmatprep.subr.bf16.mxu1 %v14491_v9  ;;  %v14567_v42 = vld [vmem:[#allocation7 + $0x160] ss:$40 sps:$4 sm:$0xff]   ;;  %v14575_v9 = vld [vmem:[#allocation7 + $0x114] ss:$40 sps:$4 sm:$0xff]  }
 0x4dd   :  { %10005 = vmatprep.subr.bf16.mxu0 %v14494_v52  ;;  %v14578_v52 = vld [vmem:[#allocation7 + $0x9d4] ss:$40 sps:$4 sm:$0xff]  }
 0x4df   :  { %9955 = vmatpush1.bf16.msra.mxu1 %v14489_v31  ;;  %v14573_v31 = vld [vmem:[#allocation7 + $0x110] ss:$40 sps:$4 sm:$0xff]  }
 0x4e0   :  { %10006 = vmatpush2.bf16.msra.mxu0 %v14492_v32  ;;  %9956 = vmatprep.subr.bf16.mxu1 %v14497_v33  ;;  %v14576_v32 = vld [vmem:[#allocation7 + $0x9d0] ss:$40 sps:$4 sm:$0xff]   ;;  %v14581_v33 = vld [vmem:[#allocation7 + $0xc4] ss:$40 sps:$4 sm:$0xff]  }
 0x4e1   :  { %10007 = vmatprep.subr.bf16.mxu0 %v14500_v34  ;;  %v14584_v34 = vld [vmem:[#allocation7 + $0x984] ss:$40 sps:$4 sm:$0xff]  }
 0x4e3   :  { %9957 = vmatpush1.bf16.msra.mxu1 %v14495_v45  ;;  %v14579_v45 = vld [vmem:[#allocation7 + $0xc0] ss:$40 sps:$4 sm:$0xff]  }
 0x4e4   :  { %10008 = vmatpush2.bf16.msra.mxu0 %v14498_v46  ;;  %9958 = vmatprep.subr.bf16.mxu1 %v14503_v47  ;;  %v14582_v46 = vld [vmem:[#allocation7 + $0x980] ss:$40 sps:$4 sm:$0xff]   ;;  %v14587_v47 = vld [vmem:[#allocation7 + $0x74] ss:$40 sps:$4 sm:$0xff]  }
 0x4e5   :  { %10009 = vmatprep.subr.bf16.mxu0 %v14506_v49  ;;  %v14590_v49 = vld [vmem:[#allocation7 + $0x934] ss:$40 sps:$4 sm:$0xff]  }
 0x4e7   :  { %9959 = vmatpush2.bf16.msra.mxu1 %v14501_v28  ;;  %v14585_v28 = vld [vmem:[#allocation7 + $0x70] ss:$40 sps:$4 sm:$0xff]  }
 0x4e8   :  { %10010 = vmatpush2.bf16.msra.mxu0 %v14504_v51  ;;  %9960 = vmatprep.subr.bf16.mxu1 %v14509_v62  ;;  %v14588_v51 = vld [vmem:[#allocation7 + $0x930] ss:$40 sps:$4 sm:$0xff]   ;;  %v14593_v62 = vld [vmem:[#allocation7 + $0x24] ss:$40 sps:$4 sm:$0xff]  }
 0x4e9   :  { %10011 = vmatprep.subr.bf16.mxu0 %v14512_v60  ;;  %v14596_v60 = vld [vmem:[#allocation7 + $0x8e4] ss:$40 sps:$4 sm:$0xff]  }
 0x4eb   :  { %9961 = vmatpush2.bf16.msra.mxu1 %v14507_v4  ;;  %v14591_v4 = vld [vmem:[#allocation7 + $0x20] ss:$40 sps:$4 sm:$0xff]  }
 0x4ec   :  { %10012 = vmatpush2.bf16.msra.mxu0 %v14510_v12  ;;  %9962 = vmatprep.subr.bf16.mxu1 %v14515_v61  ;;  %v14594_v12 = vld [vmem:[#allocation7 + $0x8e0] ss:$40 sps:$4 sm:$0xff]   ;;  %v14599_v61 = vld [vmem:[#allocation7 + $0x4d4] ss:$40 sps:$4 sm:$0xff]  }
 0x4ed   :  { %10013 = vmatprep.subr.bf16.mxu0 %v14518_v30  ;;  %v14602_v30 = vld [vmem:[#allocation7 + $0x894] ss:$40 sps:$4 sm:$0xff]  }
 0x4ef   :  { %9963 = vmatpush2.bf16.msra.mxu1 %v14513_v14  ;;  %v14597_v14 = vld [vmem:[#allocation7 + $0x4d0] ss:$40 sps:$4 sm:$0xff]  }
 0x4f0   :  { %10014 = vmatpush2.bf16.msra.mxu0 %v14516_v63  ;;  %9964 = vmatprep.subr.bf16.mxu1 %v14521_v48  ;;  %v14600_v63 = vld [vmem:[#allocation7 + $0x890] ss:$40 sps:$4 sm:$0xff]   ;;  %v14605_v48 = vld [vmem:[#allocation7 + $0x484] ss:$40 sps:$4 sm:$0xff]  }
 0x4f1   :  { %10015 = vmatprep.subr.bf16.mxu0 %v14524_v11  ;;  %v14608_v11 = vld [vmem:[#allocation7 + $0x844] ss:$40 sps:$4 sm:$0xff]  }
 0x4f3   :  { %9965 = vmatpush2.bf16.msra.mxu1 %v14519_v13  ;;  %v14603_v13 = vld [vmem:[#allocation7 + $0x480] ss:$40 sps:$4 sm:$0xff]  }
 0x4f4   :  { %10016 = vmatpush2.bf16.msra.mxu0 %v14522_v16  ;;  %9966 = vmatprep.subr.bf16.mxu1 %v14527_v53  ;;  %v14606_v16 = vld [vmem:[#allocation7 + $0x840] ss:$40 sps:$4 sm:$0xff]   ;;  %v14611_v53 = vld [vmem:[#allocation7 + $0x434] ss:$40 sps:$4 sm:$0xff]  }
 0x4f5   :  { %10071 = vmatprep.subr.bf16.mxu0 %v14530_v20  ;;  %v14614_v20 = vld [vmem:[#allocation7 + $0x7f4] ss:$40 sps:$4 sm:$0xff]  }
 0x4f7   :  { %9967 = vmatpush2.bf16.msra.mxu1 %v14525_v37  ;;  %10018 = vmatmul.mubr.bf16.vlgmr.msra.gmra.mxu0 %v15235_v44  ;;  %v14609_v37 = vld [vmem:[#allocation7 + $0x430] ss:$40 sps:$4 sm:$0xff]  }
 0x4f8   :  { %10072 = vmatpush1.bf16.msra.mxu0 %v14528_v54  ;;  %10103 = vmatprep.mubr.bf16.mxu0 %v15185_v41  ;;  %v14554_v41 = vld [vmem:[#allocation7 + $0x614] ss:$40 sps:$4 sm:$0xff]   ;;  %v14612_v54 = vld [vmem:[#allocation7 + $0x7f0] ss:$40 sps:$4 sm:$0xff]  }
 0x4f9   :  { %9968 = vmatprep.subr.bf16.mxu1 %v14533_v10  ;;  %10073 = vmatprep.subr.bf16.mxu0 %v14536_v19  ;;  %v14617_v10 = vld [vmem:[#allocation7 + $0x3e4] ss:$40 sps:$4 sm:$0xff]  }
 0x4fa   :  { %v14620_v19 = vld [vmem:[#allocation7 + $0x7a4] ss:$40 sps:$4 sm:$0xff]  }
 0x4fb   :  { %9969 = vmatpush2.bf16.msra.mxu1 %v14531_v39  ;;  %v14615_v39 = vld [vmem:[#allocation7 + $0x3e0] ss:$40 sps:$4 sm:$0xff]  }
 0x4fc   :  { %10074 = vmatpush1.bf16.msra.mxu0 %v14534_v43  ;;  %9970 = vmatprep.subr.bf16.mxu1 %v14539_v1  ;;  %v14618_v43 = vld [vmem:[#allocation7 + $0x7a0] ss:$40 sps:$4 sm:$0xff]   ;;  %v14623_v1 = vld [vmem:[#allocation7 + $0x394] ss:$40 sps:$4 sm:$0xff]  }
 0x4fd   :  { %10075 = vmatprep.subr.bf16.mxu0 %v14542_v5  ;;  %v14626_v5 = vld [vmem:[#allocation7 + $0x1154] ss:$40 sps:$4 sm:$0xff]  }
 0x4ff   :  { %9971 = vmatpush2.bf16.msra.mxu1 %v14537_v50  ;;  %v14621_v50 = vld [vmem:[#allocation7 + $0x390] ss:$40 sps:$4 sm:$0xff]  }
 0x500   :  { %10076 = vmatpush1.bf16.msra.mxu0 %v14540_v2  ;;  %9972 = vmatprep.subr.bf16.mxu1 %v14545_v57  ;;  %v14624_v2 = vld [vmem:[#allocation7 + $0x1150] ss:$40 sps:$4 sm:$0xff]   ;;  %v14629_v57 = vld [vmem:[#allocation7 + $0x344] ss:$40 sps:$4 sm:$0xff]  }
 0x501   :  { %10077 = vmatprep.subr.bf16.mxu0 %v14548_v58  ;;  %v14632_v58 = vld [vmem:[#allocation7 + $0x1104] ss:$40 sps:$4 sm:$0xff]  }
 0x503   :  { %9973 = vmatpush2.bf16.msra.mxu1 %v14543_v56  ;;  %v14627_v56 = vld [vmem:[#allocation7 + $0x340] ss:$40 sps:$4 sm:$0xff]  }
 0x504   :  { %10078 = vmatpush1.bf16.msra.mxu0 %v14546_v59  ;;  %10028 = vmatprep.subr.bf16.mxu1 %v14551_v21  ;;  %v14630_v59 = vld [vmem:[#allocation7 + $0x1100] ss:$40 sps:$4 sm:$0xff]   ;;  %v14635_v21 = vld [vmem:[#allocation7 + $0x2f4] ss:$40 sps:$4 sm:$0xff]  }
 0x505   :  { %10079 = vmatprep.subr.bf16.mxu0 %v14554_v41  ;;  %v14638_v41 = vld [vmem:[#allocation7 + $0x10b4] ss:$40 sps:$4 sm:$0xff]  }
 0x506   :  { %9975 = vmatmul.mubr.bf16.vlgmr.msra.gmra.mxu1 %v15227_v18 }
 0x507   :  { %10029 = vmatpush1.bf16.msra.mxu1 %v14549_v7  ;;  %10060 = vmatprep.mubr.bf16.mxu1 %v15165_v27  ;;  %v14570_v27 = vld [vmem:[#allocation7 + $0x520] ss:$40 sps:$4 sm:$0xff]   ;;  %v14633_v7 = vld [vmem:[#allocation7 + $0x2f0] ss:$40 sps:$4 sm:$0xff]  }
 0x508   :  { %10080 = vmatpush1.bf16.msra.mxu0 %v14552_v3  ;;  %10030 = vmatprep.subr.bf16.mxu1 %v14557_v29  ;;  %v14636_v3 = vld [vmem:[#allocation7 + $0x10b0] ss:$40 sps:$4 sm:$0xff]   ;;  %v14641_v29 = vld [vmem:[#allocation7 + $0x2a4] ss:$40 sps:$4 sm:$0xff]  }
 0x509   :  { %10081 = vmatprep.subr.bf16.mxu0 %v14560_v17  ;;  %v14644_v17 = vld [vmem:[#allocation7 + $0x1064] ss:$40 sps:$4 sm:$0xff]  }
 0x50b   :  { %10031 = vmatpush1.bf16.msra.mxu1 %v14555_v15  ;;  %v14639_v15 = vld [vmem:[#allocation7 + $0x2a0] ss:$40 sps:$4 sm:$0xff]  }
 0x50c   :  { %10082 = vmatpush1.bf16.msra.mxu0 %v14558_v6  ;;  %10032 = vmatprep.subr.bf16.mxu1 %v14563_v38  ;;  %v14647_v6 = vld [vmem:[#allocation7 + $0xc54] ss:$40 sps:$4 sm:$0xff]   ;;  %v15270_v38 = vpop.f32.mrf.mxu1 }
 0x50d   :  { %10083 = vmatprep.subr.bf16.mxu0 %v14566_v22  ;;  %v14645_v22 = vld [vmem:[#allocation7 + $0xc50] ss:$40 sps:$4 sm:$0xff]  }
 0x50f   :  { %10033 = vmatpush1.bf16.msra.mxu1 %v14561_v23  ;;  %v15272_v23 = vpop.f32.mrf.mxu0 }
 0x510   :  { %10084 = vmatpush1.bf16.msra.mxu0 %v14564_v24  ;;  %10034 = vmatprep.subr.bf16.mxu1 %v14569_v25  ;;  %v14648_v24 = vld [vmem:[#allocation7 + $0x1010] ss:$40 sps:$4 sm:$0xff]   ;;  %v14653_v25 = vld [vmem:[#allocation7 + $0xc04] ss:$40 sps:$4 sm:$0xff]  }
 0x511   :  { %10085 = vmatprep.subr.bf16.mxu0 %v14572_v8  ;;  %v14656_v8 = vld [vmem:[#allocation7 + $0xfc4] ss:$40 sps:$4 sm:$0xff]  }
 0x513   :  { %10035 = vmatpush1.bf16.msra.mxu1 %v14567_v42  ;;  %v15275_v42 = vpop.f32.mrf.mxu1 }
 0x514   :  { %10086 = vmatpush1.bf16.msra.mxu0 %v14570_v27  ;;  %10036 = vmatprep.subr.bf16.mxu1 %v14575_v9  ;;  %v14651_v27 = vld [vmem:[#allocation7 + $0xc00] ss:$40 sps:$4 sm:$0xff]   ;;  %v15278_v9 = vpop.f32.mrf.mxu0 }
 0x515   :  { %10087 = vmatprep.subr.bf16.mxu0 %v14578_v52  ;;  %v14654_v52 = vld [vmem:[#allocation7 + $0xfc0] ss:$40 sps:$4 sm:$0xff]  }
 0x517   :  { %10037 = vmatpush1.bf16.msra.mxu1 %v14573_v31  ;;  %v14659_v31 = vld [vmem:[#allocation7 + $0xbb4] ss:$40 sps:$4 sm:$0xff]  }
 0x518   :  { %10088 = vmatpush2.bf16.msra.mxu0 %v14576_v32  ;;  %10038 = vmatprep.subr.bf16.mxu1 %v14581_v33  ;;  %v14662_v32 = vld [vmem:[#allocation7 + $0xf74] ss:$40 sps:$4 sm:$0xff]   ;;  %v15280_v33 = vpop.f32.mrf.mxu1 }
 0x519   :  { %10089 = vmatprep.subr.bf16.mxu0 %v14584_v34  ;;  %v14657_v34 = vld [vmem:[#allocation7 + $0xbb0] ss:$40 sps:$4 sm:$0xff]  }
 0x51b   :  { %10039 = vmatpush1.bf16.msra.mxu1 %v14579_v45  ;;  %v15282_v45 = vpop.f32.mrf.mxu0 }
 0x51c   :  { %10090 = vmatpush2.bf16.msra.mxu0 %v14582_v46  ;;  %10040 = vmatprep.subr.bf16.mxu1 %v14587_v47  ;;  %v14665_v46 = vld [vmem:[#allocation7 + $0xb64] ss:$40 sps:$4 sm:$0xff]   ;;  %v15284_v47 = vpop.f32.mrf.mxu1 }
 0x51d   :  { %10091 = vmatprep.subr.bf16.mxu0 %v14590_v49  ;;  %v14663_v49 = vld [vmem:[#allocation7 + $0xb60] ss:$40 sps:$4 sm:$0xff]  }
 0x51f   :  { %10041 = vmatpush1.bf16.msra.mxu1 %v14585_v28  ;;  %v9251_v28 = vpop.f32.mrf.mxu0 }
 0x520   :  { %10092 = vmatpush2.bf16.msra.mxu0 %v14588_v51  ;;  %10042 = vmatprep.subr.bf16.mxu1 %v14593_v62  ;;  %v14666_v51 = vld [vmem:[#allocation7 + $0xf20] ss:$40 sps:$4 sm:$0xff]   ;;  %v14671_v62 = vld [vmem:[#allocation7 + $0xb14] ss:$40 sps:$4 sm:$0xff]  }
 0x521   :  { %10093 = vmatprep.subr.bf16.mxu0 %v14596_v60  ;;  %v15286_v60 = vpop.f32.mrf.mxu1 }
 0x523   :  { %10043 = vmatpush1.bf16.msra.mxu1 %v14591_v4  ;;  %v14674_v4 = vld [vmem:[#allocation7 + $0x13d4] ss:$40 sps:$4 sm:$0xff]  }
 0x524   :  { %10094 = vmatpush2.bf16.msra.mxu0 %v14594_v12  ;;  %10044 = vmatprep.subr.bf16.mxu1 %v14599_v61  ;;  %v15288_v12 = vpop.f32.mrf.mxu0  ;;  %v14669_v61 = vld [vmem:[#allocation7 + $0xb10] ss:$40 sps:$4 sm:$0xff]  }
 0x525   :  { %10095 = vmatprep.subr.bf16.mxu0 %v14602_v30  ;;  %v14672_v30 = vld [vmem:[#allocation7 + $0x13d0] ss:$40 sps:$4 sm:$0xff]  }
 0x527   :  { %10045 = vmatpush2.bf16.msra.mxu1 %v14597_v14  ;;  %v14677_v14 = vld [vmem:[#allocation7 + $0xac4] ss:$40 sps:$4 sm:$0xff]  }
 0x528   :  { %10096 = vmatpush2.bf16.msra.mxu0 %v14600_v63  ;;  %10046 = vmatprep.subr.bf16.mxu1 %v14605_v48  ;;  %v9290_v63 = vpop.f32.mrf.mxu1  ;;  %v14680_v48 = vld [vmem:[#allocation7 + $0x1384] ss:$40 sps:$4 sm:$0xff]  }
 0x529   :  { %10097 = vmatprep.subr.bf16.mxu0 %v14608_v11  ;;  %v15290_v11 = vpop.f32.mrf.mxu0 }
 0x52b   :  { %10047 = vmatpush2.bf16.msra.mxu1 %v14603_v13  ;;  %v14675_v13 = vld [vmem:[#allocation7 + $0xac0] ss:$40 sps:$4 sm:$0xff]  }
 0x52c   :  { %10098 = vmatpush2.bf16.msra.mxu0 %v14606_v16  ;;  %10048 = vmatprep.subr.bf16.mxu1 %v14611_v53  ;;  %v14678_v16 = vld [vmem:[#allocation7 + $0x1380] ss:$40 sps:$4 sm:$0xff]   ;;  %v14683_v53 = vld [vmem:[#allocation7 + $0xa74] ss:$40 sps:$4 sm:$0xff]  }
 0x52d   :  { %10099 = vmatprep.subr.bf16.mxu0 %v14614_v20  ;;  %v15292_v20 = vpop.f32.mrf.mxu1 }
 0x52f   :  { %10049 = vmatpush2.bf16.msra.mxu1 %v14609_v37  ;;  %v14686_v37 = vld [vmem:[#allocation7 + $0x1334] ss:$40 sps:$4 sm:$0xff]  }
 0x530   :  { %10100 = vmatpush2.bf16.msra.mxu0 %v14612_v54  ;;  %10050 = vmatprep.subr.bf16.mxu1 %v14617_v10  ;;  %v15294_v54 = vpop.f32.mrf.mxu0  ;;  %v14681_v10 = vld [vmem:[#allocation7 + $0xa70] ss:$40 sps:$4 sm:$0xff]  }
 0x531   :  { %10101 = vmatprep.subr.bf16.mxu0 %v14620_v19  ;;  %v14684_v19 = vld [vmem:[#allocation7 + $0x1330] ss:$40 sps:$4 sm:$0xff]  }
 0x533   :  { %10051 = vmatpush2.bf16.msra.mxu1 %v14615_v39  ;;  %v14689_v39 = vld [vmem:[#allocation7 + $0xa24] ss:$40 sps:$4 sm:$0xff]  }
 0x534   :  { %10102 = vmatpush2.bf16.msra.mxu0 %v14618_v43  ;;  %10052 = vmatprep.subr.bf16.mxu1 %v14623_v1  ;;  %v9294_v43 = vpop.f32.mrf.mxu1  ;;  %v14692_v1 = vld [vmem:[#allocation7 + $0x12e4] ss:$40 sps:$4 sm:$0xff]  }
 0x535   :  { %10157 = vmatprep.subr.bf16.mxu0 %v14626_v5  ;;  %v9337_v5 = vpop.f32.mrf.mxu0 }
 0x537   :  { %10053 = vmatpush2.bf16.msra.mxu1 %v14621_v50  ;;  %10104 = vmatmul.mubr.bf16.vlgmr.msra.gmra.mxu0 %v15132_v26  ;;  %v14642_v26 = vld [vmem:[#allocation7 + $0x1060] ss:$40 sps:$4 sm:$0xff]   ;;  %v15296_v50 = vpop.f32.mrf.mxu1 }
 0x538   :  { %10158 = vmatpush1.bf16.msra.mxu0 %v14624_v2  ;;  %10189 = vmatprep.mubr.bf16.mxu0 %v15215_v36  ;;  %v14650_v36 = vld [vmem:[#allocation7 + $0x1014] ss:$40 sps:$4 sm:$0xff]   ;;  %v14687_v2 = vld [vmem:[#allocation7 + $0xa20] ss:$40 sps:$4 sm:$0xff]  }
 0x539   :  { %10054 = vmatprep.subr.bf16.mxu1 %v14629_v57  ;;  %10159 = vmatprep.subr.bf16.mxu0 %v14632_v58  ;;  %v15298_v57 = vpop.f32.mrf.mxu0  ;;  %v14690_v58 = vld [vmem:[#allocation7 + $0x12e0] ss:$40 sps:$4 sm:$0xff]  }
 0x53b   :  { %10055 = vmatpush2.bf16.msra.mxu1 %v14627_v56  ;;  %v14695_v56 = vld [vmem:[#allocation7 + $0xed4] ss:$40 sps:$4 sm:$0xff]  }
 0x53c   :  { %10160 = vmatpush1.bf16.msra.mxu0 %v14630_v59  ;;  %10056 = vmatprep.subr.bf16.mxu1 %v14635_v21  ;;  %v14698_v59 = vld [vmem:[#allocation7 + $0x1294] ss:$40 sps:$4 sm:$0xff]   ;;  %v9376_v21 = vpop.f32.mrf.mxu1 }
 0x53d   :  { %10161 = vmatprep.subr.bf16.mxu0 %v14638_v41  ;;  %v14693_v41 = vld [vmem:[#allocation7 + $0xed0] ss:$40 sps:$4 sm:$0xff]  }
 0x53f   :  { %10057 = vmatpush2.bf16.msra.mxu1 %v14633_v7  ;;  %v15300_v7 = vpop.f32.mrf.mxu0 }
 0x540   :  { %10162 = vmatpush1.bf16.msra.mxu0 %v14636_v3  ;;  %10058 = vmatprep.subr.bf16.mxu1 %v14641_v29  ;;  %v14696_v3 = vld [vmem:[#allocation7 + $0x1290] ss:$40 sps:$4 sm:$0xff]   ;;  %v14701_v29 = vld [vmem:[#allocation7 + $0xe84] ss:$40 sps:$4 sm:$0xff]  }
 0x541   :  { %10163 = vmatprep.subr.bf16.mxu0 %v14644_v17  ;;  %v14704_v17 = vld [vmem:[#allocation7 + $0x1244] ss:$40 sps:$4 sm:$0xff]  }
 0x543   :  { %10059 = vmatpush2.bf16.msra.mxu1 %v14639_v15  ;;  %v15302_v15 = vpop.f32.mrf.mxu1 }
 0x544   :  { %10164 = vmatpush1.bf16.msra.mxu0 %v14642_v26  ;;  %10114 = vmatprep.subr.bf16.mxu1 %v14647_v6  ;;  %v14699_v26 = vld [vmem:[#allocation7 + $0xe80] ss:$40 sps:$4 sm:$0xff]   ;;  %v9252_v6 = vadd.f32 %v9251_v28, %v15284_v47 }
 0x545   :  { %10165 = vmatprep.subr.bf16.mxu0 %v14650_v36  ;;  %v15305_v36 = vpop.f32.mrf.mxu0 }
 0x546   :  { %10061 = vmatmul.mubr.bf16.vlgmr.msra.gmra.mxu1 %v15096_v0  ;;  %v14660_v0 = vld [vmem:[#allocation7 + $0xf70] ss:$40 sps:$4 sm:$0xff]  }
 0x547   :  { %10115 = vmatpush1.bf16.msra.mxu1 %v14645_v22  ;;  %10146 = vmatprep.mubr.bf16.mxu1 %v15194_v40  ;;  %v14668_v40 = vld [vmem:[#allocation7 + $0xf24] ss:$40 sps:$4 sm:$0xff]   ;;  %v14702_v22 = vld [vmem:[#allocation7 + $0x1240] ss:$40 sps:$4 sm:$0xff]  }
 0x548   :  { %10166 = vmatpush1.bf16.msra.mxu0 %v14648_v24  ;;  %10116 = vmatprep.subr.bf16.mxu1 %v14653_v25  ;;  %v14707_v24 = vld [vmem:[#allocation7 + $0xe34] ss:$40 sps:$4 sm:$0xff]  }
 0x549   :  { %10167 = vmatprep.subr.bf16.mxu0 %v14656_v8  ;;  %v14710_v25 = vld [vmem:[#allocation7 + $0x11f4] ss:$40 sps:$4 sm:$0xff]   ;;  %v9248_v8 = vadd.f32 %v15278_v9, %v15275_v42  ;;  %v14711_v9 = vld [vmem:[#allocation7 + $0xde0] ss:$40 sps:$4 sm:$0xff]  }
 0x54b   :  { %10117 = vmatpush1.bf16.msra.mxu1 %v14651_v27  ;;  %v9295_v27 = vadd.f32 %v9294_v43, %v9252_v6  ;;  %v14722_v43 = vld [vmem:[#allocation7 + $0xd40] ss:$40 sps:$4 sm:$0xff]  }
 0x54c   :  { %10168 = vmatpush1.bf16.msra.mxu0 %v14654_v52  ;;  %10118 = vmatprep.subr.bf16.mxu1 %v14659_v31  ;;  %v9380_v52 = vpop.f32.mrf.mxu1  ;;  %v14705_v31 = vld [vmem:[#allocation7 + $0xe30] ss:$40 sps:$4 sm:$0xff]  }
 0x54d   :  { %10169 = vmatprep.subr.bf16.mxu0 %v14662_v32  ;;  %v9291_v32 = vadd.f32 %v9290_v63, %v9248_v8 }
 0x54e   :  { %v15311_v47 = vpop.f32.mrf.mxu1 }
 0x54f   :  { %10119 = vmatpush1.bf16.msra.mxu1 %v14657_v34  ;;  %v9338_v34 = vadd.f32 %v9337_v5, %v9295_v27  ;;  %v9334_v28 = vadd.f32 %v15290_v11, %v9291_v32  ;;  %v14721_v11 = vld [vmem:[#allocation8 + $0x38] sm:$0xff]  }
 0x550   :  { %10170 = vmatpush1.bf16.msra.mxu0 %v14660_v0  ;;  %10120 = vmatprep.subr.bf16.mxu1 %v14665_v46  ;;  %v15309_v0 = vpop.f32.mrf.mxu0  ;;  %v14708_v46 = vld [vmem:[#allocation7 + $0x11f0] ss:$40 sps:$4 sm:$0xff]   ;;  %v14729_v5 = vld [vmem:[#allocation7 + $0xcf4] ss:$40 sps:$4 sm:$0xff]  }
 0x551   :  { %10171 = vmatprep.subr.bf16.mxu0 %v14668_v40  ;;  %v14713_v40 = vld [vmem:[#allocation7 + $0xde4] ss:$40 sps:$4 sm:$0xff]   ;;  %v14737_v27 = vld [vmem:[#allocation7 + $0x1650] ss:$40 sps:$4 sm:$0xff]  }
 0x552   :  { %v15314_v42 = vpop.f32.mrf.mxu0  ;;  %v14741_v32 = vld [vmem:[#allocation8 + $0x18] sm:$0xff]  }
 0x553   :  { %10121 = vmatpush1.bf16.msra.mxu1 %v14663_v49  ;;  %v14716_v49 = vld [vmem:[#allocation7 + $0x11a4] ss:$40 sps:$4 sm:$0xff]  }
 0x554   :  { %10172 = vmatpush1.bf16.msra.mxu0 %v14666_v51  ;;  %10122 = vmatprep.subr.bf16.mxu1 %v14671_v62  ;;  %v9381_v51 = vadd.f32 %v9380_v52, %v9338_v34  ;;  %v9377_v62 = vadd.f32 %v9376_v21, %v9334_v28  ;;  %v14727_v21 = vld [vmem:[#allocation7 + $0xcf0] ss:$40 sps:$4 sm:$0xff]   ;;  %v14744_v34 = vld [vmem:[#allocation7 + $0x1604] ss:$40 sps:$4 sm:$0xff]  }
 0x555   :  { %10173 = vmatprep.subr.bf16.mxu0 %v14674_v4  ;;  %v14714_v4 = vld [vmem:[#allocation7 + $0x11a0] ss:$40 sps:$4 sm:$0xff]  }
 0x556   :  { %v10254_v63 = vmax.f32 %v9381_v51, 0.0 }
 0x557   :  { %10123 = vmatpush1.bf16.msra.mxu1 %v14669_v61  ;;  %v14719_v61 = vld [vmem:[#allocation7 + $0xd94] ss:$40 sps:$4 sm:$0xff]  }
 0x558   :  { %10174 = vmatpush2.bf16.msra.mxu0 %v14672_v30  ;;  %10124 = vmatprep.subr.bf16.mxu1 %v14677_v14  ;;  %v9462_v30 = vpop.f32.mrf.mxu1  ;;  %v14720_v14 = vld [vmem:[#allocation8 + $0x78] sm:$0xff]  }
 0x559   :  { %10175 = vmatprep.subr.bf16.mxu0 %v14680_v48  ;;  %v15316_v48 = vpop.f32.mrf.mxu0 }
 0x55b   :  { %10125 = vmatpush1.bf16.msra.mxu1 %v14675_v13  ;;  %v14717_v13 = vld [vmem:[#allocation7 + $0xd90] ss:$40 sps:$4 sm:$0xff]  }
 0x55c   :  { %10176 = vmatpush2.bf16.msra.mxu0 %v14678_v16  ;;  %10126 = vmatprep.subr.bf16.mxu1 %v14683_v53  ;;  %v10244_v16 = vmax.f32 %v9377_v62, 0.0  ;;  %v15318_v53 = vpop.f32.mrf.mxu1  ;;  %v14746_v62 = vld [vmem:[#allocation8 + $0x10] sm:$0xff]  }
 0x55d   :  { %10177 = vmatprep.subr.bf16.mxu0 %v14686_v37  ;;  %v14724_v37 = vld [vmem:[#allocation7 + $0xd44] ss:$40 sps:$4 sm:$0xff]  }
 0x55f   :  { %10127 = vmatpush1.bf16.msra.mxu1 %v14681_v10  ;;  %v14725_v10 = vld [vmem:[#allocation8 + $0x70] sm:$0xff]  }
 0x560   :  { %10178 = vmatpush2.bf16.msra.mxu0 %v14684_v19  ;;  %10128 = vmatprep.subr.bf16.mxu1 %v14689_v39  ;;  %v10264_v19 = vpack.c.bf16 %v10254_v63, %v10244_v16  ;;  %v15320_v39 = vpop.f32.mrf.mxu0  ;;  %v14747_v63 = vld [vmem:[#allocation7 + $0x15b0] ss:$40 sps:$4 sm:$0xff]   ;;  %v14751_v16 = vld [vmem:[#allocation8 + $0x8] sm:$0xff]  }
 0x561   :  { %10179 = vmatprep.subr.bf16.mxu0 %v14692_v1  ;;  %v14726_v1 = vld [vmem:[#allocation8 + $0x30] sm:$0xff]  }
 0x563   :  { %10129 = vmatpush1.bf16.msra.mxu1 %v14687_v2  ;;  %v9466_v2 = vpop.f32.mrf.mxu1 }
 0x564   :  { %10180 = vmatpush2.bf16.msra.mxu0 %v14690_v58  ;;  %10130 = vmatprep.subr.bf16.mxu1 %v14695_v56  ;;  %v14730_v58 = vld [vmem:[#allocation8 + $0x68] sm:$0xff]   ;;  %v9509_v56 = vpop.f32.mrf.mxu0  ;;  %v9467_v52 = vadd.f32 %v9466_v2, %v15309_v0 }
 0x565   :  { %10181 = vmatprep.subr.bf16.mxu0 %v14698_v59  ;;  %v15323_v59 = vpop.f32.mrf.mxu1  ;;  %v14742_v0 = vld [vmem:[#allocation7 + $0x1600] ss:$40 sps:$4 sm:$0xff]  }
 0x567   :  { %10131 = vmatpush2.bf16.msra.mxu1 %v14693_v41  ;;  %v15325_v41 = vpop.f32.mrf.mxu0 }
 0x568   :  { %10182 = vmatpush2.bf16.msra.mxu0 %v14696_v3  ;;  %10132 = vmatprep.subr.bf16.mxu1 %v14701_v29  ;;  %v14731_v3 = vld [vmem:[#allocation8 + $0x28] sm:$0xff]   ;;  %v14735_v29 = vld [vmem:[#allocation8 + $0x60] sm:$0xff]  }
 0x569   :  { %10183 = vmatprep.subr.bf16.mxu0 %v14704_v17  ;;  %v9548_v17 = vpop.f32.mrf.mxu1  ;;  %v9591_v6 = vpop.f32.mrf.mxu0 }
 0x56b   :  { %10133 = vmatpush2.bf16.msra.mxu1 %v14699_v26  ;;  %v14732_v26 = vld [vmem:[#allocation7 + $0xca0] ss:$40 sps:$4 sm:$0xff]   ;;  %v15327_v8 = vpop.f32.mrf.mxu1 }
 0x56c   :  { %10184 = vmatpush2.bf16.msra.mxu0 %v14702_v22  ;;  %10134 = vmatprep.subr.bf16.mxu1 %v14707_v24  ;;  %v14736_v22 = vld [vmem:[#allocation8 + $0x20] sm:$0xff]   ;;  %v14739_v24 = vld [vmem:[#allocation7 + $0x1654] ss:$40 sps:$4 sm:$0xff]  }
 0x56d   :  { %10185 = vmatprep.subr.bf16.mxu0 %v14710_v25  ;;  %v14740_v25 = vld [vmem:[#allocation8 + $0x58] sm:$0xff]   ;;  %v9552_v28 = vpop.f32.mrf.mxu1 }
 0x56f   :  { %10135 = vmatpush2.bf16.msra.mxu1 %v14705_v31  ;;  %v15330_v31 = vpop.f32.mrf.mxu0 }
 0x570   :  { %10186 = vmatpush2.bf16.msra.mxu0 %v14708_v46  ;;  %10136 = vmatprep.subr.bf16.mxu1 %v14713_v40  ;;  %v14745_v46 = vld [vmem:[#allocation8 + $0x50] sm:$0xff]   ;;  %v9463_v40 = vadd.f32 %v9462_v30, %v15300_v7 }
 0x571   :  { %10187 = vmatprep.subr.bf16.mxu0 %v14716_v49  ;;  %v9250_v49 = vadd.f32 %v15282_v45, %v15280_v33  ;;  %v9595_v51 = vpop.f32.mrf.mxu0 }
 0x572   :  { %v9506_v33 = vadd.f32 %v15316_v48, %v9463_v40  ;;  %v14755_v48 = vld [vmem:[#allocation8 + $0x40] sm:$0xff]  }
 0x573   :  { %10137 = vmatpush2.bf16.msra.mxu1 %v14711_v9  ;;  %v9510_v9 = vadd.f32 %v9509_v56, %v9467_v52  ;;  %v9293_v7 = vadd.f32 %v15292_v20, %v9250_v49  ;;  %v15341_v30 = vpop.f32.mrf.mxu0  ;;  %v14769_v52 = vld [vmem:[#allocation7 + $0x1474] ss:$40 sps:$4 sm:$0xff]  }
 0x574   :  { %10188 = vmatpush2.bf16.msra.mxu0 %v14714_v4  ;;  %10138 = vmatprep.subr.bf16.mxu1 %v14719_v61  ;;  %v14749_v4 = vld [vmem:[#allocation7 + $0x15b4] ss:$40 sps:$4 sm:$0xff]   ;;  %v9246_v61 = vadd.f32 %v15272_v23, %v15270_v38  ;;  %v14754_v38 = vld [vmem:[#allocation7 + $0x1564] ss:$40 sps:$4 sm:$0xff]  }
 0x575   :  { %12605 = vmatprep.subr.bf16.mxu0 %v14720_v14  ;;  %v9553_v45 = vadd.f32 %v9552_v28, %v9510_v9  ;;  %v9336_v14 = vadd.f32 %v15294_v54, %v9293_v7  ;;  %v14752_v54 = vld [vmem:[#allocation7 + $0x1560] ss:$40 sps:$4 sm:$0xff]   ;;  %v14779_v7 = vld [vmem:[#allocation7 + $0x18d4] ss:$40 sps:$4 sm:$0xff]  }
 0x576   :  { %v14771_v28 = vld [vmem:[#allocation8 + $0xa8] sm:$0xff]  }
 0x577   :  { %10139 = vmatpush2.bf16.msra.mxu1 %v14717_v13  ;;  %10190 = vmatmul.mubr.bf16.vlgmr.msra.gmra.mxu0 %v15227_v18  ;;  %v14734_v18 = vld [vmem:[#allocation7 + $0xca4] ss:$40 sps:$4 sm:$0xff]   ;;  %v9549_v13 = vadd.f32 %v9548_v17, %v9506_v33  ;;  %v9379_v20 = vadd.f32 %v15302_v15, %v9336_v14  ;;  %v14765_v17 = vld [vmem:[#allocation8 + $0xf0] sm:$0xff]   ;;  %v14772_v9 = vld [vmem:[#allocation7 + $0x1420] ss:$40 sps:$4 sm:$0xff]   ;;  %v9465_v33 = vadd.f32 %v15318_v53, %v15305_v36 }
 0x578   :  { %12606 = vmatpush3.bf16.msra.mxu0 %v14721_v11  ;;  %10945 = vmatprep.mubr.bf16.mxu0 %v10264_v19  ;;  %v9596_v11 = vadd.f32 %v9595_v51, %v9553_v45  ;;  %v14775_v51 = vld [vmem:[#allocation8 + $0xe0] sm:$0xff]   ;;  %v14777_v45 = vld [vmem:[#allocation7 + $0x18d0] ss:$40 sps:$4 sm:$0xff]  }
 0x579   :  { %10140 = vmatprep.subr.bf16.mxu1 %v14724_v37  ;;  %12607 = vmatprep.subr.bf16.mxu0 %v14725_v10  ;;  %v15347_v37 = vpop.f32.mrf.mxu0  ;;  %v15349_v10 = vpop.f32.mrf.mxu1  ;;  %v9592_v19 = vadd.f32 %v9591_v6, %v9549_v13  ;;  %v14784_v13 = vld [vmem:[#allocation7 + $0x1884] ss:$40 sps:$4 sm:$0xff]   ;;  %v14782_v36 = vld [vmem:[#allocation7 + $0x1880] ss:$40 sps:$4 sm:$0xff]  }
 0x57a   :  { %v10256_v15 = vmax.f32 %v9596_v11, 0.0  ;;  %v14789_v11 = vld [vmem:[#allocation7 + $0x1834] ss:$40 sps:$4 sm:$0xff]  }
 0x57b   :  { %10141 = vmatpush2.bf16.msra.mxu1 %v14722_v43  ;;  %v14756_v43 = vld [vmem:[#allocation8] sm:$0xff]   ;;  %v15352_v2 = vpop.f32.mrf.mxu0 }
 0x57c   :  { %12608 = vmatpush3.bf16.msra.mxu0 %v14726_v1  ;;  %10142 = vmatprep.subr.bf16.mxu1 %v14729_v5  ;;  %v14759_v1 = vld [vmem:[#allocation7 + $0x1514] ss:$40 sps:$4 sm:$0xff]   ;;  %v10253_v5 = vmax.f32 %v9379_v20, 0.0  ;;  %v9508_v20 = vadd.f32 %v15320_v39, %v9465_v33  ;;  %v14787_v39 = vld [vmem:[#allocation7 + $0x1830] ss:$40 sps:$4 sm:$0xff]  }
 0x57d   :  { %12609 = vmatprep.subr.bf16.mxu0 %v14730_v58  ;;  %v15354_v58 = vpop.f32.mrf.mxu1  ;;  %v14809_v33 = vld [vmem:[#allocation7 + $0x16f4] ss:$40 sps:$4 sm:$0xff]  }
 0x57f   :  { %10143 = vmatpush2.bf16.msra.mxu1 %v14727_v21  ;;  %v14757_v21 = vld [vmem:[#allocation7 + $0x1510] ss:$40 sps:$4 sm:$0xff]   ;;  %v15358_v6 = vpop.f32.mrf.mxu1 }
 0x580   :  { %12610 = vmatpush3.bf16.msra.mxu0 %v14731_v3  ;;  %10144 = vmatprep.subr.bf16.mxu1 %v14734_v18  ;;  %v10246_v3 = vmax.f32 %v9592_v19, 0.0  ;;  %v14790_v19 = vld [vmem:[#allocation8 + $0xc8] sm:$0xff]  }
 0x581   :  { %12611 = vmatprep.subr.bf16.mxu0 %v14735_v29  ;;  %v14764_v29 = vld [vmem:[#allocation7 + $0x14c4] ss:$40 sps:$4 sm:$0xff]  }
 0x583   :  { %10145 = vmatpush2.bf16.msra.mxu1 %v14732_v26  ;;  %v15356_v26 = vpop.f32.mrf.mxu0 }
 0x584   :  { %12612 = vmatpush3.bf16.msra.mxu0 %v14736_v22  ;;  %10200 = vmatprep.subr.bf16.mxu1 %v14739_v24  ;;  %v10266_v22 = vpack.c.bf16 %v10256_v15, %v10246_v3  ;;  %v14762_v24 = vld [vmem:[#allocation7 + $0x14c0] ss:$40 sps:$4 sm:$0xff]   ;;  %v14799_v3 = vld [vmem:[#allocation7 + $0x1794] ss:$40 sps:$4 sm:$0xff]  }
 0x585   :  { %12613 = vmatprep.subr.bf16.mxu0 %v14740_v25  ;;  %v15360_v25 = vpop.f32.mrf.mxu0 }
 0x586   :  { %10147 = vmatmul.mubr.bf16.vlgmr.msra.gmra.mxu1 %v15175_v35  ;;  %v14750_v35 = vld [vmem:[#allocation8 + $0x48] sm:$0xff]  }
 0x587   :  { %10201 = vmatpush1.bf16.msra.mxu1 %v14737_v27  ;;  %10232 = vmatprep.mubr.bf16.mxu1 %v15233_v55  ;;  %v9289_v55 = vadd.f32 %v15286_v60, %v9246_v61  ;;  %v14766_v27 = vld [vmem:[#allocation8 + $0xb0] sm:$0xff]   ;;  %v15364_v40 = vpop.f32.mrf.mxu0  ;;  %v14776_v61 = vld [vmem:[#allocation8 + $0xa0] sm:$0xff]  }
 0x588   :  { %12614 = vmatpush3.bf16.msra.mxu0 %v14741_v32  ;;  %10202 = vmatprep.subr.bf16.mxu1 %v14744_v34  ;;  %v14770_v32 = vld [vmem:[#allocation8 + $0xe8] sm:$0xff]   ;;  %v15362_v34 = vpop.f32.mrf.mxu1 }
 0x589   :  { %12615 = vmatprep.subr.bf16.mxu0 %v14745_v46  ;;  %v9332_v23 = vadd.f32 %v15288_v12, %v9289_v55  ;;  %v14760_v12 = vld [vmem:[#allocation8 + $0xf8] sm:$0xff]  }
 0x58a   :  { %v14767_v46 = vld [vmem:[#allocation7 + $0x1470] ss:$40 sps:$4 sm:$0xff]   ;;  %v15366_v49 = vpop.f32.mrf.mxu1 }
 0x58b   :  { %10203 = vmatpush1.bf16.msra.mxu1 %v14742_v0  ;;  %v9375_v60 = vadd.f32 %v15296_v50, %v9332_v23  ;;  %v14761_v50 = vld [vmem:[#allocation8 + $0xb8] sm:$0xff]   ;;  %v14774_v0 = vld [vmem:[#allocation7 + $0x1424] ss:$40 sps:$4 sm:$0xff]  }
 0x58c   :  { %12616 = vmatpush3.bf16.msra.mxu0 %v14746_v62  ;;  %10204 = vmatprep.subr.bf16.mxu1 %v14749_v4  ;;  %v15368_v62 = vpop.f32.mrf.mxu0  ;;  %v15370_v4 = vpop.f32.mrf.mxu1 }
 0x58d   :  { %12617 = vmatprep.subr.bf16.mxu0 %v14750_v35  ;;  %v10243_v56 = vmax.f32 %v9375_v60, 0.0  ;;  %v14780_v35 = vld [vmem:[#allocation8 + $0xd8] sm:$0xff]  }
 0x58e   :  { %v15374_v55 = vpop.f32.mrf.mxu0  ;;  %v15376_v14 = vpop.f32.mrf.mxu1 }
 0x58f   :  { %10205 = vmatpush1.bf16.msra.mxu1 %v14747_v63  ;;  %v10263_v18 = vpack.c.bf16 %v10253_v5, %v10243_v56  ;;  %v14781_v63 = vld [vmem:[#allocation8 + $0x98] sm:$0xff]   ;;  %v14794_v5 = vld [vmem:[#allocation7 + $0x17e4] ss:$40 sps:$4 sm:$0xff]  }
 0x590   :  { %12618 = vmatpush3.bf16.msra.mxu0 %v14751_v16  ;;  %10206 = vmatprep.subr.bf16.mxu1 %v14754_v38  ;;  %v9461_v16 = vadd.f32 %v15311_v47, %v15298_v57  ;;  %v14785_v38 = vld [vmem:[#allocation8 + $0xd0] sm:$0xff]   ;;  %v15380_v23 = vpop.f32.mrf.mxu0  ;;  %v9724_v53 = vpop.f32.mrf.mxu1 }
 0x591   :  { %12619 = vmatprep.subr.bf16.mxu0 %v14755_v48  ;;  %v14786_v48 = vld [vmem:[#allocation8 + $0x90] sm:$0xff]  }
 0x592   :  { %v9504_v60 = vadd.f32 %v15314_v42, %v9461_v16  ;;  %v15385_v57 = vpop.f32.mrf.mxu0  ;;  %v15387_v47 = vpop.f32.mrf.mxu1  ;;  %v14795_v42 = vld [vmem:[#allocation8 + $0xc0] sm:$0xff]  }
 0x593   :  { %10207 = vmatpush1.bf16.msra.mxu1 %v14752_v54  ;;  %v9551_v54 = vadd.f32 %v15327_v8, %v9508_v20  ;;  %v14814_v16 = vld [vmem:[#allocation7 + $0x16a4] ss:$40 sps:$4 sm:$0xff]  }
 0x594   :  { %12620 = vmatpush3.bf16.msra.mxu0 %v14756_v43  ;;  %10208 = vmatprep.subr.bf16.mxu1 %v14759_v1  ;;  %v9547_v43 = vadd.f32 %v15323_v59, %v9504_v60  ;;  %v14791_v1 = vld [vmem:[#allocation8 + $0x88] sm:$0xff]   ;;  %v15391_v15 = vpop.f32.mrf.mxu0  ;;  %v9806_v8 = vpop.f32.mrf.mxu1  ;;  %v14796_v59 = vld [vmem:[#allocation8 + $0x80] sm:$0xff]   ;;  %v14817_v60 = vld [vmem:[#allocation8 + $0x178] sm:$0xff]  }
 0x595   :  { %12627 = vmatprep.subr.bf16.mxu0 %v14760_v12  ;;  %v9594_v12 = vadd.f32 %v15330_v31, %v9551_v54 }
 0x596   :  { %v9590_v56 = vadd.f32 %v15325_v41, %v9547_v43  ;;  %v14801_v41 = vld [vmem:[#allocation8 + $0x1b8] sm:$0xff]  }
 0x597   :  { %10209 = vmatpush1.bf16.msra.mxu1 %v14757_v21  ;;  %10946 = vmatmul.mubr.bf16.vlgmr.msra.gmra.mxu0 %v10263_v18  ;;  %v14792_v21 = vld [vmem:[#allocation7 + $0x17e0] ss:$40 sps:$4 sm:$0xff]   ;;  %v14800_v18 = vld [vmem:[#allocation8 + $0x1f8] sm:$0xff]  }
 0x598   :  { %12628 = vmatpush3.bf16.msra.mxu0 %v14761_v50  ;;  %10986 = vmatprep.mubr.bf16.mxu0 %v10266_v22  ;;  %v10255_v50 = vmax.f32 %v9594_v12, 0.0  ;;  %v10245_v31 = vmax.f32 %v9590_v56, 0.0  ;;  %v14797_v22 = vld [vmem:[#allocation7 + $0x1790] ss:$40 sps:$4 sm:$0xff]  }
 0x599   :  { %10210 = vmatprep.subr.bf16.mxu1 %v14764_v29  ;;  %12629 = vmatprep.subr.bf16.mxu0 %v14765_v17  ;;  %v15394_v29 = vpop.f32.mrf.mxu0  ;;  %v15396_v17 = vpop.f32.mrf.mxu1  ;;  %v14820_v12 = vld [vmem:[#allocation8 + $0x198] sm:$0xff]  }
 0x59b   :  { %10211 = vmatpush1.bf16.msra.mxu1 %v14762_v24  ;;  %v15398_v24 = vpop.f32.mrf.mxu0 }
 0x59c   :  { %12630 = vmatpush3.bf16.msra.mxu0 %v14766_v27  ;;  %10212 = vmatprep.subr.bf16.mxu1 %v14769_v52  ;;  %v14804_v27 = vld [vmem:[#allocation7 + $0x1744] ss:$40 sps:$4 sm:$0xff]   ;;  %v10265_v52 = vpack.c.bf16 %v10255_v50, %v10245_v31  ;;  %v14822_v31 = vld [vmem:[#allocation8 + $0x130] sm:$0xff]  }
 0x59d   :  { %12631 = vmatprep.subr.bf16.mxu0 %v14770_v32  ;;  %v9682_v32 = vadd.f32 %v15356_v26, %v15362_v34  ;;  %v14810_v26 = vld [vmem:[#allocation8 + $0x1e8] sm:$0xff]  }
 0x59f   :  { %10213 = vmatpush1.bf16.msra.mxu1 %v14767_v46  ;;  %v14805_v46 = vld [vmem:[#allocation8 + $0x1f0] sm:$0xff]  }
 0x5a0   :  { %12632 = vmatpush3.bf16.msra.mxu0 %v14771_v28  ;;  %10214 = vmatprep.subr.bf16.mxu1 %v14774_v0  ;;  %v9810_v28 = vpop.f32.mrf.mxu1  ;;  %v9678_v0 = vadd.f32 %v15347_v37, %v15354_v58  ;;  %v14811_v58 = vld [vmem:[#allocation8 + $0x1a8] sm:$0xff]  }
 0x5a1   :  { %12633 = vmatprep.subr.bf16.mxu0 %v14775_v51  ;;  %v9725_v51 = vadd.f32 %v9724_v53, %v9682_v32  ;;  %v14827_v32 = vld [vmem:[#allocation8 + $0x1c8] sm:$0xff]  }
 0x5a3   :  { %10215 = vmatpush1.bf16.msra.mxu1 %v14772_v9  ;;  %v14802_v9 = vld [vmem:[#allocation7 + $0x1740] ss:$40 sps:$4 sm:$0xff]   ;;  %v9768_v34 = vadd.f32 %v15374_v55, %v9725_v51 }
 0x5a4   :  { %12634 = vmatpush3.bf16.msra.mxu0 %v14776_v61  ;;  %10216 = vmatprep.subr.bf16.mxu1 %v14779_v7  ;;  %v9935_v61 = vpop.f32.mrf.mxu0  ;;  %v9890_v7 = vpop.f32.mrf.mxu1  ;;  %v14816_v55 = vld [vmem:[#allocation8 + $0x1a0] sm:$0xff]   ;;  %v14826_v51 = vld [vmem:[#allocation8 + $0x128] sm:$0xff]  }
 0x5a5   :  { %12635 = vmatprep.subr.bf16.mxu0 %v14780_v35  ;;  %v14806_v35 = vld [vmem:[#allocation8 + $0x1b0] sm:$0xff]   ;;  %v9811_v20 = vadd.f32 %v9810_v28, %v9768_v34  ;;  %v9891_v56 = vadd.f32 %v9890_v7, %v15380_v23  ;;  %v14829_v7 = vld [vmem:[#allocation8 + $0x160] sm:$0xff]  }
 0x5a6   :  { %v9892_v37 = vpop.f32.mrf.mxu1 }
 0x5a7   :  { %10217 = vmatpush2.bf16.msra.mxu1 %v14777_v45  ;;  %v9721_v45 = vadd.f32 %v15370_v4, %v9678_v0  ;;  %v14812_v4 = vld [vmem:[#allocation7 + $0x16a0] ss:$40 sps:$4 sm:$0xff]   ;;  %v10258_v54 = vmax.f32 %v9811_v20, 0.0  ;;  %v9934_v23 = vadd.f32 %v15398_v24, %v9891_v56 }
 0x5a8   :  { %12636 = vmatpush3.bf16.msra.mxu0 %v14781_v63  ;;  %10218 = vmatprep.subr.bf16.mxu1 %v14784_v13  ;;  %v14807_v63 = vld [vmem:[#allocation7 + $0x16f0] ss:$40 sps:$4 sm:$0xff]   ;;  %v9937_v13 = vpop.f32.mrf.mxu0  ;;  %v14831_v24 = vld [vmem:[#allocation8 + $0x1c0] sm:$0xff]   ;;  %v14846_v56 = vld [vmem:[#allocation8 + $0x228] sm:$0xff]  }
 0x5a9   :  { %12637 = vmatprep.subr.bf16.mxu0 %v14785_v38  ;;  %v9764_v38 = vadd.f32 %v15364_v40, %v9721_v45  ;;  %v14818_v40 = vld [vmem:[#allocation8 + $0x138] sm:$0xff]  }
 0x5ab   :  { %10219 = vmatpush2.bf16.msra.mxu1 %v14782_v36  ;;  %v14815_v36 = vld [vmem:[#allocation8 + $0x1e0] sm:$0xff]   ;;  %v9807_v53 = vadd.f32 %v9806_v8, %v9764_v38 }
 0x5ac   :  { %12638 = vmatpush3.bf16.msra.mxu0 %v14786_v48  ;;  %10220 = vmatprep.subr.bf16.mxu1 %v14789_v11  ;;  %v9939_v48 = vpop.f32.mrf.mxu0  ;;  %v9894_v11 = vpop.f32.mrf.mxu1 }
 0x5ad   :  { %12639 = vmatprep.subr.bf16.mxu0 %v14790_v19  ;;  %v14819_v19 = vld [vmem:[#allocation8 + $0x1d8] sm:$0xff]  }
 0x5af   :  { %10221 = vmatpush2.bf16.msra.mxu1 %v14787_v39  ;;  %v10248_v39 = vmax.f32 %v9807_v53, 0.0 }
 0x5b0   :  { %12640 = vmatpush3.bf16.msra.mxu0 %v14791_v1  ;;  %10222 = vmatprep.subr.bf16.mxu1 %v14794_v5  ;;  %v9893_v1 = vadd.f32 %v9892_v37, %v15385_v57  ;;  %v9896_v5 = vpop.f32.mrf.mxu1  ;;  %v14832_v37 = vld [vmem:[#allocation8 + $0x180] sm:$0xff]  }
 0x5b1   :  { %12641 = vmatprep.subr.bf16.mxu0 %v14795_v42  ;;  %v14821_v42 = vld [vmem:[#allocation8 + $0x170] sm:$0xff]   ;;  %v10268_v8 = vpack.c.bf16 %v10258_v54, %v10248_v39  ;;  %v9897_v57 = vadd.f32 %v9896_v5, %v15394_v29  ;;  %v14837_v39 = vld [vmem:[#allocation8 + $0x148] sm:$0xff]   ;;  %v14839_v5 = vld [vmem:[#allocation8 + $0x140] sm:$0xff]  }
 0x5b3   :  { %10223 = vmatpush2.bf16.msra.mxu1 %v14792_v21  ;;  %v9895_v21 = vadd.f32 %v9894_v11, %v15391_v15  ;;  %v9940_v29 = vadd.f32 %v9939_v48, %v9897_v57  ;;  %v9680_v48 = vadd.f32 %v15352_v2, %v15358_v6  ;;  %v14835_v11 = vld [vmem:[#allocation8 + $0x150] sm:$0xff]   ;;  %v14838_v2 = vld [vmem:[#allocation8 + $0x108] sm:$0xff]  }
 0x5b4   :  { %12642 = vmatpush3.bf16.msra.mxu0 %v14796_v59  ;;  %10224 = vmatprep.subr.bf16.mxu1 %v14799_v3  ;;  %v14823_v59 = vld [vmem:[#allocation8 + $0x1d0] sm:$0xff]  }
 0x5b5   :  { %12671 = vmatprep.subr.bf16.mxu0 %v14800_v18  ;;  %v9936_v18 = vadd.f32 %v9935_v61, %v9893_v1  ;;  %v14828_v61 = vld [vmem:[#allocation8 + $0x188] sm:$0xff]   ;;  %v9723_v54 = vadd.f32 %v15376_v14, %v9680_v48  ;;  %v14852_v57 = vld [vmem:[#allocation8 + $0x210] sm:$0xff]  }
 0x5b7   :  { %10225 = vmatpush2.bf16.msra.mxu1 %v14797_v22  ;;  %10987 = vmatmul.mubr.bf16.vlgmr.msra.gmra.mxu0 %v10265_v52  ;;  %v10019_v43 = vpop.f32.mrf.mxu0  ;;  %v9938_v52 = vadd.f32 %v9937_v13, %v9895_v21  ;;  %v14830_v13 = vld [vmem:[#allocation8 + $0x120] sm:$0xff]   ;;  %v9766_v1 = vadd.f32 %v15368_v62, %v9723_v54  ;;  %v14843_v62 = vld [vmem:[#allocation8 + $0x270] sm:$0xff]  }
 0x5b8   :  { %12672 = vmatpush3.bf16.msra.mxu0 %v14801_v41  ;;  %10226 = vmatprep.subr.bf16.mxu1 %v14804_v27  ;;  %v14824_v41 = vld [vmem:[#allocation8 + $0x190] sm:$0xff]   ;;  %v14825_v27 = vld [vmem:[#allocation8 + $0x168] sm:$0xff]   ;;  %v14848_v21 = vld [vmem:[#allocation8 + $0x220] sm:$0xff]  }
 0x5b9   :  { %12673 = vmatprep.subr.bf16.mxu0 %v14805_v46  ;;  %v10021_v3 = vpop.f32.mrf.mxu0 }
 0x5bb   :  { %10227 = vmatpush2.bf16.msra.mxu1 %v14802_v9  ;;  %v10023_v46 = vpop.f32.mrf.mxu0 }
 0x5bc   :  { %12674 = vmatpush3.bf16.msra.mxu0 %v14806_v35  ;;  %10228 = vmatprep.subr.bf16.mxu1 %v14809_v33 }
 0x5bd   :  { %12675 = vmatprep.subr.bf16.mxu0 %v14810_v26  ;;  %v10025_v26 = vpop.f32.mrf.mxu0 }
 0x5bf   :  { %10229 = vmatpush2.bf16.msra.mxu1 %v14807_v63 }
 0x5c0   :  { %12676 = vmatpush3.bf16.msra.mxu0 %v14811_v58  ;;  %10230 = vmatprep.subr.bf16.mxu1 %v14814_v16  ;;  %v14833_v58 = vld [vmem:[#allocation8 + $0x158] sm:$0xff]  }
 0x5c1   :  { %12677 = vmatprep.subr.bf16.mxu0 %v14815_v36 }
 0x5c3   :  { %10231 = vmatpush2.bf16.msra.mxu1 %v14812_v4  ;;  %v14834_v4 = vld [vmem:[#allocation8 + $0x118] sm:$0xff]  }
 0x5c4   :  { %12678 = vmatpush3.bf16.msra.mxu0 %v14816_v55  ;;  %12649 = vmatprep.subr.bf16.mxu1 %v14817_v60  ;;  %v9676_v60 = vadd.f32 %v15341_v30, %v15349_v10  ;;  %v14840_v10 = vld [vmem:[#allocation8 + $0x100] sm:$0xff]  }
 0x5c5   :  { %12679 = vmatprep.subr.bf16.mxu0 %v14819_v19  ;;  %v14836_v19 = vld [vmem:[#allocation8 + $0x110] sm:$0xff]  }
 0x5c6   :  { %v9976_v50 = vpop.f32.mrf.mxu1  ;;  %10233 = vmatmul.mubr.bf16.vlgmr.msra.gmra.mxu1 %v15235_v44 }
 0x5c7   :  { %12650 = vmatpush3.bf16.msra.mxu1 %v14818_v40  ;;  %11027 = vmatprep.mubr.bf16.mxu1 %v10268_v8  ;;  %v9977_v44 = vadd.f32 %v9976_v50, %v9934_v23  ;;  %v9809_v40 = vadd.f32 %v15396_v17, %v9766_v1  ;;  %v14845_v17 = vld [vmem:[#allocation8 + $0x268] sm:$0xff]   ;;  %v14851_v50 = vld [vmem:[#allocation8 + $0x250] sm:$0xff]  }
 0x5c8   :  { %v9978_v22 = vpop.f32.mrf.mxu1  ;;  %12680 = vmatpush3.bf16.msra.mxu0 %v14820_v12  ;;  %12651 = vmatprep.subr.bf16.mxu1 %v14821_v42  ;;  %v14841_v12 = vld [vmem:[#allocation8 + $0x278] sm:$0xff]  }
 0x5c9   :  { %v9979_v15 = vadd.f32 %v9978_v22, %v9936_v18  ;;  %12681 = vmatprep.subr.bf16.mxu0 %v14823_v59  ;;  %v10020_v34 = vadd.f32 %v10019_v43, %v9977_v44  ;;  %v9719_v43 = vadd.f32 %v15366_v49, %v9676_v60  ;;  %v10257_v14 = vmax.f32 %v9809_v40, 0.0  ;;  %v14842_v42 = vld [vmem:[#allocation8 + $0x238] sm:$0xff]   ;;  %v14853_v18 = vld [vmem:[#allocation8 + $0x248] sm:$0xff]   ;;  %v14855_v22 = vld [vmem:[#allocation8 + $0x240] sm:$0xff]  }
 0x5ca   :  { %v9980_v28 = vpop.f32.mrf.mxu1  ;;  %v14849_v59 = vld [vmem:[#allocation8 + $0x258] sm:$0xff]  }
 0x5cb   :  { %v9981_v0 = vadd.f32 %v9980_v28, %v9938_v52  ;;  %12652 = vmatpush3.bf16.msra.mxu1 %v14822_v31  ;;  %v10022_v35 = vadd.f32 %v10021_v3, %v9979_v15  ;;  %v10249_v36 = vmax.f32 %v10020_v34, 0.0  ;;  %v9762_v6 = vadd.f32 %v15360_v25, %v9719_v43  ;;  %v14844_v25 = vld [vmem:[#allocation8 + $0x230] sm:$0xff]   ;;  %v14850_v3 = vld [vmem:[#allocation8 + $0x218] sm:$0xff]   ;;  %v14854_v31 = vld [vmem:[#allocation8 + $0x208] sm:$0xff]  }
 0x5cc   :  { %v9982_v9 = vpop.f32.mrf.mxu1  ;;  %12682 = vmatpush3.bf16.msra.mxu0 %v14824_v41  ;;  %12653 = vmatprep.subr.bf16.mxu1 %v14825_v27  ;;  %v14856_v41 = vld [vmem:[#allocation8 + $0x200] sm:$0xff]  }
 0x5cd   :  { %v10024_v33 = vadd.f32 %v10023_v46, %v9981_v0  ;;  %v9983_v45 = vadd.f32 %v9982_v9, %v9940_v29  ;;  %12683 = vmatprep.subr.bf16.mxu0 %v14827_v32  ;;  %v10250_v16 = vmax.f32 %v10022_v35, 0.0  ;;  %v9805_v30 = vadd.f32 %v15387_v47, %v9762_v6  ;;  %v14847_v47 = vld [vmem:[#allocation8 + $0x260] sm:$0xff]  }
 0x5cf   :  { %v10026_v63 = vadd.f32 %v10025_v26, %v9983_v45  ;;  %12654 = vmatpush3.bf16.msra.mxu1 %v14826_v51  ;;  %v10259_v38 = vmax.f32 %v10024_v33, 0.0  ;;  %v10247_v49 = vmax.f32 %v9805_v30, 0.0 }
 0x5d0   :  { %12684 = vmatpush3.bf16.msra.mxu0 %v14828_v61  ;;  %12655 = vmatprep.subr.bf16.mxu1 %v14829_v7 }
 0x5d1   :  { %v10260_v20 = vmax.f32 %v10026_v63, 0.0  ;;  %12685 = vmatprep.subr.bf16.mxu0 %v14831_v24  ;;  %v10269_v55 = vpack.c.bf16 %v10259_v38, %v10249_v36  ;;  %v10267_v8 = vpack.c.bf16 %v10257_v14, %v10247_v49 }
 0x5d3   :  { %12656 = vmatpush3.bf16.msra.mxu1 %v14830_v13  ;;  %v10270_v53 = vpack.c.bf16 %v10260_v20, %v10250_v16 }
 0x5d4   :  { %12686 = vmatpush3.bf16.msra.mxu0 %v14832_v37  ;;  %12657 = vmatprep.subr.bf16.mxu1 %v14833_v58 }
 0x5d5   :  { %11068 = vmatprep.mubr.bf16.mxu0 %v10270_v53 }
 0x5d7   :  { %12658 = vmatpush3.bf16.msra.mxu1 %v14834_v4  ;;  %11069 = vmatmul.mubr.bf16.vlgmr.msra.gmra.mxu0 %v10269_v55 }
 0x5d8   :  { %12659 = vmatprep.subr.bf16.mxu1 %v14835_v11 }
 0x5db   :  { %12660 = vmatpush3.bf16.msra.mxu1 %v14836_v19 }
 0x5dc   :  { %12661 = vmatprep.subr.bf16.mxu1 %v14837_v39 }
 0x5df   :  { %12662 = vmatpush3.bf16.msra.mxu1 %v14838_v2 }
 0x5e0   :  { %12663 = vmatprep.subr.bf16.mxu1 %v14839_v5 }
 0x5e3   :  { %12664 = vmatpush3.bf16.msra.mxu1 %v14840_v10 }
 0x5e4   :  { %12693 = vmatprep.subr.bf16.mxu1 %v14841_v12 }
 0x5e6   :  { %11028 = vmatmul.mubr.bf16.vlgmr.msra.gmra.mxu1 %v10267_v8 }
 0x5e7   :  { %12694 = vmatpush3.bf16.msra.mxu1 %v14842_v42 }
 0x5e8   :  { %12695 = vmatprep.subr.bf16.mxu1 %v14843_v62 }
 0x5eb   :  { %12696 = vmatpush3.bf16.msra.mxu1 %v14844_v25 }
 0x5ec   :  { %12697 = vmatprep.subr.bf16.mxu1 %v14845_v17 }
 0x5ef   :  { %12698 = vmatpush3.bf16.msra.mxu1 %v14846_v56 }
 0x5f0   :  { %12699 = vmatprep.subr.bf16.mxu1 %v14847_v47 }
 0x5f3   :  { %12700 = vmatpush3.bf16.msra.mxu1 %v14848_v21 }
 0x5f4   :  { %12701 = vmatprep.subr.bf16.mxu1 %v14849_v59 }
 0x5f7   :  { %12702 = vmatpush3.bf16.msra.mxu1 %v14850_v3  ;;  %v10105_v15 = vpop.f32.mrf.mxu0 }
 0x5f8   :  { %12703 = vmatprep.subr.bf16.mxu1 %v14851_v50 }
 0x5f9   :  { %v10107_v32 = vpop.f32.mrf.mxu0 }
 0x5fb   :  { %12704 = vmatpush3.bf16.msra.mxu1 %v14852_v57  ;;  %v10109_v28 = vpop.f32.mrf.mxu0 }
 0x5fc   :  { %12705 = vmatprep.subr.bf16.mxu1 %v14853_v18 }
 0x5fd   :  { %v10111_v0 = vpop.f32.mrf.mxu0 }
 0x5ff   :  { %12706 = vmatpush3.bf16.msra.mxu1 %v14854_v31 }
 0x600   :  { %12707 = vmatprep.subr.bf16.mxu1 %v14855_v22 }
 0x603   :  { %12708 = vmatpush3.bf16.msra.mxu1 %v14856_v41 }
 0x606   :  { %v10062_v27 = vpop.f32.mrf.mxu1 }
 0x607   :  { %v10106_v33 = vadd.f32 %v10105_v15, %v10062_v27 }
 0x608   :  { %v10064_v23 = vpop.f32.mrf.mxu1 }
 0x609   :  { %v10108_v7 = vadd.f32 %v10107_v32, %v10064_v23 }
 0x60a   :  { %v10066_v52 = vpop.f32.mrf.mxu1 }
 0x60b   :  { %v10110_v35 = vadd.f32 %v10109_v28, %v10066_v52 }
 0x60c   :  { %v10068_v46 = vpop.f32.mrf.mxu1 }
 0x60d   :  { %v10112_v24 = vadd.f32 %v10111_v0, %v10068_v46 }
 0x637   :  { %v10191_v51 = vpop.f32.mrf.mxu0 }
 0x639   :  { %v10193_v61 = vpop.f32.mrf.mxu0 }
 0x63b   :  { %v10195_v63 = vpop.f32.mrf.mxu0 }
 0x63d   :  { %v10197_v36 = vpop.f32.mrf.mxu0 }
 0x646   :  { %v10148_v44 = vpop.f32.mrf.mxu1 }
 0x647   :  { %v10149_v13 = vadd.f32 %v10148_v44, %v10106_v33 }
 0x648   :  { %v10150_v29 = vpop.f32.mrf.mxu1 }
 0x649   :  { %v10151_v26 = vadd.f32 %v10150_v29, %v10108_v7  ;;  %v10192_v53 = vadd.f32 %v10191_v51, %v10149_v13 }
 0x64a   :  { %v10152_v9 = vpop.f32.mrf.mxu1 }
 0x64b   :  { %v10153_v34 = vadd.f32 %v10152_v9, %v10110_v35  ;;  %v10194_v38 = vadd.f32 %v10193_v61, %v10151_v26 }
 0x64c   :  { %v10154_v45 = vpop.f32.mrf.mxu1 }
 0x64d   :  { %v10155_v58 = vadd.f32 %v10154_v45, %v10112_v24  ;;  %v10196_v20 = vadd.f32 %v10195_v63, %v10153_v34 }
 0x64f   :  { %v10198_v55 = vadd.f32 %v10197_v36, %v10155_v58 }
 0x657   :  { %v12621_v5 = vpop.f32.mrf.mxu0 }
 0x659   :  { %v12622_v30 = vpop.f32.mrf.mxu0 }
 0x65a   :  { %v12623_v3 = vadd.f32 %v12622_v30, %v12621_v5 }
 0x65b   :  { %v12624_v10 = vpop.f32.mrf.mxu0 }
 0x65d   :  { %v12625_v14 = vpop.f32.mrf.mxu0 }
 0x65e   :  { %v12626_v31 = vadd.f32 %v12625_v14, %v12624_v10 }
 0x677   :  { %v12643_v12 = vpop.f32.mrf.mxu0 }
 0x679   :  { %v12644_v49 = vpop.f32.mrf.mxu0 }
 0x67a   :  { %v12645_v21 = vadd.f32 %v12644_v49, %v12643_v12 }
 0x67b   :  { %v12646_v42 = vpop.f32.mrf.mxu0 }
 0x67c   :  { %v10989_v22 = vadd.f32 %v12645_v21, %v12623_v3 }
 0x67d   :  { %v12647_v62 = vpop.f32.mrf.mxu0 }
 0x67e   :  { %v12648_v50 = vadd.f32 %v12647_v62, %v12646_v42 }
 0x680   :  { %v10992_v23 = vadd.f32 %v12648_v50, %v12626_v31 }
 0x686   :  { %v10234_v37 = vpop.f32.mrf.mxu1 }
 0x687   :  { %v10235_v60 = vadd.f32 %v10234_v37, %v10192_v53 }
 0x688   :  { %v10236_v16 = vpop.f32.mrf.mxu1 }
 0x689   :  { %v10237_v48 = vadd.f32 %v10236_v16, %v10194_v38  ;;  %v10251_v2 = vmax.f32 %v10235_v60, 0.0 }
 0x68a   :  { %v10238_v4 = vpop.f32.mrf.mxu1 }
 0x68b   :  { %v10239_v11 = vadd.f32 %v10238_v4, %v10196_v20  ;;  %v10252_v39 = vmax.f32 %v10237_v48, 0.0 }
 0x68c   :  { %v10240_v54 = vpop.f32.mrf.mxu1 }
 0x68d   :  { %v10241_v19 = vadd.f32 %v10240_v54, %v10198_v55  ;;  %v10261_v43 = vmax.f32 %v10239_v11, 0.0 }
 0x68f   :  { %v10262_v1 = vmax.f32 %v10241_v19, 0.0  ;;  %v10271_v40 = vpack.c.bf16 %v10261_v43, %v10251_v2 }
 0x691   :  { %v10272_v6 = vpack.c.bf16 %v10262_v1, %v10252_v39 }
 0x693   :  { %11109 = vmatprep.mubr.bf16.mxu1 %v10272_v6 }
 0x694   :  { %11110 = vmatmul.mubr.bf16.vlgmr.msra.gmra.mxu1 %v10271_v40 }
 0x697   :  { %v12687_v17 = vpop.f32.mrf.mxu0 }
 0x699   :  { %v12688_v47 = vpop.f32.mrf.mxu0 }
 0x69a   :  { %v12689_v46 = vadd.f32 %v12688_v47, %v12687_v17 }
 0x69b   :  { %v12690_v18 = vpop.f32.mrf.mxu0 }
 0x69d   :  { %v12691_v52 = vpop.f32.mrf.mxu0 }
 0x69e   :  { %v12692_v29 = vadd.f32 %v12691_v52, %v12690_v18 }
 0x6a6   :  { %v12665_v8 = vpop.f32.mrf.mxu1 }
 0x6a8   :  { %v12666_v25 = vpop.f32.mrf.mxu1 }
 0x6a9   :  { %v12667_v57 = vadd.f32 %v12666_v25, %v12665_v8 }
 0x6aa   :  { %v12668_v56 = vpop.f32.mrf.mxu1 }
 0x6ab   :  { %v11030_v15 = vadd.f32 %v12667_v57, %v10989_v22 }
 0x6ac   :  { %v12669_v59 = vpop.f32.mrf.mxu1 }
 0x6ad   :  { %v12670_v41 = vadd.f32 %v12669_v59, %v12668_v56  ;;  %v11071_v51 = vadd.f32 %v12689_v46, %v11030_v15 }
 0x6af   :  { %v11033_v28 = vadd.f32 %v12670_v41, %v10992_v23 }
 0x6b1   :  { %v11074_v7 = vadd.f32 %v12692_v29, %v11033_v28 }
 0x754   :  { %v12709_v27 = vpop.f32.mrf.mxu1 }
 0x756   :  { %v12710_v32 = vpop.f32.mrf.mxu1 }
 0x757   :  { %v12711_v44 = vadd.f32 %v12710_v32, %v12709_v27 }
 0x758   :  { %v12712_v0 = vpop.f32.mrf.mxu1 }
 0x759   :  { %v11112_v61 = vadd.f32 %v12711_v44, %v11071_v51 }
 0x75a   :  { %v12713_v9 = vpop.f32.mrf.mxu1 }
 0x75b   :  { %v12714_v35 = vadd.f32 %v12713_v9, %v12712_v0  ;;  %v11118_v45 = vmax.f32 %v11112_v61, 0.0 }
 0x75d   :  { %v11115_v33 = vadd.f32 %v12714_v35, %v11074_v7 }
 0x75f   :  { %v11119_v24 = vmax.f32 %v11115_v33, 0.0 }
 0x761   :  { %v12603_v26 = vpack.c.bf16 %v11119_v24, %v11118_v45 }
 0x763   :  { %12604 = vst [vmem:[#allocation10] sm:$0xff] %v12603_v26  }
 0x764   :  { %14962 = shalt.err (!%p14959_p10)
}
 0x765   :  { %11141 = dma.vmem_to_hbm [thread:$0]  %s11136_s3, 128, %s15433_s4, [#allocation4], %s14987_s9, %s14987_s9, %s14988_s10  }
 0x766   :  { %14977 = dma.done.wait [#allocation4], 128  }
 0x767   :  { %14978 = vsyncadd [#allocation4], 4294967168 }
 0x768   :  { %11145 = vsyncpa [#allocation3], 1 }
 0x769   :  { %11146 = vsyncpa [#allocation6], 1 }
 0x76a   :  { %11147 = vsyncpa [#allocation9], 1 }
 0x76b   :  { %11148 = vsyncpa [#allocation4], 1 }

</bundles_post_ra>
